<compile_context>
chip_gen: v6e
topology: v6e:2x2x1
jax: 0.10.0
libtpu: 0.0.40
codegen_flags: <defaults>
</compile_context>

<pallas_src>
import functools

import jax
import jax.numpy as jnp
from jax.experimental import pallas as pl
from jax.experimental.pallas import tpu as pltpu


# ----------------------------------------------------------------------------
# In-kernel helpers
# ----------------------------------------------------------------------------
def _ln(x, g, b, eps):
    """LayerNorm over the last axis, f32 math. x: (S, D), g/b: (1, D)."""
    mean = jnp.mean(x, axis=-1, keepdims=True)
    var = jnp.mean(jnp.square(x - mean), axis=-1, keepdims=True)
    return (x - mean) * jax.lax.rsqrt(var + eps) * g + b


# ----------------------------------------------------------------------------
# Fused encoder layer kernel:  MHA (+RoPE) -> add&LN -> FFN -> add&LN
# One grid step per batch element; all weights resident in VMEM.
# ----------------------------------------------------------------------------
def _encoder_layer_kernel(x_ref, wqkv_ref, bqkv_ref, wo_ref, bo_ref,
                          ln1g_ref, ln1b_ref, w1_ref, b1_ref, w2_ref, b2_ref,
                          ln2g_ref, ln2b_ref, cos_ref, sin_ref, rot_ref,
                          o_ref, *, num_heads, scale, causal, apply_rope,
                          act_fun, eps):
    x = x_ref[0]                                     # (S, D), input dtype
    S, D = x.shape
    Dh = D // num_heads

    # ---- fused QKV projection: one MXU pass with N = 3*D -------------------
    qkv = jnp.dot(x, wqkv_ref[...], preferred_element_type=jnp.float32)
    qkv = qkv + bqkv_ref[...]                        # (S, 3D) f32

    cos = cos_ref[...]                               # (S, Dh)
    sin = sin_ref[...]                               # (S, Dh)
    rot = rot_ref[...]                               # (Dh, Dh): x @ rot == rotate_half(x)

    if causal:
        row = jax.lax.broadcasted_iota(jnp.int32, (S, S), 0)
        col = jax.lax.broadcasted_iota(jnp.int32, (S, S), 1)
        causal_mask = col <= row

    # ---- per-head attention; concat-over-heads folded into out-projection --
    proj = jnp.zeros((S, D), jnp.float32) + bo_ref[...]
    for h in range(num_heads):                       # static unroll (H small)
        qh = qkv[:, h * Dh:(h + 1) * Dh]
        kh = qkv[:, D + h * Dh:D + (h + 1) * Dh]
        vh = qkv[:, 2 * D + h * Dh:2 * D + (h + 1) * Dh]
        if apply_rope:
            # rotate_half via a tiny constant matmul (robust, no lane concat)
            qh = qh * cos + jnp.dot(qh, rot, preferred_element_type=jnp.float32) * sin
            kh = kh * cos + jnp.dot(kh, rot, preferred_element_type=jnp.float32) * sin
        # scores = q @ k^T without materializing a transposed value
        s = jax.lax.dot_general(qh, kh, (((1,), (1,)), ((), ())),
                                preferred_element_type=jnp.float32) * scale
        if causal:
            s = jnp.where(causal_mask, s, -1e30)
        m = jnp.max(s, axis=-1, keepdims=True)
        p = jnp.exp(s - m)
        denom = jnp.sum(p, axis=-1, keepdims=True)
        oh = jnp.dot(p, vh, preferred_element_type=jnp.float32)
        oh = oh * pl.reciprocal(denom, approx=True)  # EUP slot (free-ish)
        # head's slice of the output projection: oh @ wo[h*Dh:(h+1)*Dh, :]
        proj = proj + jnp.dot(oh, wo_ref[pl.ds(h * Dh, Dh), :],
                              preferred_element_type=jnp.float32)

    # ---- residual + LayerNorm 1 (fused, f32 math) ---------------------------
    y = x.astype(jnp.float32) + proj
    y = _ln(y, ln1g_ref[...], ln1b_ref[...], eps)

    # ---- FFN (bias+activation fused) + residual + LayerNorm 2 ---------------
    h1 = jnp.dot(y, w1_ref[...], preferred_element_type=jnp.float32) + b1_ref[...]
    if act_fun == "relu":
        h1 = jnp.maximum(h1, 0.0)
    elif act_fun == "gelu":
        # matches torch.nn.GELU default (exact erf form)
        h1 = jax.nn.gelu(h1, approximate=False)
    h2 = jnp.dot(h1, w2_ref[...], preferred_element_type=jnp.float32) + b2_ref[...]
    z = y + h2
    z = _ln(z, ln2g_ref[...], ln2b_ref[...], eps)

    o_ref[0] = z.astype(o_ref.dtype)


def encoder_layer(x, p, cos, sin, rot, *, num_heads, causal, apply_rope,
                  act_fun):
    """x: (B, S, D) -> (B, S, D). One pallas_call, grid over batch."""
    B, S, D = x.shape
    Dff = p["w1"].shape[1]
    Dh = D // num_heads
    kernel = functools.partial(
        _encoder_layer_kernel, num_heads=num_heads, scale=1.0 / (Dh ** 0.5),
        causal=causal, apply_rope=apply_rope, act_fun=act_fun, eps=1e-5)

    def rep(shape):  # whole-array (weight) block, resident across grid steps
        return pl.BlockSpec(shape, lambda i: (0, 0))

    return pl.pallas_call(
        kernel,
        out_shape=jax.ShapeDtypeStruct((B, S, D), x.dtype),
        grid=(B,),
        in_specs=[
            pl.BlockSpec((1, S, D), lambda i: (i, 0, 0)),   # x
            rep((D, 3 * D)),   # wqkv (fused q|k|v)
            rep((1, 3 * D)),   # bqkv
            rep((D, D)),       # wo
            rep((1, D)),       # bo
            rep((1, D)),       # ln1_g
            rep((1, D)),       # ln1_b
            rep((D, Dff)),     # w1
            rep((1, Dff)),     # b1
            rep((Dff, D)),     # w2
            rep((1, D)),       # b2
            rep((1, D)),       # ln2_g
            rep((1, D)),       # ln2_b
            rep((S, Dh)),      # cos
            rep((S, Dh)),      # sin
            rep((Dh, Dh)),     # rot (rotate_half matrix)
        ],
        out_specs=pl.BlockSpec((1, S, D), lambda i: (i, 0, 0)),
        compiler_params=pltpu.CompilerParams(dimension_semantics=("parallel",)),
    )(x, p["wqkv"], p["bqkv"], p["wo"], p["bo"], p["ln1_g"], p["ln1_b"],
      p["w1"], p["b1"], p["w2"], p["b2"], p["ln2_g"], p["ln2_b"],
      cos, sin, rot)


# ----------------------------------------------------------------------------
# DownsamplingLayer: strided Conv1d(d_model, d_model, k=factor, stride=factor)
# == free row-major reshape + matmul (window flattening order (k, c)).
# ----------------------------------------------------------------------------
def _downsample_kernel(x_ref, w_ref, b_ref, o_ref):
    y = jnp.dot(x_ref[0], w_ref[...], preferred_element_type=jnp.float32)
    o_ref[0] = (y + b_ref[...]).astype(o_ref.dtype)


def downsampling_layer(x, p, factor):
    B, S, D = x.shape
    assert S % factor == 0
    S_out = S // factor
    xr = x.reshape(B, S_out, factor * D)   # contiguous reshape (no data movement)
    return pl.pallas_call(
        _downsample_kernel,
        out_shape=jax.ShapeDtypeStruct((B, S_out, D), x.dtype),
        grid=(B,),
        in_specs=[
            pl.BlockSpec((1, S_out, factor * D), lambda i: (i, 0, 0)),
            pl.BlockSpec((factor * D, D), lambda i: (0, 0)),
            pl.BlockSpec((1, D), lambda i: (0, 0)),
        ],
        out_specs=pl.BlockSpec((1, S_out, D), lambda i: (i, 0, 0)),
        compiler_params=pltpu.CompilerParams(dimension_semantics=("parallel",)),
    )(xr, p["w_ds"], p["b_ds"])


# ----------------------------------------------------------------------------
# Glue: rotary positional-encoding constants (hoisted, once per stage)
# ----------------------------------------------------------------------------
def _rope_constants(S, Dh):
    half = Dh // 2
    inv_freq = 1.0 / (10000.0 ** (jnp.arange(0, half, dtype=jnp.float32) / half))
    pos = jnp.arange(S, dtype=jnp.float32)
    freqs = jnp.outer(pos, inv_freq)                        # (S, half)
    emb = jnp.concatenate([freqs, freqs], axis=-1)          # (S, Dh)
    cos, sin = jnp.cos(emb), jnp.sin(emb)
    # rotate_half(x) == x @ rot  with rot = [[0, I], [-I, 0]]
    eye = jnp.eye(half, dtype=jnp.float32)
    zeros = jnp.zeros((half, half), jnp.float32)
    rot = jnp.concatenate(
        [jnp.concatenate([zeros, eye], axis=1),
         jnp.concatenate([-eye, zeros], axis=1)], axis=0)   # (Dh, Dh)
    return cos, sin, rot


# ----------------------------------------------------------------------------
# Full TighteningBlock forward
# ----------------------------------------------------------------------------
def tightening_block_forward(x, params, *, num_heads, n_layers, sizes,
                             apply_rotary_pos_enc=True, act_fun="relu",
                             inference=True, causal=False):
    del inference  # TODO(synk): dropout omitted (identity at inference).
    for i, n in enumerate(n_layers):
        S, D = x.shape[1], x.shape[2]
        cos, sin, rot = _rope_constants(S, D // num_heads)  # once per stage
        for l in range(n):
            x = encoder_layer(
                x, params["blocks"][i][l], cos, sin, rot,
                num_heads=num_heads, causal=causal,
                apply_rope=apply_rotary_pos_enc, act_fun=act_fun)
        if i < len(n_layers) - 1:
            factor = sizes[i] // sizes[i + 1]
            x = downsampling_layer(x, params["downsample"][i], factor)
    return x


# ----------------------------------------------------------------------------
# Deterministic parameter initialization
# ----------------------------------------------------------------------------
def init_params(key, d_model, d_ff, num_heads, n_layers, sizes):
    def dense(k, shape):
        return 0.02 * jax.random.normal(k, shape, dtype=jnp.float32)

    keys = iter(jax.random.split(key, 1024))
    blocks = []
    for n in n_layers:
        layers = []
        for _ in range(n):
            wq = dense(next(keys), (d_model, d_model))
            wk = dense(next(keys), (d_model, d_model))
            wv = dense(next(keys), (d_model, d_model))
            p = {
                "wqkv": jnp.concatenate([wq, wk, wv], axis=1),   # fused (D, 3D)
                "bqkv": jnp.zeros((1, 3 * d_model), jnp.float32),
                "wo": dense(next(keys), (d_model, d_model)),
                "bo": jnp.zeros((1, d_model), jnp.float32),
                "ln1_g": jnp.ones((1, d_model), jnp.float32),
                "ln1_b": jnp.zeros((1, d_model), jnp.float32),
                "w1": dense(next(keys), (d_model, d_ff)),
                "b1": jnp.zeros((1, d_ff), jnp.float32),
                "w2": dense(next(keys), (d_ff, d_model)),
                "b2": jnp.zeros((1, d_model), jnp.float32),
                "ln2_g": jnp.ones((1, d_model), jnp.float32),
                "ln2_b": jnp.zeros((1, d_model), jnp.float32),
            }
            layers.append(p)
        blocks.append(layers)

    downsample = []
    for i in range(len(n_layers) - 1):
        factor = sizes[i] // sizes[i + 1]
        # conv_w[o, c, k] laid out as w_ds[k*D + c, o]
        conv_w = dense(next(keys), (d_model, d_model, factor))
        w_ds = conv_w.transpose(2, 1, 0).reshape(factor * d_model, d_model)
        downsample.append({"w_ds": w_ds,
                           "b_ds": jnp.zeros((1, d_model), jnp.float32)})

    return {"blocks": blocks, "downsample": downsample}


# ----------------------------------------------------------------------------
if __name__ == "__main__":
    key = jax.random.PRNGKey(0)
    k_param, k_x = jax.random.split(key)

    # Small config consistent with TighteningBlock(d_model, n_layers, sizes, num_heads)
    B, d_model, num_heads = 2, 32, 4
    n_layers = [1, 1]
    sizes = [16, 8]            # seq length 16 -> downsample factor 2 -> 8
    d_ff = 4 * d_model
    S = sizes[0]

    params = init_params(k_param, d_model, d_ff, num_heads, n_layers, sizes)
    x = jax.random.normal(k_x, (B, S, d_model), dtype=jnp.float32)

    fwd = jax.jit(lambda xx, pp: tightening_block_forward(
        xx, pp, num_heads=num_heads, n_layers=tuple(n_layers),
        sizes=tuple(sizes), apply_rotary_pos_enc=True, act_fun="relu",
        inference=True, causal=False))

    out = jax.block_until_ready(fwd(x, params))
    assert out.shape == (B, sizes[-1], d_model), out.shape
    assert jnp.all(jnp.isfinite(out))
    print("KERNEL_OK")
</pallas_src>

<mosaic_0001>
module attributes {stable_mosaic.version = 11 : i64} {
  func.func @_encoder_layer_kernel(%arg0: i32, %arg1: memref<1x16x32xf32, #tpu.memory_space<vmem>>, %arg2: memref<32x96xf32, #tpu.memory_space<vmem>>, %arg3: memref<1x96xf32, #tpu.memory_space<vmem>>, %arg4: memref<32x32xf32, #tpu.memory_space<vmem>>, %arg5: memref<1x32xf32, #tpu.memory_space<vmem>>, %arg6: memref<1x32xf32, #tpu.memory_space<vmem>>, %arg7: memref<1x32xf32, #tpu.memory_space<vmem>>, %arg8: memref<32x128xf32, #tpu.memory_space<vmem>>, %arg9: memref<1x128xf32, #tpu.memory_space<vmem>>, %arg10: memref<128x32xf32, #tpu.memory_space<vmem>>, %arg11: memref<1x32xf32, #tpu.memory_space<vmem>>, %arg12: memref<1x32xf32, #tpu.memory_space<vmem>>, %arg13: memref<1x32xf32, #tpu.memory_space<vmem>>, %arg14: memref<16x8xf32, #tpu.memory_space<vmem>>, %arg15: memref<16x8xf32, #tpu.memory_space<vmem>>, %arg16: memref<8x8xf32, #tpu.memory_space<vmem>>, %arg17: memref<1x16x32xf32, #tpu.memory_space<vmem>>) attributes {dimension_semantics = [#tpu.dimension_semantics<parallel>], iteration_bounds = array<i64: 2>, scalar_prefetch = 0 : i64, scratch_operands = 0 : i64, tpu.core_type = #tpu.core_type<tc>, window_params = [{transform_indices = @transform_0, window_bounds = array<i64: 1, 16, 32>}, {pipeline_mode = #tpu.pipeline_mode<synchronous>, transform_indices = @transform_1, window_bounds = array<i64: 32, 96>}, {pipeline_mode = #tpu.pipeline_mode<synchronous>, transform_indices = @transform_2, window_bounds = array<i64: 1, 96>}, {pipeline_mode = #tpu.pipeline_mode<synchronous>, transform_indices = @transform_3, window_bounds = array<i64: 32, 32>}, {pipeline_mode = #tpu.pipeline_mode<synchronous>, transform_indices = @transform_4, window_bounds = array<i64: 1, 32>}, {pipeline_mode = #tpu.pipeline_mode<synchronous>, transform_indices = @transform_5, window_bounds = array<i64: 1, 32>}, {pipeline_mode = #tpu.pipeline_mode<synchronous>, transform_indices = @transform_6, window_bounds = array<i64: 1, 32>}, {pipeline_mode = #tpu.pipeline_mode<synchronous>, transform_indices = @transform_7, window_bounds = array<i64: 32, 128>}, {pipeline_mode = #tpu.pipeline_mode<synchronous>, transform_indices = @transform_8, window_bounds = array<i64: 1, 128>}, {pipeline_mode = #tpu.pipeline_mode<synchronous>, transform_indices = @transform_9, window_bounds = array<i64: 128, 32>}, {pipeline_mode = #tpu.pipeline_mode<synchronous>, transform_indices = @transform_10, window_bounds = array<i64: 1, 32>}, {pipeline_mode = #tpu.pipeline_mode<synchronous>, transform_indices = @transform_11, window_bounds = array<i64: 1, 32>}, {pipeline_mode = #tpu.pipeline_mode<synchronous>, transform_indices = @transform_12, window_bounds = array<i64: 1, 32>}, {pipeline_mode = #tpu.pipeline_mode<synchronous>, transform_indices = @transform_13, window_bounds = array<i64: 16, 8>}, {pipeline_mode = #tpu.pipeline_mode<synchronous>, transform_indices = @transform_14, window_bounds = array<i64: 16, 8>}, {pipeline_mode = #tpu.pipeline_mode<synchronous>, transform_indices = @transform_15, window_bounds = array<i64: 8, 8>}, {transform_indices = @transform_16, window_bounds = array<i64: 1, 16, 32>}]} {
    %c0 = arith.constant 0 : index
    %c0_0 = arith.constant 0 : index
    %c0_1 = arith.constant 0 : index
    %0 = vector.load %arg1[%c0, %c0_0, %c0_1] : memref<1x16x32xf32, #tpu.memory_space<vmem>>, vector<1x16x32xf32>
    %1 = vector.shape_cast %0 : vector<1x16x32xf32> to vector<16x32xf32>
    %c0_2 = arith.constant 0 : index
    %c0_3 = arith.constant 0 : index
    %2 = vector.load %arg2[%c0_2, %c0_3] : memref<32x96xf32, #tpu.memory_space<vmem>>, vector<32x96xf32>
    %cst = arith.constant dense<0.000000e+00> : vector<16x96xf32>
    %3 = tpu.matmul %1, %2, %cst {dimension_numbers = #tpu.dot_dimension_numbers<[1], [0], [0], [1], [0, 0, 1, 1], [], []>} : vector<16x32xf32>, vector<32x96xf32>, vector<16x96xf32> -> vector<16x96xf32>
    %c0_4 = arith.constant 0 : index
    %c0_5 = arith.constant 0 : index
    %4 = vector.load %arg3[%c0_4, %c0_5] : memref<1x96xf32, #tpu.memory_space<vmem>>, vector<1x96xf32>
    %5 = vector.broadcast %4 : vector<1x96xf32> to vector<16x96xf32>
    %6 = arith.addf %3, %5 : vector<16x96xf32>
    %c0_6 = arith.constant 0 : index
    %c0_7 = arith.constant 0 : index
    %7 = vector.load %arg14[%c0_6, %c0_7] : memref<16x8xf32, #tpu.memory_space<vmem>>, vector<16x8xf32>
    %c0_8 = arith.constant 0 : index
    %c0_9 = arith.constant 0 : index
    %8 = vector.load %arg15[%c0_8, %c0_9] : memref<16x8xf32, #tpu.memory_space<vmem>>, vector<16x8xf32>
    %c0_10 = arith.constant 0 : index
    %c0_11 = arith.constant 0 : index
    %9 = vector.load %arg16[%c0_10, %c0_11] : memref<8x8xf32, #tpu.memory_space<vmem>>, vector<8x8xf32>
    %cst_12 = arith.constant 0.000000e+00 : f32
    %10 = vector.broadcast %cst_12 : f32 to vector<16x32xf32>
    %c0_13 = arith.constant 0 : index
    %c0_14 = arith.constant 0 : index
    %11 = vector.load %arg5[%c0_13, %c0_14] : memref<1x32xf32, #tpu.memory_space<vmem>>, vector<1x32xf32>
    %12 = vector.broadcast %11 : vector<1x32xf32> to vector<16x32xf32>
    %13 = arith.addf %10, %12 : vector<16x32xf32>
    %14 = vector.extract_strided_slice %6 {offsets = [0, 0], sizes = [16, 8], strides = [1, 1]} : vector<16x96xf32> to vector<16x8xf32>
    %15 = vector.extract_strided_slice %6 {offsets = [0, 32], sizes = [16, 8], strides = [1, 1]} : vector<16x96xf32> to vector<16x8xf32>
    %16 = vector.extract_strided_slice %6 {offsets = [0, 64], sizes = [16, 8], strides = [1, 1]} : vector<16x96xf32> to vector<16x8xf32>
    %17 = arith.mulf %14, %7 : vector<16x8xf32>
    %cst_15 = arith.constant dense<0.000000e+00> : vector<16x8xf32>
    %18 = tpu.matmul %14, %9, %cst_15 {dimension_numbers = #tpu.dot_dimension_numbers<[1], [0], [0], [1], [0, 0, 1, 1], [], []>} : vector<16x8xf32>, vector<8x8xf32>, vector<16x8xf32> -> vector<16x8xf32>
    %19 = arith.mulf %18, %8 : vector<16x8xf32>
    %20 = arith.addf %17, %19 : vector<16x8xf32>
    %21 = arith.mulf %15, %7 : vector<16x8xf32>
    %cst_16 = arith.constant dense<0.000000e+00> : vector<16x8xf32>
    %22 = tpu.matmul %15, %9, %cst_16 {dimension_numbers = #tpu.dot_dimension_numbers<[1], [0], [0], [1], [0, 0, 1, 1], [], []>} : vector<16x8xf32>, vector<8x8xf32>, vector<16x8xf32> -> vector<16x8xf32>
    %23 = arith.mulf %22, %8 : vector<16x8xf32>
    %24 = arith.addf %21, %23 : vector<16x8xf32>
    %cst_17 = arith.constant dense<0.000000e+00> : vector<16x16xf32>
    %25 = tpu.matmul %20, %24, %cst_17 {dimension_numbers = #tpu.dot_dimension_numbers<[1], [1], [0], [0], [0, 0, 1, 0], [], []>} : vector<16x8xf32>, vector<16x8xf32>, vector<16x16xf32> -> vector<16x16xf32>
    %cst_18 = arith.constant 0.353553385 : f32
    %26 = vector.broadcast %cst_18 : f32 to vector<16x16xf32>
    %27 = arith.mulf %25, %26 : vector<16x16xf32>
    %cst_19 = arith.constant dense<0xFF800000> : vector<16xf32>
    %28 = vector.multi_reduction <maximumf>, %27, %cst_19 [1] : vector<16x16xf32> to vector<16xf32>
    %29 = vector.shape_cast %28 : vector<16xf32> to vector<16x1xf32>
    %30 = vector.broadcast %29 : vector<16x1xf32> to vector<16x16xf32>
    %31 = arith.subf %27, %30 : vector<16x16xf32>
    %32 = math.exp %31 : vector<16x16xf32>
    %cst_20 = arith.constant dense<0.000000e+00> : vector<16xf32>
    %33 = vector.multi_reduction <add>, %32, %cst_20 [1] : vector<16x16xf32> to vector<16xf32>
    %34 = vector.shape_cast %33 : vector<16xf32> to vector<16x1xf32>
    %cst_21 = arith.constant dense<0.000000e+00> : vector<16x8xf32>
    %35 = tpu.matmul %32, %16, %cst_21 {dimension_numbers = #tpu.dot_dimension_numbers<[1], [0], [0], [1], [0, 0, 1, 1], [], []>} : vector<16x16xf32>, vector<16x8xf32>, vector<16x8xf32> -> vector<16x8xf32>
    %36 = tpu.reciprocal %34 {approx = true} : vector<16x1xf32> -> vector<16x1xf32>
    %37 = vector.broadcast %36 : vector<16x1xf32> to vector<16x8xf32>
    %38 = arith.mulf %35, %37 : vector<16x8xf32>
    %c0_22 = arith.constant 0 : index
    %c0_23 = arith.constant 0 : index
    %39 = vector.load %arg4[%c0_22, %c0_23] : memref<32x32xf32, #tpu.memory_space<vmem>>, vector<8x32xf32>
    %cst_24 = arith.constant dense<0.000000e+00> : vector<16x32xf32>
    %40 = tpu.matmul %38, %39, %cst_24 {dimension_numbers = #tpu.dot_dimension_numbers<[1], [0], [0], [1], [0, 0, 1, 1], [], []>} : vector<16x8xf32>, vector<8x32xf32>, vector<16x32xf32> -> vector<16x32xf32>
    %41 = arith.addf %13, %40 : vector<16x32xf32>
    %42 = vector.extract_strided_slice %6 {offsets = [0, 8], sizes = [16, 8], strides = [1, 1]} : vector<16x96xf32> to vector<16x8xf32>
    %43 = vector.extract_strided_slice %6 {offsets = [0, 40], sizes = [16, 8], strides = [1, 1]} : vector<16x96xf32> to vector<16x8xf32>
    %44 = vector.extract_strided_slice %6 {offsets = [0, 72], sizes = [16, 8], strides = [1, 1]} : vector<16x96xf32> to vector<16x8xf32>
    %45 = arith.mulf %42, %7 : vector<16x8xf32>
    %cst_25 = arith.constant dense<0.000000e+00> : vector<16x8xf32>
    %46 = tpu.matmul %42, %9, %cst_25 {dimension_numbers = #tpu.dot_dimension_numbers<[1], [0], [0], [1], [0, 0, 1, 1], [], []>} : vector<16x8xf32>, vector<8x8xf32>, vector<16x8xf32> -> vector<16x8xf32>
    %47 = arith.mulf %46, %8 : vector<16x8xf32>
    %48 = arith.addf %45, %47 : vector<16x8xf32>
    %49 = arith.mulf %43, %7 : vector<16x8xf32>
    %cst_26 = arith.constant dense<0.000000e+00> : vector<16x8xf32>
    %50 = tpu.matmul %43, %9, %cst_26 {dimension_numbers = #tpu.dot_dimension_numbers<[1], [0], [0], [1], [0, 0, 1, 1], [], []>} : vector<16x8xf32>, vector<8x8xf32>, vector<16x8xf32> -> vector<16x8xf32>
    %51 = arith.mulf %50, %8 : vector<16x8xf32>
    %52 = arith.addf %49, %51 : vector<16x8xf32>
    %cst_27 = arith.constant dense<0.000000e+00> : vector<16x16xf32>
    %53 = tpu.matmul %48, %52, %cst_27 {dimension_numbers = #tpu.dot_dimension_numbers<[1], [1], [0], [0], [0, 0, 1, 0], [], []>} : vector<16x8xf32>, vector<16x8xf32>, vector<16x16xf32> -> vector<16x16xf32>
    %cst_28 = arith.constant 0.353553385 : f32
    %54 = vector.broadcast %cst_28 : f32 to vector<16x16xf32>
    %55 = arith.mulf %53, %54 : vector<16x16xf32>
    %cst_29 = arith.constant dense<0xFF800000> : vector<16xf32>
    %56 = vector.multi_reduction <maximumf>, %55, %cst_29 [1] : vector<16x16xf32> to vector<16xf32>
    %57 = vector.shape_cast %56 : vector<16xf32> to vector<16x1xf32>
    %58 = vector.broadcast %57 : vector<16x1xf32> to vector<16x16xf32>
    %59 = arith.subf %55, %58 : vector<16x16xf32>
    %60 = math.exp %59 : vector<16x16xf32>
    %cst_30 = arith.constant dense<0.000000e+00> : vector<16xf32>
    %61 = vector.multi_reduction <add>, %60, %cst_30 [1] : vector<16x16xf32> to vector<16xf32>
    %62 = vector.shape_cast %61 : vector<16xf32> to vector<16x1xf32>
    %cst_31 = arith.constant dense<0.000000e+00> : vector<16x8xf32>
    %63 = tpu.matmul %60, %44, %cst_31 {dimension_numbers = #tpu.dot_dimension_numbers<[1], [0], [0], [1], [0, 0, 1, 1], [], []>} : vector<16x16xf32>, vector<16x8xf32>, vector<16x8xf32> -> vector<16x8xf32>
    %64 = tpu.reciprocal %62 {approx = true} : vector<16x1xf32> -> vector<16x1xf32>
    %65 = vector.broadcast %64 : vector<16x1xf32> to vector<16x8xf32>
    %66 = arith.mulf %63, %65 : vector<16x8xf32>
    %c8 = arith.constant 8 : index
    %c0_32 = arith.constant 0 : index
    %67 = vector.load %arg4[%c8, %c0_32] : memref<32x32xf32, #tpu.memory_space<vmem>>, vector<8x32xf32>
    %cst_33 = arith.constant dense<0.000000e+00> : vector<16x32xf32>
    %68 = tpu.matmul %66, %67, %cst_33 {dimension_numbers = #tpu.dot_dimension_numbers<[1], [0], [0], [1], [0, 0, 1, 1], [], []>} : vector<16x8xf32>, vector<8x32xf32>, vector<16x32xf32> -> vector<16x32xf32>
    %69 = arith.addf %41, %68 : vector<16x32xf32>
    %70 = vector.extract_strided_slice %6 {offsets = [0, 16], sizes = [16, 8], strides = [1, 1]} : vector<16x96xf32> to vector<16x8xf32>
    %71 = vector.extract_strided_slice %6 {offsets = [0, 48], sizes = [16, 8], strides = [1, 1]} : vector<16x96xf32> to vector<16x8xf32>
    %72 = vector.extract_strided_slice %6 {offsets = [0, 80], sizes = [16, 8], strides = [1, 1]} : vector<16x96xf32> to vector<16x8xf32>
    %73 = arith.mulf %70, %7 : vector<16x8xf32>
    %cst_34 = arith.constant dense<0.000000e+00> : vector<16x8xf32>
    %74 = tpu.matmul %70, %9, %cst_34 {dimension_numbers = #tpu.dot_dimension_numbers<[1], [0], [0], [1], [0, 0, 1, 1], [], []>} : vector<16x8xf32>, vector<8x8xf32>, vector<16x8xf32> -> vector<16x8xf32>
    %75 = arith.mulf %74, %8 : vector<16x8xf32>
    %76 = arith.addf %73, %75 : vector<16x8xf32>
    %77 = arith.mulf %71, %7 : vector<16x8xf32>
    %cst_35 = arith.constant dense<0.000000e+00> : vector<16x8xf32>
    %78 = tpu.matmul %71, %9, %cst_35 {dimension_numbers = #tpu.dot_dimension_numbers<[1], [0], [0], [1], [0, 0, 1, 1], [], []>} : vector<16x8xf32>, vector<8x8xf32>, vector<16x8xf32> -> vector<16x8xf32>
    %79 = arith.mulf %78, %8 : vector<16x8xf32>
    %80 = arith.addf %77, %79 : vector<16x8xf32>
    %cst_36 = arith.constant dense<0.000000e+00> : vector<16x16xf32>
    %81 = tpu.matmul %76, %80, %cst_36 {dimension_numbers = #tpu.dot_dimension_numbers<[1], [1], [0], [0], [0, 0, 1, 0], [], []>} : vector<16x8xf32>, vector<16x8xf32>, vector<16x16xf32> -> vector<16x16xf32>
    %cst_37 = arith.constant 0.353553385 : f32
    %82 = vector.broadcast %cst_37 : f32 to vector<16x16xf32>
    %83 = arith.mulf %81, %82 : vector<16x16xf32>
    %cst_38 = arith.constant dense<0xFF800000> : vector<16xf32>
    %84 = vector.multi_reduction <maximumf>, %83, %cst_38 [1] : vector<16x16xf32> to vector<16xf32>
    %85 = vector.shape_cast %84 : vector<16xf32> to vector<16x1xf32>
    %86 = vector.broadcast %85 : vector<16x1xf32> to vector<16x16xf32>
    %87 = arith.subf %83, %86 : vector<16x16xf32>
    %88 = math.exp %87 : vector<16x16xf32>
    %cst_39 = arith.constant dense<0.000000e+00> : vector<16xf32>
    %89 = vector.multi_reduction <add>, %88, %cst_39 [1] : vector<16x16xf32> to vector<16xf32>
    %90 = vector.shape_cast %89 : vector<16xf32> to vector<16x1xf32>
    %cst_40 = arith.constant dense<0.000000e+00> : vector<16x8xf32>
    %91 = tpu.matmul %88, %72, %cst_40 {dimension_numbers = #tpu.dot_dimension_numbers<[1], [0], [0], [1], [0, 0, 1, 1], [], []>} : vector<16x16xf32>, vector<16x8xf32>, vector<16x8xf32> -> vector<16x8xf32>
    %92 = tpu.reciprocal %90 {approx = true} : vector<16x1xf32> -> vector<16x1xf32>
    %93 = vector.broadcast %92 : vector<16x1xf32> to vector<16x8xf32>
    %94 = arith.mulf %91, %93 : vector<16x8xf32>
    %c16 = arith.constant 16 : index
    %c0_41 = arith.constant 0 : index
    %95 = vector.load %arg4[%c16, %c0_41] : memref<32x32xf32, #tpu.memory_space<vmem>>, vector<8x32xf32>
    %cst_42 = arith.constant dense<0.000000e+00> : vector<16x32xf32>
    %96 = tpu.matmul %94, %95, %cst_42 {dimension_numbers = #tpu.dot_dimension_numbers<[1], [0], [0], [1], [0, 0, 1, 1], [], []>} : vector<16x8xf32>, vector<8x32xf32>, vector<16x32xf32> -> vector<16x32xf32>
    %97 = arith.addf %69, %96 : vector<16x32xf32>
    %98 = vector.extract_strided_slice %6 {offsets = [0, 24], sizes = [16, 8], strides = [1, 1]} : vector<16x96xf32> to vector<16x8xf32>
    %99 = vector.extract_strided_slice %6 {offsets = [0, 56], sizes = [16, 8], strides = [1, 1]} : vector<16x96xf32> to vector<16x8xf32>
    %100 = vector.extract_strided_slice %6 {offsets = [0, 88], sizes = [16, 8], strides = [1, 1]} : vector<16x96xf32> to vector<16x8xf32>
    %101 = arith.mulf %98, %7 : vector<16x8xf32>
    %cst_43 = arith.constant dense<0.000000e+00> : vector<16x8xf32>
    %102 = tpu.matmul %98, %9, %cst_43 {dimension_numbers = #tpu.dot_dimension_numbers<[1], [0], [0], [1], [0, 0, 1, 1], [], []>} : vector<16x8xf32>, vector<8x8xf32>, vector<16x8xf32> -> vector<16x8xf32>
    %103 = arith.mulf %102, %8 : vector<16x8xf32>
    %104 = arith.addf %101, %103 : vector<16x8xf32>
    %105 = arith.mulf %99, %7 : vector<16x8xf32>
    %cst_44 = arith.constant dense<0.000000e+00> : vector<16x8xf32>
    %106 = tpu.matmul %99, %9, %cst_44 {dimension_numbers = #tpu.dot_dimension_numbers<[1], [0], [0], [1], [0, 0, 1, 1], [], []>} : vector<16x8xf32>, vector<8x8xf32>, vector<16x8xf32> -> vector<16x8xf32>
    %107 = arith.mulf %106, %8 : vector<16x8xf32>
    %108 = arith.addf %105, %107 : vector<16x8xf32>
    %cst_45 = arith.constant dense<0.000000e+00> : vector<16x16xf32>
    %109 = tpu.matmul %104, %108, %cst_45 {dimension_numbers = #tpu.dot_dimension_numbers<[1], [1], [0], [0], [0, 0, 1, 0], [], []>} : vector<16x8xf32>, vector<16x8xf32>, vector<16x16xf32> -> vector<16x16xf32>
    %cst_46 = arith.constant 0.353553385 : f32
    %110 = vector.broadcast %cst_46 : f32 to vector<16x16xf32>
    %111 = arith.mulf %109, %110 : vector<16x16xf32>
    %cst_47 = arith.constant dense<0xFF800000> : vector<16xf32>
    %112 = vector.multi_reduction <maximumf>, %111, %cst_47 [1] : vector<16x16xf32> to vector<16xf32>
    %113 = vector.shape_cast %112 : vector<16xf32> to vector<16x1xf32>
    %114 = vector.broadcast %113 : vector<16x1xf32> to vector<16x16xf32>
    %115 = arith.subf %111, %114 : vector<16x16xf32>
    %116 = math.exp %115 : vector<16x16xf32>
    %cst_48 = arith.constant dense<0.000000e+00> : vector<16xf32>
    %117 = vector.multi_reduction <add>, %116, %cst_48 [1] : vector<16x16xf32> to vector<16xf32>
    %118 = vector.shape_cast %117 : vector<16xf32> to vector<16x1xf32>
    %cst_49 = arith.constant dense<0.000000e+00> : vector<16x8xf32>
    %119 = tpu.matmul %116, %100, %cst_49 {dimension_numbers = #tpu.dot_dimension_numbers<[1], [0], [0], [1], [0, 0, 1, 1], [], []>} : vector<16x16xf32>, vector<16x8xf32>, vector<16x8xf32> -> vector<16x8xf32>
    %120 = tpu.reciprocal %118 {approx = true} : vector<16x1xf32> -> vector<16x1xf32>
    %121 = vector.broadcast %120 : vector<16x1xf32> to vector<16x8xf32>
    %122 = arith.mulf %119, %121 : vector<16x8xf32>
    %c24 = arith.constant 24 : index
    %c0_50 = arith.constant 0 : index
    %123 = vector.load %arg4[%c24, %c0_50] : memref<32x32xf32, #tpu.memory_space<vmem>>, vector<8x32xf32>
    %cst_51 = arith.constant dense<0.000000e+00> : vector<16x32xf32>
    %124 = tpu.matmul %122, %123, %cst_51 {dimension_numbers = #tpu.dot_dimension_numbers<[1], [0], [0], [1], [0, 0, 1, 1], [], []>} : vector<16x8xf32>, vector<8x32xf32>, vector<16x32xf32> -> vector<16x32xf32>
    %125 = arith.addf %97, %124 : vector<16x32xf32>
    %126 = arith.addf %1, %125 : vector<16x32xf32>
    %c0_52 = arith.constant 0 : index
    %c0_53 = arith.constant 0 : index
    %127 = vector.load %arg6[%c0_52, %c0_53] : memref<1x32xf32, #tpu.memory_space<vmem>>, vector<1x32xf32>
    %c0_54 = arith.constant 0 : index
    %c0_55 = arith.constant 0 : index
    %128 = vector.load %arg7[%c0_54, %c0_55] : memref<1x32xf32, #tpu.memory_space<vmem>>, vector<1x32xf32>
    %cst_56 = arith.constant dense<0.000000e+00> : vector<16xf32>
    %129 = vector.multi_reduction <add>, %126, %cst_56 [1] : vector<16x32xf32> to vector<16xf32>
    %130 = vector.shape_cast %129 : vector<16xf32> to vector<16x1xf32>
    %cst_57 = arith.constant 3.200000e+01 : f32
    %131 = vector.broadcast %cst_57 : f32 to vector<16x1xf32>
    %132 = arith.divf %130, %131 : vector<16x1xf32>
    %133 = vector.broadcast %132 : vector<16x1xf32> to vector<16x32xf32>
    %134 = arith.subf %126, %133 : vector<16x32xf32>
    %135 = arith.mulf %134, %134 : vector<16x32xf32>
    %cst_58 = arith.constant dense<0.000000e+00> : vector<16xf32>
    %136 = vector.multi_reduction <add>, %135, %cst_58 [1] : vector<16x32xf32> to vector<16xf32>
    %137 = vector.shape_cast %136 : vector<16xf32> to vector<16x1xf32>
    %cst_59 = arith.constant 3.200000e+01 : f32
    %138 = vector.broadcast %cst_59 : f32 to vector<16x1xf32>
    %139 = arith.divf %137, %138 : vector<16x1xf32>
    %140 = vector.broadcast %132 : vector<16x1xf32> to vector<16x32xf32>
    %141 = arith.subf %126, %140 : vector<16x32xf32>
    %cst_60 = arith.constant 9.99999974E-6 : f32
    %142 = vector.broadcast %cst_60 : f32 to vector<16x1xf32>
    %143 = arith.addf %139, %142 : vector<16x1xf32>
    %144 = math.rsqrt %143 : vector<16x1xf32>
    %145 = vector.broadcast %144 : vector<16x1xf32> to vector<16x32xf32>
    %146 = arith.mulf %141, %145 : vector<16x32xf32>
    %147 = vector.broadcast %127 : vector<1x32xf32> to vector<16x32xf32>
    %148 = arith.mulf %146, %147 : vector<16x32xf32>
    %149 = vector.broadcast %128 : vector<1x32xf32> to vector<16x32xf32>
    %150 = arith.addf %148, %149 : vector<16x32xf32>
    %c0_61 = arith.constant 0 : index
    %c0_62 = arith.constant 0 : index
    %151 = vector.load %arg8[%c0_61, %c0_62] : memref<32x128xf32, #tpu.memory_space<vmem>>, vector<32x128xf32>
    %cst_63 = arith.constant dense<0.000000e+00> : vector<16x128xf32>
    %152 = tpu.matmul %150, %151, %cst_63 {dimension_numbers = #tpu.dot_dimension_numbers<[1], [0], [0], [1], [0, 0, 1, 1], [], []>} : vector<16x32xf32>, vector<32x128xf32>, vector<16x128xf32> -> vector<16x128xf32>
    %c0_64 = arith.constant 0 : index
    %c0_65 = arith.constant 0 : index
    %153 = vector.load %arg9[%c0_64, %c0_65] : memref<1x128xf32, #tpu.memory_space<vmem>>, vector<1x128xf32>
    %154 = vector.broadcast %153 : vector<1x128xf32> to vector<16x128xf32>
    %155 = arith.addf %152, %154 : vector<16x128xf32>
    %cst_66 = arith.constant 0.000000e+00 : f32
    %156 = vector.broadcast %cst_66 : f32 to vector<16x128xf32>
    %157 = arith.maximumf %155, %156 : vector<16x128xf32>
    %c0_67 = arith.constant 0 : index
    %c0_68 = arith.constant 0 : index
    %158 = vector.load %arg10[%c0_67, %c0_68] : memref<128x32xf32, #tpu.memory_space<vmem>>, vector<128x32xf32>
    %cst_69 = arith.constant dense<0.000000e+00> : vector<16x32xf32>
    %159 = tpu.matmul %157, %158, %cst_69 {dimension_numbers = #tpu.dot_dimension_numbers<[1], [0], [0], [1], [0, 0, 1, 1], [], []>} : vector<16x128xf32>, vector<128x32xf32>, vector<16x32xf32> -> vector<16x32xf32>
    %c0_70 = arith.constant 0 : index
    %c0_71 = arith.constant 0 : index
    %160 = vector.load %arg11[%c0_70, %c0_71] : memref<1x32xf32, #tpu.memory_space<vmem>>, vector<1x32xf32>
    %161 = vector.broadcast %160 : vector<1x32xf32> to vector<16x32xf32>
    %162 = arith.addf %159, %161 : vector<16x32xf32>
    %163 = arith.addf %150, %162 : vector<16x32xf32>
    %c0_72 = arith.constant 0 : index
    %c0_73 = arith.constant 0 : index
    %164 = vector.load %arg12[%c0_72, %c0_73] : memref<1x32xf32, #tpu.memory_space<vmem>>, vector<1x32xf32>
    %c0_74 = arith.constant 0 : index
    %c0_75 = arith.constant 0 : index
    %165 = vector.load %arg13[%c0_74, %c0_75] : memref<1x32xf32, #tpu.memory_space<vmem>>, vector<1x32xf32>
    %cst_76 = arith.constant dense<0.000000e+00> : vector<16xf32>
    %166 = vector.multi_reduction <add>, %163, %cst_76 [1] : vector<16x32xf32> to vector<16xf32>
    %167 = vector.shape_cast %166 : vector<16xf32> to vector<16x1xf32>
    %cst_77 = arith.constant 3.200000e+01 : f32
    %168 = vector.broadcast %cst_77 : f32 to vector<16x1xf32>
    %169 = arith.divf %167, %168 : vector<16x1xf32>
    %170 = vector.broadcast %169 : vector<16x1xf32> to vector<16x32xf32>
    %171 = arith.subf %163, %170 : vector<16x32xf32>
    %172 = arith.mulf %171, %171 : vector<16x32xf32>
    %cst_78 = arith.constant dense<0.000000e+00> : vector<16xf32>
    %173 = vector.multi_reduction <add>, %172, %cst_78 [1] : vector<16x32xf32> to vector<16xf32>
    %174 = vector.shape_cast %173 : vector<16xf32> to vector<16x1xf32>
    %cst_79 = arith.constant 3.200000e+01 : f32
    %175 = vector.broadcast %cst_79 : f32 to vector<16x1xf32>
    %176 = arith.divf %174, %175 : vector<16x1xf32>
    %177 = vector.broadcast %169 : vector<16x1xf32> to vector<16x32xf32>
    %178 = arith.subf %163, %177 : vector<16x32xf32>
    %cst_80 = arith.constant 9.99999974E-6 : f32
    %179 = vector.broadcast %cst_80 : f32 to vector<16x1xf32>
    %180 = arith.addf %176, %179 : vector<16x1xf32>
    %181 = math.rsqrt %180 : vector<16x1xf32>
    %182 = vector.broadcast %181 : vector<16x1xf32> to vector<16x32xf32>
    %183 = arith.mulf %178, %182 : vector<16x32xf32>
    %184 = vector.broadcast %164 : vector<1x32xf32> to vector<16x32xf32>
    %185 = arith.mulf %183, %184 : vector<16x32xf32>
    %186 = vector.broadcast %165 : vector<1x32xf32> to vector<16x32xf32>
    %187 = arith.addf %185, %186 : vector<16x32xf32>
    %c0_81 = arith.constant 0 : index
    %c0_82 = arith.constant 0 : index
    %c0_83 = arith.constant 0 : index
    %188 = vector.load %arg17[%c0_81, %c0_82, %c0_83] : memref<1x16x32xf32, #tpu.memory_space<vmem>>, vector<1x16x32xf32>
    %189 = vector.shape_cast %188 : vector<1x16x32xf32> to vector<16x32xf32>
    %190 = vector.shape_cast %187 : vector<16x32xf32> to vector<1x16x32xf32>
    tpu.vector_store %arg17[%c0_81, %c0_82, %c0_83], %190 {strides = array<i32>} : memref<1x16x32xf32, #tpu.memory_space<vmem>>, vector<1x16x32xf32>,
    return
  }
  func.func @transform_0(%arg0: i32) -> (i32, i32, i32) {
    %c0_i32 = arith.constant 0 : i32
    %c0_i32_0 = arith.constant 0 : i32
    %c0_i32_1 = arith.constant 0 : i32
    return %arg0, %c0_i32, %c0_i32_0 : i32, i32, i32
  }
  func.func @transform_1(%arg0: i32) -> (i32, i32) {
    %c0_i32 = arith.constant 0 : i32
    %c0_i32_0 = arith.constant 0 : i32
    %c0_i32_1 = arith.constant 0 : i32
    return %c0_i32, %c0_i32_0 : i32, i32
  }
  func.func @transform_2(%arg0: i32) -> (i32, i32) {
    %c0_i32 = arith.constant 0 : i32
    %c0_i32_0 = arith.constant 0 : i32
    %c0_i32_1 = arith.constant 0 : i32
    return %c0_i32, %c0_i32_0 : i32, i32
  }
  func.func @transform_3(%arg0: i32) -> (i32, i32) {
    %c0_i32 = arith.constant 0 : i32
    %c0_i32_0 = arith.constant 0 : i32
    %c0_i32_1 = arith.constant 0 : i32
    return %c0_i32, %c0_i32_0 : i32, i32
  }
  func.func @transform_4(%arg0: i32) -> (i32, i32) {
    %c0_i32 = arith.constant 0 : i32
    %c0_i32_0 = arith.constant 0 : i32
    %c0_i32_1 = arith.constant 0 : i32
    return %c0_i32, %c0_i32_0 : i32, i32
  }
  func.func @transform_5(%arg0: i32) -> (i32, i32) {
    %c0_i32 = arith.constant 0 : i32
    %c0_i32_0 = arith.constant 0 : i32
    %c0_i32_1 = arith.constant 0 : i32
    return %c0_i32, %c0_i32_0 : i32, i32
  }
  func.func @transform_6(%arg0: i32) -> (i32, i32) {
    %c0_i32 = arith.constant 0 : i32
    %c0_i32_0 = arith.constant 0 : i32
    %c0_i32_1 = arith.constant 0 : i32
    return %c0_i32, %c0_i32_0 : i32, i32
  }
  func.func @transform_7(%arg0: i32) -> (i32, i32) {
    %c0_i32 = arith.constant 0 : i32
    %c0_i32_0 = arith.constant 0 : i32
    %c0_i32_1 = arith.constant 0 : i32
    return %c0_i32, %c0_i32_0 : i32, i32
  }
  func.func @transform_8(%arg0: i32) -> (i32, i32) {
    %c0_i32 = arith.constant 0 : i32
    %c0_i32_0 = arith.constant 0 : i32
    %c0_i32_1 = arith.constant 0 : i32
    return %c0_i32, %c0_i32_0 : i32, i32
  }
  func.func @transform_9(%arg0: i32) -> (i32, i32) {
    %c0_i32 = arith.constant 0 : i32
    %c0_i32_0 = arith.constant 0 : i32
    %c0_i32_1 = arith.constant 0 : i32
    return %c0_i32, %c0_i32_0 : i32, i32
  }
  func.func @transform_10(%arg0: i32) -> (i32, i32) {
    %c0_i32 = arith.constant 0 : i32
    %c0_i32_0 = arith.constant 0 : i32
    %c0_i32_1 = arith.constant 0 : i32
    return %c0_i32, %c0_i32_0 : i32, i32
  }
  func.func @transform_11(%arg0: i32) -> (i32, i32) {
    %c0_i32 = arith.constant 0 : i32
    %c0_i32_0 = arith.constant 0 : i32
    %c0_i32_1 = arith.constant 0 : i32
    return %c0_i32, %c0_i32_0 : i32, i32
  }
  func.func @transform_12(%arg0: i32) -> (i32, i32) {
    %c0_i32 = arith.constant 0 : i32
    %c0_i32_0 = arith.constant 0 : i32
    %c0_i32_1 = arith.constant 0 : i32
    return %c0_i32, %c0_i32_0 : i32, i32
  }
  func.func @transform_13(%arg0: i32) -> (i32, i32) {
    %c0_i32 = arith.constant 0 : i32
    %c0_i32_0 = arith.constant 0 : i32
    %c0_i32_1 = arith.constant 0 : i32
    return %c0_i32, %c0_i32_0 : i32, i32
  }
  func.func @transform_14(%arg0: i32) -> (i32, i32) {
    %c0_i32 = arith.constant 0 : i32
    %c0_i32_0 = arith.constant 0 : i32
    %c0_i32_1 = arith.constant 0 : i32
    return %c0_i32, %c0_i32_0 : i32, i32
  }
  func.func @transform_15(%arg0: i32) -> (i32, i32) {
    %c0_i32 = arith.constant 0 : i32
    %c0_i32_0 = arith.constant 0 : i32
    %c0_i32_1 = arith.constant 0 : i32
    return %c0_i32, %c0_i32_0 : i32, i32
  }
  func.func @transform_16(%arg0: i32) -> (i32, i32, i32) {
    %c0_i32 = arith.constant 0 : i32
    %c0_i32_0 = arith.constant 0 : i32
    %c0_i32_1 = arith.constant 0 : i32
    return %arg0, %c0_i32, %c0_i32_0 : i32, i32, i32
  }
}

module attributes {stable_mosaic.version = 11 : i64} {
  func.func @_downsample_kernel(%arg0: i32, %arg1: memref<1x8x64xf32, #tpu.memory_space<vmem>>, %arg2: memref<64x32xf32, #tpu.memory_space<vmem>>, %arg3: memref<1x32xf32, #tpu.memory_space<vmem>>, %arg4: memref<1x8x32xf32, #tpu.memory_space<vmem>>) attributes {dimension_semantics = [#tpu.dimension_semantics<parallel>], iteration_bounds = array<i64: 2>, scalar_prefetch = 0 : i64, scratch_operands = 0 : i64, tpu.core_type = #tpu.core_type<tc>, window_params = [{transform_indices = @transform_0, window_bounds = array<i64: 1, 8, 64>}, {pipeline_mode = #tpu.pipeline_mode<synchronous>, transform_indices = @transform_1, window_bounds = array<i64: 64, 32>}, {pipeline_mode = #tpu.pipeline_mode<synchronous>, transform_indices = @transform_2, window_bounds = array<i64: 1, 32>}, {transform_indices = @transform_3, window_bounds = array<i64: 1, 8, 32>}]} {
    %c0 = arith.constant 0 : index
    %c0_0 = arith.constant 0 : index
    %c0_1 = arith.constant 0 : index
    %0 = vector.load %arg1[%c0, %c0_0, %c0_1] : memref<1x8x64xf32, #tpu.memory_space<vmem>>, vector<1x8x64xf32>
    %1 = vector.shape_cast %0 : vector<1x8x64xf32> to vector<8x64xf32>
    %c0_2 = arith.constant 0 : index
    %c0_3 = arith.constant 0 : index
    %2 = vector.load %arg2[%c0_2, %c0_3] : memref<64x32xf32, #tpu.memory_space<vmem>>, vector<64x32xf32>
    %cst = arith.constant dense<0.000000e+00> : vector<8x32xf32>
    %3 = tpu.matmul %1, %2, %cst {dimension_numbers = #tpu.dot_dimension_numbers<[1], [0], [0], [1], [0, 0, 1, 1], [], []>} : vector<8x64xf32>, vector<64x32xf32>, vector<8x32xf32> -> vector<8x32xf32>
    %c0_4 = arith.constant 0 : index
    %c0_5 = arith.constant 0 : index
    %4 = vector.load %arg3[%c0_4, %c0_5] : memref<1x32xf32, #tpu.memory_space<vmem>>, vector<1x32xf32>
    %5 = vector.broadcast %4 : vector<1x32xf32> to vector<8x32xf32>
    %6 = arith.addf %3, %5 : vector<8x32xf32>
    %c0_6 = arith.constant 0 : index
    %c0_7 = arith.constant 0 : index
    %c0_8 = arith.constant 0 : index
    %7 = vector.load %arg4[%c0_6, %c0_7, %c0_8] : memref<1x8x32xf32, #tpu.memory_space<vmem>>, vector<1x8x32xf32>
    %8 = vector.shape_cast %7 : vector<1x8x32xf32> to vector<8x32xf32>
    %9 = vector.shape_cast %6 : vector<8x32xf32> to vector<1x8x32xf32>
    tpu.vector_store %arg4[%c0_6, %c0_7, %c0_8], %9 {strides = array<i32>} : memref<1x8x32xf32, #tpu.memory_space<vmem>>, vector<1x8x32xf32>,
    return
  }
  func.func @transform_0(%arg0: i32) -> (i32, i32, i32) {
    %c0_i32 = arith.constant 0 : i32
    %c0_i32_0 = arith.constant 0 : i32
    %c0_i32_1 = arith.constant 0 : i32
    return %arg0, %c0_i32, %c0_i32_0 : i32, i32, i32
  }
  func.func @transform_1(%arg0: i32) -> (i32, i32) {
    %c0_i32 = arith.constant 0 : i32
    %c0_i32_0 = arith.constant 0 : i32
    %c0_i32_1 = arith.constant 0 : i32
    return %c0_i32, %c0_i32_0 : i32, i32
  }
  func.func @transform_2(%arg0: i32) -> (i32, i32) {
    %c0_i32 = arith.constant 0 : i32
    %c0_i32_0 = arith.constant 0 : i32
    %c0_i32_1 = arith.constant 0 : i32
    return %c0_i32, %c0_i32_0 : i32, i32
  }
  func.func @transform_3(%arg0: i32) -> (i32, i32, i32) {
    %c0_i32 = arith.constant 0 : i32
    %c0_i32_0 = arith.constant 0 : i32
    %c0_i32_1 = arith.constant 0 : i32
    return %arg0, %c0_i32, %c0_i32_0 : i32, i32, i32
  }
}

module attributes {stable_mosaic.version = 11 : i64} {
  func.func @_encoder_layer_kernel(%arg0: i32, %arg1: memref<1x8x32xf32, #tpu.memory_space<vmem>>, %arg2: memref<32x96xf32, #tpu.memory_space<vmem>>, %arg3: memref<1x96xf32, #tpu.memory_space<vmem>>, %arg4: memref<32x32xf32, #tpu.memory_space<vmem>>, %arg5: memref<1x32xf32, #tpu.memory_space<vmem>>, %arg6: memref<1x32xf32, #tpu.memory_space<vmem>>, %arg7: memref<1x32xf32, #tpu.memory_space<vmem>>, %arg8: memref<32x128xf32, #tpu.memory_space<vmem>>, %arg9: memref<1x128xf32, #tpu.memory_space<vmem>>, %arg10: memref<128x32xf32, #tpu.memory_space<vmem>>, %arg11: memref<1x32xf32, #tpu.memory_space<vmem>>, %arg12: memref<1x32xf32, #tpu.memory_space<vmem>>, %arg13: memref<1x32xf32, #tpu.memory_space<vmem>>, %arg14: memref<8x8xf32, #tpu.memory_space<vmem>>, %arg15: memref<8x8xf32, #tpu.memory_space<vmem>>, %arg16: memref<8x8xf32, #tpu.memory_space<vmem>>, %arg17: memref<1x8x32xf32, #tpu.memory_space<vmem>>) attributes {dimension_semantics = [#tpu.dimension_semantics<parallel>], iteration_bounds = array<i64: 2>, scalar_prefetch = 0 : i64, scratch_operands = 0 : i64, tpu.core_type = #tpu.core_type<tc>, window_params = [{transform_indices = @transform_0, window_bounds = array<i64: 1, 8, 32>}, {pipeline_mode = #tpu.pipeline_mode<synchronous>, transform_indices = @transform_1, window_bounds = array<i64: 32, 96>}, {pipeline_mode = #tpu.pipeline_mode<synchronous>, transform_indices = @transform_2, window_bounds = array<i64: 1, 96>}, {pipeline_mode = #tpu.pipeline_mode<synchronous>, transform_indices = @transform_3, window_bounds = array<i64: 32, 32>}, {pipeline_mode = #tpu.pipeline_mode<synchronous>, transform_indices = @transform_4, window_bounds = array<i64: 1, 32>}, {pipeline_mode = #tpu.pipeline_mode<synchronous>, transform_indices = @transform_5, window_bounds = array<i64: 1, 32>}, {pipeline_mode = #tpu.pipeline_mode<synchronous>, transform_indices = @transform_6, window_bounds = array<i64: 1, 32>}, {pipeline_mode = #tpu.pipeline_mode<synchronous>, transform_indices = @transform_7, window_bounds = array<i64: 32, 128>}, {pipeline_mode = #tpu.pipeline_mode<synchronous>, transform_indices = @transform_8, window_bounds = array<i64: 1, 128>}, {pipeline_mode = #tpu.pipeline_mode<synchronous>, transform_indices = @transform_9, window_bounds = array<i64: 128, 32>}, {pipeline_mode = #tpu.pipeline_mode<synchronous>, transform_indices = @transform_10, window_bounds = array<i64: 1, 32>}, {pipeline_mode = #tpu.pipeline_mode<synchronous>, transform_indices = @transform_11, window_bounds = array<i64: 1, 32>}, {pipeline_mode = #tpu.pipeline_mode<synchronous>, transform_indices = @transform_12, window_bounds = array<i64: 1, 32>}, {pipeline_mode = #tpu.pipeline_mode<synchronous>, transform_indices = @transform_13, window_bounds = array<i64: 8, 8>}, {pipeline_mode = #tpu.pipeline_mode<synchronous>, transform_indices = @transform_14, window_bounds = array<i64: 8, 8>}, {pipeline_mode = #tpu.pipeline_mode<synchronous>, transform_indices = @transform_15, window_bounds = array<i64: 8, 8>}, {transform_indices = @transform_16, window_bounds = array<i64: 1, 8, 32>}]} {
    %c0 = arith.constant 0 : index
    %c0_0 = arith.constant 0 : index
    %c0_1 = arith.constant 0 : index
    %0 = vector.load %arg1[%c0, %c0_0, %c0_1] : memref<1x8x32xf32, #tpu.memory_space<vmem>>, vector<1x8x32xf32>
    %1 = vector.shape_cast %0 : vector<1x8x32xf32> to vector<8x32xf32>
    %c0_2 = arith.constant 0 : index
    %c0_3 = arith.constant 0 : index
    %2 = vector.load %arg2[%c0_2, %c0_3] : memref<32x96xf32, #tpu.memory_space<vmem>>, vector<32x96xf32>
    %cst = arith.constant dense<0.000000e+00> : vector<8x96xf32>
    %3 = tpu.matmul %1, %2, %cst {dimension_numbers = #tpu.dot_dimension_numbers<[1], [0], [0], [1], [0, 0, 1, 1], [], []>} : vector<8x32xf32>, vector<32x96xf32>, vector<8x96xf32> -> vector<8x96xf32>
    %c0_4 = arith.constant 0 : index
    %c0_5 = arith.constant 0 : index
    %4 = vector.load %arg3[%c0_4, %c0_5] : memref<1x96xf32, #tpu.memory_space<vmem>>, vector<1x96xf32>
    %5 = vector.broadcast %4 : vector<1x96xf32> to vector<8x96xf32>
    %6 = arith.addf %3, %5 : vector<8x96xf32>
    %c0_6 = arith.constant 0 : index
    %c0_7 = arith.constant 0 : index
    %7 = vector.load %arg14[%c0_6, %c0_7] : memref<8x8xf32, #tpu.memory_space<vmem>>, vector<8x8xf32>
    %c0_8 = arith.constant 0 : index
    %c0_9 = arith.constant 0 : index
    %8 = vector.load %arg15[%c0_8, %c0_9] : memref<8x8xf32, #tpu.memory_space<vmem>>, vector<8x8xf32>
    %c0_10 = arith.constant 0 : index
    %c0_11 = arith.constant 0 : index
    %9 = vector.load %arg16[%c0_10, %c0_11] : memref<8x8xf32, #tpu.memory_space<vmem>>, vector<8x8xf32>
    %cst_12 = arith.constant 0.000000e+00 : f32
    %10 = vector.broadcast %cst_12 : f32 to vector<8x32xf32>
    %c0_13 = arith.constant 0 : index
    %c0_14 = arith.constant 0 : index
    %11 = vector.load %arg5[%c0_13, %c0_14] : memref<1x32xf32, #tpu.memory_space<vmem>>, vector<1x32xf32>
    %12 = vector.broadcast %11 : vector<1x32xf32> to vector<8x32xf32>
    %13 = arith.addf %10, %12 : vector<8x32xf32>
    %14 = vector.extract_strided_slice %6 {offsets = [0, 0], sizes = [8, 8], strides = [1, 1]} : vector<8x96xf32> to vector<8x8xf32>
    %15 = vector.extract_strided_slice %6 {offsets = [0, 32], sizes = [8, 8], strides = [1, 1]} : vector<8x96xf32> to vector<8x8xf32>
    %16 = vector.extract_strided_slice %6 {offsets = [0, 64], sizes = [8, 8], strides = [1, 1]} : vector<8x96xf32> to vector<8x8xf32>
    %17 = arith.mulf %14, %7 : vector<8x8xf32>
    %cst_15 = arith.constant dense<0.000000e+00> : vector<8x8xf32>
    %18 = tpu.matmul %14, %9, %cst_15 {dimension_numbers = #tpu.dot_dimension_numbers<[1], [0], [0], [1], [0, 0, 1, 1], [], []>} : vector<8x8xf32>, vector<8x8xf32>, vector<8x8xf32> -> vector<8x8xf32>
    %19 = arith.mulf %18, %8 : vector<8x8xf32>
    %20 = arith.addf %17, %19 : vector<8x8xf32>
    %21 = arith.mulf %15, %7 : vector<8x8xf32>
    %cst_16 = arith.constant dense<0.000000e+00> : vector<8x8xf32>
    %22 = tpu.matmul %15, %9, %cst_16 {dimension_numbers = #tpu.dot_dimension_numbers<[1], [0], [0], [1], [0, 0, 1, 1], [], []>} : vector<8x8xf32>, vector<8x8xf32>, vector<8x8xf32> -> vector<8x8xf32>
    %23 = arith.mulf %22, %8 : vector<8x8xf32>
    %24 = arith.addf %21, %23 : vector<8x8xf32>
    %cst_17 = arith.constant dense<0.000000e+00> : vector<8x8xf32>
    %25 = tpu.matmul %20, %24, %cst_17 {dimension_numbers = #tpu.dot_dimension_numbers<[1], [1], [0], [0], [0, 0, 1, 0], [], []>} : vector<8x8xf32>, vector<8x8xf32>, vector<8x8xf32> -> vector<8x8xf32>
    %cst_18 = arith.constant 0.353553385 : f32
    %26 = vector.broadcast %cst_18 : f32 to vector<8x8xf32>
    %27 = arith.mulf %25, %26 : vector<8x8xf32>
    %cst_19 = arith.constant dense<0xFF800000> : vector<8xf32>
    %28 = vector.multi_reduction <maximumf>, %27, %cst_19 [1] : vector<8x8xf32> to vector<8xf32>
    %29 = vector.shape_cast %28 : vector<8xf32> to vector<8x1xf32>
    %30 = vector.broadcast %29 : vector<8x1xf32> to vector<8x8xf32>
    %31 = arith.subf %27, %30 : vector<8x8xf32>
    %32 = math.exp %31 : vector<8x8xf32>
    %cst_20 = arith.constant dense<0.000000e+00> : vector<8xf32>
    %33 = vector.multi_reduction <add>, %32, %cst_20 [1] : vector<8x8xf32> to vector<8xf32>
    %34 = vector.shape_cast %33 : vector<8xf32> to vector<8x1xf32>
    %cst_21 = arith.constant dense<0.000000e+00> : vector<8x8xf32>
    %35 = tpu.matmul %32, %16, %cst_21 {dimension_numbers = #tpu.dot_dimension_numbers<[1], [0], [0], [1], [0, 0, 1, 1], [], []>} : vector<8x8xf32>, vector<8x8xf32>, vector<8x8xf32> -> vector<8x8xf32>
    %36 = tpu.reciprocal %34 {approx = true} : vector<8x1xf32> -> vector<8x1xf32>
    %37 = vector.broadcast %36 : vector<8x1xf32> to vector<8x8xf32>
    %38 = arith.mulf %35, %37 : vector<8x8xf32>
    %c0_22 = arith.constant 0 : index
    %c0_23 = arith.constant 0 : index
    %39 = vector.load %arg4[%c0_22, %c0_23] : memref<32x32xf32, #tpu.memory_space<vmem>>, vector<8x32xf32>
    %cst_24 = arith.constant dense<0.000000e+00> : vector<8x32xf32>
    %40 = tpu.matmul %38, %39, %cst_24 {dimension_numbers = #tpu.dot_dimension_numbers<[1], [0], [0], [1], [0, 0, 1, 1], [], []>} : vector<8x8xf32>, vector<8x32xf32>, vector<8x32xf32> -> vector<8x32xf32>
    %41 = arith.addf %13, %40 : vector<8x32xf32>
    %42 = vector.extract_strided_slice %6 {offsets = [0, 8], sizes = [8, 8], strides = [1, 1]} : vector<8x96xf32> to vector<8x8xf32>
    %43 = vector.extract_strided_slice %6 {offsets = [0, 40], sizes = [8, 8], strides = [1, 1]} : vector<8x96xf32> to vector<8x8xf32>
    %44 = vector.extract_strided_slice %6 {offsets = [0, 72], sizes = [8, 8], strides = [1, 1]} : vector<8x96xf32> to vector<8x8xf32>
    %45 = arith.mulf %42, %7 : vector<8x8xf32>
    %cst_25 = arith.constant dense<0.000000e+00> : vector<8x8xf32>
    %46 = tpu.matmul %42, %9, %cst_25 {dimension_numbers = #tpu.dot_dimension_numbers<[1], [0], [0], [1], [0, 0, 1, 1], [], []>} : vector<8x8xf32>, vector<8x8xf32>, vector<8x8xf32> -> vector<8x8xf32>
    %47 = arith.mulf %46, %8 : vector<8x8xf32>
    %48 = arith.addf %45, %47 : vector<8x8xf32>
    %49 = arith.mulf %43, %7 : vector<8x8xf32>
    %cst_26 = arith.constant dense<0.000000e+00> : vector<8x8xf32>
    %50 = tpu.matmul %43, %9, %cst_26 {dimension_numbers = #tpu.dot_dimension_numbers<[1], [0], [0], [1], [0, 0, 1, 1], [], []>} : vector<8x8xf32>, vector<8x8xf32>, vector<8x8xf32> -> vector<8x8xf32>
    %51 = arith.mulf %50, %8 : vector<8x8xf32>
    %52 = arith.addf %49, %51 : vector<8x8xf32>
    %cst_27 = arith.constant dense<0.000000e+00> : vector<8x8xf32>
    %53 = tpu.matmul %48, %52, %cst_27 {dimension_numbers = #tpu.dot_dimension_numbers<[1], [1], [0], [0], [0, 0, 1, 0], [], []>} : vector<8x8xf32>, vector<8x8xf32>, vector<8x8xf32> -> vector<8x8xf32>
    %cst_28 = arith.constant 0.353553385 : f32
    %54 = vector.broadcast %cst_28 : f32 to vector<8x8xf32>
    %55 = arith.mulf %53, %54 : vector<8x8xf32>
    %cst_29 = arith.constant dense<0xFF800000> : vector<8xf32>
    %56 = vector.multi_reduction <maximumf>, %55, %cst_29 [1] : vector<8x8xf32> to vector<8xf32>
    %57 = vector.shape_cast %56 : vector<8xf32> to vector<8x1xf32>
    %58 = vector.broadcast %57 : vector<8x1xf32> to vector<8x8xf32>
    %59 = arith.subf %55, %58 : vector<8x8xf32>
    %60 = math.exp %59 : vector<8x8xf32>
    %cst_30 = arith.constant dense<0.000000e+00> : vector<8xf32>
    %61 = vector.multi_reduction <add>, %60, %cst_30 [1] : vector<8x8xf32> to vector<8xf32>
    %62 = vector.shape_cast %61 : vector<8xf32> to vector<8x1xf32>
    %cst_31 = arith.constant dense<0.000000e+00> : vector<8x8xf32>
    %63 = tpu.matmul %60, %44, %cst_31 {dimension_numbers = #tpu.dot_dimension_numbers<[1], [0], [0], [1], [0, 0, 1, 1], [], []>} : vector<8x8xf32>, vector<8x8xf32>, vector<8x8xf32> -> vector<8x8xf32>
    %64 = tpu.reciprocal %62 {approx = true} : vector<8x1xf32> -> vector<8x1xf32>
    %65 = vector.broadcast %64 : vector<8x1xf32> to vector<8x8xf32>
    %66 = arith.mulf %63, %65 : vector<8x8xf32>
    %c8 = arith.constant 8 : index
    %c0_32 = arith.constant 0 : index
    %67 = vector.load %arg4[%c8, %c0_32] : memref<32x32xf32, #tpu.memory_space<vmem>>, vector<8x32xf32>
    %cst_33 = arith.constant dense<0.000000e+00> : vector<8x32xf32>
    %68 = tpu.matmul %66, %67, %cst_33 {dimension_numbers = #tpu.dot_dimension_numbers<[1], [0], [0], [1], [0, 0, 1, 1], [], []>} : vector<8x8xf32>, vector<8x32xf32>, vector<8x32xf32> -> vector<8x32xf32>
    %69 = arith.addf %41, %68 : vector<8x32xf32>
    %70 = vector.extract_strided_slice %6 {offsets = [0, 16], sizes = [8, 8], strides = [1, 1]} : vector<8x96xf32> to vector<8x8xf32>
    %71 = vector.extract_strided_slice %6 {offsets = [0, 48], sizes = [8, 8], strides = [1, 1]} : vector<8x96xf32> to vector<8x8xf32>
    %72 = vector.extract_strided_slice %6 {offsets = [0, 80], sizes = [8, 8], strides = [1, 1]} : vector<8x96xf32> to vector<8x8xf32>
    %73 = arith.mulf %70, %7 : vector<8x8xf32>
    %cst_34 = arith.constant dense<0.000000e+00> : vector<8x8xf32>
    %74 = tpu.matmul %70, %9, %cst_34 {dimension_numbers = #tpu.dot_dimension_numbers<[1], [0], [0], [1], [0, 0, 1, 1], [], []>} : vector<8x8xf32>, vector<8x8xf32>, vector<8x8xf32> -> vector<8x8xf32>
    %75 = arith.mulf %74, %8 : vector<8x8xf32>
    %76 = arith.addf %73, %75 : vector<8x8xf32>
    %77 = arith.mulf %71, %7 : vector<8x8xf32>
    %cst_35 = arith.constant dense<0.000000e+00> : vector<8x8xf32>
    %78 = tpu.matmul %71, %9, %cst_35 {dimension_numbers = #tpu.dot_dimension_numbers<[1], [0], [0], [1], [0, 0, 1, 1], [], []>} : vector<8x8xf32>, vector<8x8xf32>, vector<8x8xf32> -> vector<8x8xf32>
    %79 = arith.mulf %78, %8 : vector<8x8xf32>
    %80 = arith.addf %77, %79 : vector<8x8xf32>
    %cst_36 = arith.constant dense<0.000000e+00> : vector<8x8xf32>
    %81 = tpu.matmul %76, %80, %cst_36 {dimension_numbers = #tpu.dot_dimension_numbers<[1], [1], [0], [0], [0, 0, 1, 0], [], []>} : vector<8x8xf32>, vector<8x8xf32>, vector<8x8xf32> -> vector<8x8xf32>
    %cst_37 = arith.constant 0.353553385 : f32
    %82 = vector.broadcast %cst_37 : f32 to vector<8x8xf32>
    %83 = arith.mulf %81, %82 : vector<8x8xf32>
    %cst_38 = arith.constant dense<0xFF800000> : vector<8xf32>
    %84 = vector.multi_reduction <maximumf>, %83, %cst_38 [1] : vector<8x8xf32> to vector<8xf32>
    %85 = vector.shape_cast %84 : vector<8xf32> to vector<8x1xf32>
    %86 = vector.broadcast %85 : vector<8x1xf32> to vector<8x8xf32>
    %87 = arith.subf %83, %86 : vector<8x8xf32>
    %88 = math.exp %87 : vector<8x8xf32>
    %cst_39 = arith.constant dense<0.000000e+00> : vector<8xf32>
    %89 = vector.multi_reduction <add>, %88, %cst_39 [1] : vector<8x8xf32> to vector<8xf32>
    %90 = vector.shape_cast %89 : vector<8xf32> to vector<8x1xf32>
    %cst_40 = arith.constant dense<0.000000e+00> : vector<8x8xf32>
    %91 = tpu.matmul %88, %72, %cst_40 {dimension_numbers = #tpu.dot_dimension_numbers<[1], [0], [0], [1], [0, 0, 1, 1], [], []>} : vector<8x8xf32>, vector<8x8xf32>, vector<8x8xf32> -> vector<8x8xf32>
    %92 = tpu.reciprocal %90 {approx = true} : vector<8x1xf32> -> vector<8x1xf32>
    %93 = vector.broadcast %92 : vector<8x1xf32> to vector<8x8xf32>
    %94 = arith.mulf %91, %93 : vector<8x8xf32>
    %c16 = arith.constant 16 : index
    %c0_41 = arith.constant 0 : index
    %95 = vector.load %arg4[%c16, %c0_41] : memref<32x32xf32, #tpu.memory_space<vmem>>, vector<8x32xf32>
    %cst_42 = arith.constant dense<0.000000e+00> : vector<8x32xf32>
    %96 = tpu.matmul %94, %95, %cst_42 {dimension_numbers = #tpu.dot_dimension_numbers<[1], [0], [0], [1], [0, 0, 1, 1], [], []>} : vector<8x8xf32>, vector<8x32xf32>, vector<8x32xf32> -> vector<8x32xf32>
    %97 = arith.addf %69, %96 : vector<8x32xf32>
    %98 = vector.extract_strided_slice %6 {offsets = [0, 24], sizes = [8, 8], strides = [1, 1]} : vector<8x96xf32> to vector<8x8xf32>
    %99 = vector.extract_strided_slice %6 {offsets = [0, 56], sizes = [8, 8], strides = [1, 1]} : vector<8x96xf32> to vector<8x8xf32>
    %100 = vector.extract_strided_slice %6 {offsets = [0, 88], sizes = [8, 8], strides = [1, 1]} : vector<8x96xf32> to vector<8x8xf32>
    %101 = arith.mulf %98, %7 : vector<8x8xf32>
    %cst_43 = arith.constant dense<0.000000e+00> : vector<8x8xf32>
    %102 = tpu.matmul %98, %9, %cst_43 {dimension_numbers = #tpu.dot_dimension_numbers<[1], [0], [0], [1], [0, 0, 1, 1], [], []>} : vector<8x8xf32>, vector<8x8xf32>, vector<8x8xf32> -> vector<8x8xf32>
    %103 = arith.mulf %102, %8 : vector<8x8xf32>
    %104 = arith.addf %101, %103 : vector<8x8xf32>
    %105 = arith.mulf %99, %7 : vector<8x8xf32>
    %cst_44 = arith.constant dense<0.000000e+00> : vector<8x8xf32>
    %106 = tpu.matmul %99, %9, %cst_44 {dimension_numbers = #tpu.dot_dimension_numbers<[1], [0], [0], [1], [0, 0, 1, 1], [], []>} : vector<8x8xf32>, vector<8x8xf32>, vector<8x8xf32> -> vector<8x8xf32>
    %107 = arith.mulf %106, %8 : vector<8x8xf32>
    %108 = arith.addf %105, %107 : vector<8x8xf32>
    %cst_45 = arith.constant dense<0.000000e+00> : vector<8x8xf32>
    %109 = tpu.matmul %104, %108, %cst_45 {dimension_numbers = #tpu.dot_dimension_numbers<[1], [1], [0], [0], [0, 0, 1, 0], [], []>} : vector<8x8xf32>, vector<8x8xf32>, vector<8x8xf32> -> vector<8x8xf32>
    %cst_46 = arith.constant 0.353553385 : f32
    %110 = vector.broadcast %cst_46 : f32 to vector<8x8xf32>
    %111 = arith.mulf %109, %110 : vector<8x8xf32>
    %cst_47 = arith.constant dense<0xFF800000> : vector<8xf32>
    %112 = vector.multi_reduction <maximumf>, %111, %cst_47 [1] : vector<8x8xf32> to vector<8xf32>
    %113 = vector.shape_cast %112 : vector<8xf32> to vector<8x1xf32>
    %114 = vector.broadcast %113 : vector<8x1xf32> to vector<8x8xf32>
    %115 = arith.subf %111, %114 : vector<8x8xf32>
    %116 = math.exp %115 : vector<8x8xf32>
    %cst_48 = arith.constant dense<0.000000e+00> : vector<8xf32>
    %117 = vector.multi_reduction <add>, %116, %cst_48 [1] : vector<8x8xf32> to vector<8xf32>
    %118 = vector.shape_cast %117 : vector<8xf32> to vector<8x1xf32>
    %cst_49 = arith.constant dense<0.000000e+00> : vector<8x8xf32>
    %119 = tpu.matmul %116, %100, %cst_49 {dimension_numbers = #tpu.dot_dimension_numbers<[1], [0], [0], [1], [0, 0, 1, 1], [], []>} : vector<8x8xf32>, vector<8x8xf32>, vector<8x8xf32> -> vector<8x8xf32>
    %120 = tpu.reciprocal %118 {approx = true} : vector<8x1xf32> -> vector<8x1xf32>
    %121 = vector.broadcast %120 : vector<8x1xf32> to vector<8x8xf32>
    %122 = arith.mulf %119, %121 : vector<8x8xf32>
    %c24 = arith.constant 24 : index
    %c0_50 = arith.constant 0 : index
    %123 = vector.load %arg4[%c24, %c0_50] : memref<32x32xf32, #tpu.memory_space<vmem>>, vector<8x32xf32>
    %cst_51 = arith.constant dense<0.000000e+00> : vector<8x32xf32>
    %124 = tpu.matmul %122, %123, %cst_51 {dimension_numbers = #tpu.dot_dimension_numbers<[1], [0], [0], [1], [0, 0, 1, 1], [], []>} : vector<8x8xf32>, vector<8x32xf32>, vector<8x32xf32> -> vector<8x32xf32>
    %125 = arith.addf %97, %124 : vector<8x32xf32>
    %126 = arith.addf %1, %125 : vector<8x32xf32>
    %c0_52 = arith.constant 0 : index
    %c0_53 = arith.constant 0 : index
    %127 = vector.load %arg6[%c0_52, %c0_53] : memref<1x32xf32, #tpu.memory_space<vmem>>, vector<1x32xf32>
    %c0_54 = arith.constant 0 : index
    %c0_55 = arith.constant 0 : index
    %128 = vector.load %arg7[%c0_54, %c0_55] : memref<1x32xf32, #tpu.memory_space<vmem>>, vector<1x32xf32>
    %cst_56 = arith.constant dense<0.000000e+00> : vector<8xf32>
    %129 = vector.multi_reduction <add>, %126, %cst_56 [1] : vector<8x32xf32> to vector<8xf32>
    %130 = vector.shape_cast %129 : vector<8xf32> to vector<8x1xf32>
    %cst_57 = arith.constant 3.200000e+01 : f32
    %131 = vector.broadcast %cst_57 : f32 to vector<8x1xf32>
    %132 = arith.divf %130, %131 : vector<8x1xf32>
    %133 = vector.broadcast %132 : vector<8x1xf32> to vector<8x32xf32>
    %134 = arith.subf %126, %133 : vector<8x32xf32>
    %135 = arith.mulf %134, %134 : vector<8x32xf32>
    %cst_58 = arith.constant dense<0.000000e+00> : vector<8xf32>
    %136 = vector.multi_reduction <add>, %135, %cst_58 [1] : vector<8x32xf32> to vector<8xf32>
    %137 = vector.shape_cast %136 : vector<8xf32> to vector<8x1xf32>
    %cst_59 = arith.constant 3.200000e+01 : f32
    %138 = vector.broadcast %cst_59 : f32 to vector<8x1xf32>
    %139 = arith.divf %137, %138 : vector<8x1xf32>
    %140 = vector.broadcast %132 : vector<8x1xf32> to vector<8x32xf32>
    %141 = arith.subf %126, %140 : vector<8x32xf32>
    %cst_60 = arith.constant 9.99999974E-6 : f32
    %142 = vector.broadcast %cst_60 : f32 to vector<8x1xf32>
    %143 = arith.addf %139, %142 : vector<8x1xf32>
    %144 = math.rsqrt %143 : vector<8x1xf32>
    %145 = vector.broadcast %144 : vector<8x1xf32> to vector<8x32xf32>
    %146 = arith.mulf %141, %145 : vector<8x32xf32>
    %147 = vector.broadcast %127 : vector<1x32xf32> to vector<8x32xf32>
    %148 = arith.mulf %146, %147 : vector<8x32xf32>
    %149 = vector.broadcast %128 : vector<1x32xf32> to vector<8x32xf32>
    %150 = arith.addf %148, %149 : vector<8x32xf32>
    %c0_61 = arith.constant 0 : index
    %c0_62 = arith.constant 0 : index
    %151 = vector.load %arg8[%c0_61, %c0_62] : memref<32x128xf32, #tpu.memory_space<vmem>>, vector<32x128xf32>
    %cst_63 = arith.constant dense<0.000000e+00> : vector<8x128xf32>
    %152 = tpu.matmul %150, %151, %cst_63 {dimension_numbers = #tpu.dot_dimension_numbers<[1], [0], [0], [1], [0, 0, 1, 1], [], []>} : vector<8x32xf32>, vector<32x128xf32>, vector<8x128xf32> -> vector<8x128xf32>
    %c0_64 = arith.constant 0 : index
    %c0_65 = arith.constant 0 : index
    %153 = vector.load %arg9[%c0_64, %c0_65] : memref<1x128xf32, #tpu.memory_space<vmem>>, vector<1x128xf32>
    %154 = vector.broadcast %153 : vector<1x128xf32> to vector<8x128xf32>
    %155 = arith.addf %152, %154 : vector<8x128xf32>
    %cst_66 = arith.constant 0.000000e+00 : f32
    %156 = vector.broadcast %cst_66 : f32 to vector<8x128xf32>
    %157 = arith.maximumf %155, %156 : vector<8x128xf32>
    %c0_67 = arith.constant 0 : index
    %c0_68 = arith.constant 0 : index
    %158 = vector.load %arg10[%c0_67, %c0_68] : memref<128x32xf32, #tpu.memory_space<vmem>>, vector<128x32xf32>
    %cst_69 = arith.constant dense<0.000000e+00> : vector<8x32xf32>
    %159 = tpu.matmul %157, %158, %cst_69 {dimension_numbers = #tpu.dot_dimension_numbers<[1], [0], [0], [1], [0, 0, 1, 1], [], []>} : vector<8x128xf32>, vector<128x32xf32>, vector<8x32xf32> -> vector<8x32xf32>
    %c0_70 = arith.constant 0 : index
    %c0_71 = arith.constant 0 : index
    %160 = vector.load %arg11[%c0_70, %c0_71] : memref<1x32xf32, #tpu.memory_space<vmem>>, vector<1x32xf32>
    %161 = vector.broadcast %160 : vector<1x32xf32> to vector<8x32xf32>
    %162 = arith.addf %159, %161 : vector<8x32xf32>
    %163 = arith.addf %150, %162 : vector<8x32xf32>
    %c0_72 = arith.constant 0 : index
    %c0_73 = arith.constant 0 : index
    %164 = vector.load %arg12[%c0_72, %c0_73] : memref<1x32xf32, #tpu.memory_space<vmem>>, vector<1x32xf32>
    %c0_74 = arith.constant 0 : index
    %c0_75 = arith.constant 0 : index
    %165 = vector.load %arg13[%c0_74, %c0_75] : memref<1x32xf32, #tpu.memory_space<vmem>>, vector<1x32xf32>
    %cst_76 = arith.constant dense<0.000000e+00> : vector<8xf32>
    %166 = vector.multi_reduction <add>, %163, %cst_76 [1] : vector<8x32xf32> to vector<8xf32>
    %167 = vector.shape_cast %166 : vector<8xf32> to vector<8x1xf32>
    %cst_77 = arith.constant 3.200000e+01 : f32
    %168 = vector.broadcast %cst_77 : f32 to vector<8x1xf32>
    %169 = arith.divf %167, %168 : vector<8x1xf32>
    %170 = vector.broadcast %169 : vector<8x1xf32> to vector<8x32xf32>
    %171 = arith.subf %163, %170 : vector<8x32xf32>
    %172 = arith.mulf %171, %171 : vector<8x32xf32>
    %cst_78 = arith.constant dense<0.000000e+00> : vector<8xf32>
    %173 = vector.multi_reduction <add>, %172, %cst_78 [1] : vector<8x32xf32> to vector<8xf32>
    %174 = vector.shape_cast %173 : vector<8xf32> to vector<8x1xf32>
    %cst_79 = arith.constant 3.200000e+01 : f32
    %175 = vector.broadcast %cst_79 : f32 to vector<8x1xf32>
    %176 = arith.divf %174, %175 : vector<8x1xf32>
    %177 = vector.broadcast %169 : vector<8x1xf32> to vector<8x32xf32>
    %178 = arith.subf %163, %177 : vector<8x32xf32>
    %cst_80 = arith.constant 9.99999974E-6 : f32
    %179 = vector.broadcast %cst_80 : f32 to vector<8x1xf32>
    %180 = arith.addf %176, %179 : vector<8x1xf32>
    %181 = math.rsqrt %180 : vector<8x1xf32>
    %182 = vector.broadcast %181 : vector<8x1xf32> to vector<8x32xf32>
    %183 = arith.mulf %178, %182 : vector<8x32xf32>
    %184 = vector.broadcast %164 : vector<1x32xf32> to vector<8x32xf32>
    %185 = arith.mulf %183, %184 : vector<8x32xf32>
    %186 = vector.broadcast %165 : vector<1x32xf32> to vector<8x32xf32>
    %187 = arith.addf %185, %186 : vector<8x32xf32>
    %c0_81 = arith.constant 0 : index
    %c0_82 = arith.constant 0 : index
    %c0_83 = arith.constant 0 : index
    %188 = vector.load %arg17[%c0_81, %c0_82, %c0_83] : memref<1x8x32xf32, #tpu.memory_space<vmem>>, vector<1x8x32xf32>
    %189 = vector.shape_cast %188 : vector<1x8x32xf32> to vector<8x32xf32>
    %190 = vector.shape_cast %187 : vector<8x32xf32> to vector<1x8x32xf32>
    tpu.vector_store %arg17[%c0_81, %c0_82, %c0_83], %190 {strides = array<i32>} : memref<1x8x32xf32, #tpu.memory_space<vmem>>, vector<1x8x32xf32>,
    return
  }
  func.func @transform_0(%arg0: i32) -> (i32, i32, i32) {
    %c0_i32 = arith.constant 0 : i32
    %c0_i32_0 = arith.constant 0 : i32
    %c0_i32_1 = arith.constant 0 : i32
    return %arg0, %c0_i32, %c0_i32_0 : i32, i32, i32
  }
  func.func @transform_1(%arg0: i32) -> (i32, i32) {
    %c0_i32 = arith.constant 0 : i32
    %c0_i32_0 = arith.constant 0 : i32
    %c0_i32_1 = arith.constant 0 : i32
    return %c0_i32, %c0_i32_0 : i32, i32
  }
  func.func @transform_2(%arg0: i32) -> (i32, i32) {
    %c0_i32 = arith.constant 0 : i32
    %c0_i32_0 = arith.constant 0 : i32
    %c0_i32_1 = arith.constant 0 : i32
    return %c0_i32, %c0_i32_0 : i32, i32
  }
  func.func @transform_3(%arg0: i32) -> (i32, i32) {
    %c0_i32 = arith.constant 0 : i32
    %c0_i32_0 = arith.constant 0 : i32
    %c0_i32_1 = arith.constant 0 : i32
    return %c0_i32, %c0_i32_0 : i32, i32
  }
  func.func @transform_4(%arg0: i32) -> (i32, i32) {
    %c0_i32 = arith.constant 0 : i32
    %c0_i32_0 = arith.constant 0 : i32
    %c0_i32_1 = arith.constant 0 : i32
    return %c0_i32, %c0_i32_0 : i32, i32
  }
  func.func @transform_5(%arg0: i32) -> (i32, i32) {
    %c0_i32 = arith.constant 0 : i32
    %c0_i32_0 = arith.constant 0 : i32
    %c0_i32_1 = arith.constant 0 : i32
    return %c0_i32, %c0_i32_0 : i32, i32
  }
  func.func @transform_6(%arg0: i32) -> (i32, i32) {
    %c0_i32 = arith.constant 0 : i32
    %c0_i32_0 = arith.constant 0 : i32
    %c0_i32_1 = arith.constant 0 : i32
    return %c0_i32, %c0_i32_0 : i32, i32
  }
  func.func @transform_7(%arg0: i32) -> (i32, i32) {
    %c0_i32 = arith.constant 0 : i32
    %c0_i32_0 = arith.constant 0 : i32
    %c0_i32_1 = arith.constant 0 : i32
    return %c0_i32, %c0_i32_0 : i32, i32
  }
  func.func @transform_8(%arg0: i32) -> (i32, i32) {
    %c0_i32 = arith.constant 0 : i32
    %c0_i32_0 = arith.constant 0 : i32
    %c0_i32_1 = arith.constant 0 : i32
    return %c0_i32, %c0_i32_0 : i32, i32
  }
  func.func @transform_9(%arg0: i32) -> (i32, i32) {
    %c0_i32 = arith.constant 0 : i32
    %c0_i32_0 = arith.constant 0 : i32
    %c0_i32_1 = arith.constant 0 : i32
    return %c0_i32, %c0_i32_0 : i32, i32
  }
  func.func @transform_10(%arg0: i32) -> (i32, i32) {
    %c0_i32 = arith.constant 0 : i32
    %c0_i32_0 = arith.constant 0 : i32
    %c0_i32_1 = arith.constant 0 : i32
    return %c0_i32, %c0_i32_0 : i32, i32
  }
  func.func @transform_11(%arg0: i32) -> (i32, i32) {
    %c0_i32 = arith.constant 0 : i32
    %c0_i32_0 = arith.constant 0 : i32
    %c0_i32_1 = arith.constant 0 : i32
    return %c0_i32, %c0_i32_0 : i32, i32
  }
  func.func @transform_12(%arg0: i32) -> (i32, i32) {
    %c0_i32 = arith.constant 0 : i32
    %c0_i32_0 = arith.constant 0 : i32
    %c0_i32_1 = arith.constant 0 : i32
    return %c0_i32, %c0_i32_0 : i32, i32
  }
  func.func @transform_13(%arg0: i32) -> (i32, i32) {
    %c0_i32 = arith.constant 0 : i32
    %c0_i32_0 = arith.constant 0 : i32
    %c0_i32_1 = arith.constant 0 : i32
    return %c0_i32, %c0_i32_0 : i32, i32
  }
  func.func @transform_14(%arg0: i32) -> (i32, i32) {
    %c0_i32 = arith.constant 0 : i32
    %c0_i32_0 = arith.constant 0 : i32
    %c0_i32_1 = arith.constant 0 : i32
    return %c0_i32, %c0_i32_0 : i32, i32
  }
  func.func @transform_15(%arg0: i32) -> (i32, i32) {
    %c0_i32 = arith.constant 0 : i32
    %c0_i32_0 = arith.constant 0 : i32
    %c0_i32_1 = arith.constant 0 : i32
    return %c0_i32, %c0_i32_0 : i32, i32
  }
  func.func @transform_16(%arg0: i32) -> (i32, i32, i32) {
    %c0_i32 = arith.constant 0 : i32
    %c0_i32_0 = arith.constant 0 : i32
    %c0_i32_1 = arith.constant 0 : i32
    return %arg0, %c0_i32, %c0_i32_0 : i32, i32, i32
  }
}

</mosaic_0001>

<bundles_post_ra>
// kernel: _lambda_.4
= control target key start
LH: loop header
LB: loop body
LE: loop exit
PB: predicated region body
PF: predicated region fallthrough
CT: control target
= control target key end

     0   :  { %s390_s12 = smov 0   ;;  %s434_s0 = inlined_call_operand.vmem [shape: f32[2,8,64], index: 0, kind: input, shape index: {}]   ;;  %s435_s1 = inlined_call_operand.vmem [shape: f32[64,32], index: 1, kind: input, shape index: {}]   ;;  %s436_s2 = inlined_call_operand.vmem [shape: f32[1,32], index: 2, kind: input, shape index: {}]   ;;  %s437_s3 = inlined_call_operand.vmem [shape: f32[2,8,32], index: 3, kind: output, shape index: {}]  }
   0x1 LB: > { %s311_s13 = sadd.s32 4294967295, %s366_s12   ;;  %p315_p0 = scmp.ge.s32.totalorder %s366_s12, 1  ;;  %s366_s12 = sphi %s390_s12, %s13_s12  }
   0x2   : > { %p136_p1 = scmp.lt.s32.totalorder %s366_s12, 3 }
   0x4   : > { %p137_p2 = pnand %p315_p0, %p136_p1 }
   0x5   : > { %p158_p3 = scmp.lt.s32.totalorder (!%p137_p2), %s311_s13, 1 }
   0x6   : > { %140 = sbr.rel (%p137_p2) target bundleno = 224 (0xe0), region = 32 }
   0xb   : > { %v174_v0 = vld [vmem:[%s435_s1 + $0x38] sm:$0xff]  ;;  %v368_v1 = vmov 0.0   ;;  %v173_v2 = vld [vmem:[%s435_s1 + $0x30] sm:$0xff]  ;;  %vm369_vm0 = vmmov 0   ;;  %v172_v3 = vld [vmem:[%s435_s1 + $0x28] sm:$0xff]  ;;  %s439_s13 = smov (!%p158_p3, %s311_s13), 1 }
   0xc   : > { %331 = vmatprep.subr.mxu0 %v368_v1  ;;  %347 = vmatprep.mubr.msk.f32.mxu0 %vm369_vm0, %v368_v1  ;;  %v171_v4 = vld [vmem:[%s435_s1 + $0x20] sm:$0xff]  ;;  %v170_v5 = vld [vmem:[%s435_s1 + $0x18] sm:$0xff]  ;;  %s316_s24 = sshll.u32 %s439_s13, 3  ;;  %v169_v6 = vld [vmem:[%s435_s1 + $0x10] sm:$0xff]  ;;  %vm182_vm1 = vcmask 523264   ;;  %vm256_vm2 = vcmask 261120  }
   0xd   : > { %332 = vmatpush3.msra.mxu0 %v174_v0  ;;  %v168_v7 = vld [vmem:[%s435_s1 + $0x8] sm:$0xff]  ;;  %s161_s4 = scalar_lea.vmem %s434_s0, %s316_s24  ;;  %v167_v8 = vld [vmem:[%s435_s1] sm:$0xff]  ;;  %s165_s11 = scalar_lea.vmem %s437_s3, %s316_s24 }
   0xe   : > { %333 = vmatprep.subr.mxu0 %v368_v1  ;;  %v166_v9 = vld [vmem:[%s161_s4] sm:$0xff] }
   0xf   : > { %334 = vmatpush3.msra.mxu0 %v173_v2  ;;  %v318_v10 = vld [vmem:[%s436_s2] ss:$0 sm:$0xff] }
  0x10   : > { %335 = vmatprep.subr.mxu0 %v368_v1 }
  0x11   : > { %336 = vmatpush3.msra.mxu0 %v172_v3 }
  0x12   : > { %337 = vmatprep.subr.mxu0 %v368_v1 }
  0x13   : > { %338 = vmatpush3.msra.mxu0 %v171_v4 }
  0x14   : > { %339 = vmatprep.subr.mxu0 %v368_v1 }
  0x15   : > { %340 = vmatpush3.msra.mxu0 %v170_v5 }
  0x16   : > { %341 = vmatprep.subr.mxu0 %v368_v1 }
  0x17   : > { %342 = vmatpush3.msra.mxu0 %v169_v6 }
  0x18   : > { %343 = vmatprep.subr.mxu0 %v368_v1 }
  0x19   : > { %344 = vmatpush3.msra.mxu0 %v168_v7 }
  0x1a   : > { %345 = vmatprep.subr.mxu0 %v368_v1 }
  0x1b   : > { %346 = vmatpush3.msra.mxu0 %v167_v8 }
  0x1c   : > { %348 = vmatmul.mubr.msk.f32.vlgmr.msra.gmra.mxu0 %vm182_vm1, %v166_v9 }
  0xdc   : > { %v252_v11 = vpop.f32.mrf.mxu0 }
  0xdd   : > { %v253_v12 = vadd.f32 %v318_v10, %v252_v11 }
  0xde   : > { %v349_v13 = vpop.f32.mrf.mxu0 }
  0xdf   : > { %257 = vst.msk [vmem:[%s165_s11] sm:$0xff] %vm256_vm2, %v253_v12 }
  0xe0 PF: > { %s13_s12 = sadd.s32 1, %s366_s12  }
  0xe1   : > { %p10_p4 = scmp.ge.s32.totalorder %s13_s12, 4  }
  0xe3   :  { %12 = sbr.rel (!%p10_p4) target bundleno = 1 (0x1), region = 62 }

// kernel: _lambda_.3
= control target key start
LH: loop header
LB: loop body
LE: loop exit
PB: predicated region body
PF: predicated region fallthrough
CT: control target
= control target key end

     0   :  { %s3455_s21 = smov 0   ;;  %s3888_s0 = inlined_call_operand.vmem [shape: f32[2,16,32], index: 0, kind: input, shape index: {}]   ;;  %s3889_s1 = inlined_call_operand.vmem [shape: f32[32,96], index: 1, kind: input, shape index: {}]   ;;  %s3890_s2 = inlined_call_operand.vmem [shape: f32[1,96], index: 2, kind: input, shape index: {}]   ;;  %s3891_s3 = inlined_call_operand.vmem [shape: f32[32,32], index: 3, kind: input, shape index: {}]   ;;  %s3892_s4 = inlined_call_operand.vmem [shape: f32[1,32], index: 4, kind: input, shape index: {}]   ;;  %s3893_s5 = inlined_call_operand.vmem [shape: f32[1,32], index: 5, kind: input, shape index: {}]   ;;  %s3894_s6 = inlined_call_operand.vmem [shape: f32[1,32], index: 6, kind: input, shape index: {}]   ;;  %s3895_s7 = inlined_call_operand.vmem [shape: f32[32,128], index: 7, kind: input, shape index: {}]   ;;  %s3896_s8 = inlined_call_operand.vmem [shape: f32[1,128], index: 8, kind: input, shape index: {}]   ;;  %s3897_s9 = inlined_call_operand.vmem [shape: f32[128,32], index: 9, kind: input, shape index: {}]   ;;  %s3898_s10 = inlined_call_operand.vmem [shape: f32[1,32], index: 10, kind: input, shape index: {}]   ;;  %s3899_s11 = inlined_call_operand.vmem [shape: f32[1,32], index: 11, kind: input, shape index: {}]   ;;  %s3900_s12 = inlined_call_operand.vmem [shape: f32[1,32], index: 12, kind: input, shape index: {}]   ;;  %s3901_s13 = inlined_call_operand.vmem [shape: f32[16,8], index: 13, kind: input, shape index: {}]   ;;  %s3902_s14 = inlined_call_operand.vmem [shape: f32[16,8], index: 14, kind: input, shape index: {}]   ;;  %s3903_s15 = inlined_call_operand.vmem [shape: f32[8,8], index: 15, kind: input, shape index: {}]   ;;  %s3904_s16 = inlined_call_operand.vmem [shape: f32[2,16,32], index: 16, kind: output, shape index: {}]  }
   0x1   :  { %3905 = sst [smem:[#allocation2_spill]] %s3888_s0 }
   0x2 LB: > { %s2940_s22 = sadd.s32 4294967295, %s3353_s21   ;;  %p2944_p0 = scmp.ge.s32.totalorder %s3353_s21, 1  ;;  %s3353_s21 = sphi %s3455_s21, %s26_s21  }
   0x3   : > { %p462_p1 = scmp.lt.s32.totalorder %s3353_s21, 3 }
   0x5   : > { %p463_p2 = pnand %p2944_p0, %p462_p1 }
   0x6   : > { %p512_p3 = scmp.lt.s32.totalorder (!%p463_p2), %s2940_s22, 1  ;;  %s3355_s0 = smov (!%p463_p2), 32  }
   0x7   : > { %466 = sbr.rel (%p463_p2) target bundleno = 5520 (0x1590), region = 84  ;;  %s3906_s24 = sld [smem:[#allocation2_spill]] (!%p463_p2) }
   0x8   : > { %s3356_s30 = smov (!%p463_p2), 96   ;;  %s3358_s26 = smov (!%p463_p2), 88  }
   0x9   : > { %s3359_s27 = smov (!%p463_p2), 120   ;;  %s3360_s28 = smov (!%p463_p2), 8  }
   0xa   : > { %s3361_s29 = smov (!%p463_p2), 40   ;;  %s3362_s18 = smov (!%p463_p2), 56  }
   0xb   : > { %s3363_s20 = smov (!%p463_p2), 80   ;;  %s3364_s23 = smov (!%p463_p2), 112  }
   0xc   : > { %v527_v0 = vld [vmem:[%s3889_s1 + $0x18] sm:$0xff]  ;;  %v526_v1 = vld [vmem:[%s3889_s1 + $0x10] sm:$0xff]  ;;  %v3472_v2 = vld [vmem:[%s3901_s13 + $0x8] sm:$0xff]  ;;  %s3908_s22 = smov (!%p512_p3, %s2940_s22), 1  ;;  %vm535_vm0 = vcmask 261120   ;;  %vm632_vm1 = vcmask 64512  }
   0xd   : > { %3111 = vmatprep.subr.mxu1 %v527_v0  ;;  %v525_v3 = vld [vmem:[%s3889_s1 + $0x8] sm:$0xff]  ;;  %722 = vrot.lane.b32.xlu1 %v3472_v2, %s3355_s0  ;;  %v524_v4 = vld [vmem:[%s3889_s1] sm:$0xff]  ;;  %s3011_s19 = sshll.u32 %s3908_s22, 4  ;;  %vm916_vm2 = vcmask 130048   ;;  %s3368_s17 = smov 104  }
   0xe   : > { %3112 = vmatpush3.msra.mxu1 %v527_v0  ;;  %s516_s25 = scalar_lea.vmem %s3906_s24, %s3011_s19  ;;  %v3501_v7 = vld [vmem:[%s3903_s15] sm:$0xff]  ;;  %v3543_v22 = vld [vmem:[%s3902_s14 + $0x8] sm:$0xff]  ;;  %s3365_s24 = smov 16  }
   0xf   : > { %3113 = vmatprep.subr.mxu1 %v526_v1  ;;  %v3490_v5 = vld [vmem:[%s516_s25] sm:$0xff]  ;;  %v3492_v6 = vld [vmem:[%s516_s25 + $0x8] sm:$0xff]  ;;  %s3366_s25 = smov 48  }
  0x10   : > { %3114 = vmatpush3.msra.mxu1 %v526_v1  ;;  %3119 = vmatprep.mubr.msk.f32.mxu1 %vm535_vm0, %v3490_v5  ;;  %v2949_v9 = vld [vmem:[%s3890_s2] ss:$0 sm:$0xff] }
  0x11   : > { %3115 = vmatprep.subr.mxu1 %v525_v3  ;;  %v3525_v13 = vld [vmem:[%s3901_s13] sm:$0xff] }
  0x12   : > { %3116 = vmatpush3.msra.mxu1 %v525_v3  ;;  %v3534_v17 = vld [vmem:[%s3902_s14] sm:$0xff] }
  0x13   : > { %3117 = vmatprep.subr.mxu1 %v524_v4  ;;  %v1026_v58 = vld [vmem:[%s3891_s3] sm:$0xff] }
  0x14   : > { %3118 = vmatpush3.msra.mxu1 %v524_v4  ;;  %3146 = vmatprep.subr.mxu0 %v1026_v58 }
  0x15   : > { %3120 = vmatmul.mubr.msk.f32.vlgmr.msra.gmra.mxu1 %vm535_vm0, %v3492_v6  ;;  %3122 = vmatprep.subr.mxu1 %v3501_v7 }
  0x16   : > { %3123 = vmatpush3.msra.mxu1 %v3501_v7  ;;  %3147 = vmatpush3.msra.mxu0 %v1026_v58 }
  0x17   : > { %3127 = vmatprep.subr.mxu1 %v3501_v7  ;;  %3156 = vmatprep.subr.mxu0 %v3501_v7 }
  0x7f   : > { %v723_v27 = vpop.permute.xlu1 %722 }
  0xd5   : > { %v3121_v8 = vpop.f32.mrf.mxu1 }
  0xd6   : > { %v3511_v12 = vadd.f32 %v3121_v8, %v2949_v9 }
  0xd7   : > { %v608_v10 = vpop.f32.mrf.mxu1 }
  0xd8   : > { %v3509_v11 = vadd.f32 %v2949_v9, %v608_v10  ;;  %v727_v28 = vmul.f32 %v723_v27, %v3511_v12  ;;  %v631_v38 = vmul.f32 %v3472_v2, %v3511_v12 }
  0xda   : > { %728 = vrot.lane.b32.xlu0 %v3509_v11, %s3356_s30  ;;  %3124 = vmatprep.mubr.msk.f32.mxu1 %vm632_vm1, %v3509_v11  ;;  %v630_v19 = vmul.f32 %v3525_v13, %v3509_v11 }
  0xdb   : > { %3125 = vmatmul.mubr.msk.f32.vlgmr.msra.gmra.mxu1 %vm632_vm1, %v3511_v12 }
  0xdc   : > { %3128 = vmatpush3.msra.mxu1 %v3501_v7 }
  0xde   : > { %730 = vrot.lane.b32.xlu0 %v3511_v12, %s3356_s30 }
  0xe2   : > { %720 = vrot.lane.b32.xlu0 %v3525_v13, %s3355_s0 }
 0x14c   : > { %v729_v14 = vpop.permute.xlu0 %728 }
 0x14d   : > { %3129 = vmatprep.mubr.msk.f32.mxu1 %vm632_vm1, %v729_v14 }
 0x150   : > { %v731_v15 = vpop.permute.xlu0 %730 }
 0x151   : > { %3130 = vmatmul.mubr.msk.f32.vlgmr.msra.gmra.mxu1 %vm632_vm1, %v731_v15 }
 0x154   : > { %v721_v29 = vpop.permute.xlu0 %720 }
 0x155   : > { %v726_v32 = vmul.f32 %v721_v29, %v3509_v11 }
 0x19b   : > { %v3126_v16 = vpop.f32.mrf.mxu1 }
 0x19c   : > { %v715_v36 = vmul.f32 %v3126_v16, %v3543_v22 }
 0x19d   : > { %v705_v18 = vpop.f32.mrf.mxu1 }
 0x19e   : > { %v714_v20 = vmul.f32 %v705_v18, %v3534_v17  ;;  %v717_v39 = vadd.f32 %v715_v36, %v631_v38 }
 0x1a0   : > { %v716_v21 = vadd.f32 %v714_v20, %v630_v19 }
 0x1a2   : > { %3136 = vmatprep.mubr.msk.f32.mxu1 %vm632_vm1, %v716_v21 }
 0x211   : > { %v3131_v23 = vpop.f32.mrf.mxu1 }
 0x212   : > { %v812_v24 = vmul.f32 %v3131_v23, %v3543_v22 }
 0x213   : > { %v802_v25 = vpop.f32.mrf.mxu1 }
 0x214   : > { %817 = vrot.lane.b32.xlu1 %v812_v24, %s3355_s0  ;;  %v811_v26 = vmul.f32 %v802_v25, %v3534_v17 }
 0x218   : > { %815 = vrot.lane.b32.xlu1 %v811_v26, %s3355_s0  ;;  %s3357_s0 = smov 64  }
 0x286   : > { %v818_v30 = vpop.permute.xlu1 %817 }
 0x287   : > { %v822_v31 = vadd.f32 %v818_v30, %v727_v28 }
 0x289   : > { %827 = vrot.lane.b32.xlu0 %v822_v31, %s3356_s30 }
 0x28a   : > { %v816_v33 = vpop.permute.xlu1 %815 }
 0x28b   : > { %v821_v34 = vadd.f32 %v816_v33, %v726_v32 }
 0x28d   : > { %825 = vrot.lane.b32.xlu1 %v821_v34, %s3356_s30  ;;  %s3367_s30 = smov 72  }
 0x2fb   : > { %v828_v35 = vpop.permute.xlu0 %827 }
 0x2fc   : > { %3132 = vmatprep.subr.msk.mxu1 %vm632_vm1, %v828_v35 }
 0x2fd   : > { %3133 = vmatpush3.xpose.msk.msra.mxu1 %vm632_vm1, %v828_v35 }
 0x2ff   : > { %v826_v37 = vpop.permute.xlu1 %825 }
 0x300   : > { %3134 = vmatprep.subr.msk.mxu1 %vm632_vm1, %v826_v37 }
 0x301   : > { %3135 = vmatpush3.xpose.msk.msra.mxu1 %vm632_vm1, %v826_v37 }
 0x304   : > { %3137 = vmatmul.mubr.msk.f32.vlgmr.msra.gmra.mxu1 %vm632_vm1, %v717_v39 }
 0x3c4   : > { %v3138_v40 = vpop.f32.mrf.mxu1 }
 0x3c5   : > { %v915_v41 = vmul.f32 0.35355338, %v3138_v40 }
 0x3c6   : > { %v905_v42 = vpop.f32.mrf.mxu1 }
 0x3c7   : > { %v914_v43 = vmul.f32 0.35355338, %v905_v42  ;;  %v920_v44 = vsel %vm916_vm2, %v915_v41, -inf }
 0x3c8   : > { %921 = vmax.xlane.f32.xlu1 %v920_v44 }
 0x3c9   : > { %v917_v45 = vsel %vm916_vm2, %v914_v43, -inf }
 0x3ca   : > { %918 = vmax.xlane.f32.xlu0 %v917_v45 }
 0x3d9   : > { %935 = vrot.lane.b32.xlu1 %v3509_v11, %s3357_s0 }
 0x3e0   : > { %937 = vrot.lane.b32.xlu0 %v3511_v12, %s3357_s0 }
 0x451   : > { %v922_v46 = vpop.xlane.xlu1 %921 }
 0x452   : > { %v924_v47 = vsub.f32 %v915_v41, %v922_v46 }
 0x453   : > { %v919_v48 = vpop.xlane.xlu0 %918 }
 0x454   : > { %v927_v49 = vmul.f32 1.442695, %v924_v47  ;;  %v923_v50 = vsub.f32 %v914_v43, %v919_v48 }
 0x455   : > { %v936_v53 = vpop.permute.xlu1 %935 }
 0x456   : > { %3307 = vpow2.f32 %v927_v49  ;;  %v925_v51 = vmul.f32 1.442695, %v923_v50 }
 0x457   : > { %v938_v52 = vpop.permute.xlu0 %937 }
 0x458   : > { %3309 = vpow2.f32 %v925_v51  ;;  %3139 = vmatprep.subr.mxu1 %v938_v52 }
 0x459   : > { %3140 = vmatpush3.msra.mxu1 %v938_v52 }
 0x45a   : > { %3141 = vmatprep.subr.mxu1 %v936_v53 }
 0x45b   : > { %3142 = vmatpush3.msra.mxu1 %v936_v53 }
 0x45c   : > { %3151 = vmatprep.subr.mxu1 %v3501_v7 }
 0x463   : > { %v3308_v54 = vpop.eup %3307 }
 0x464   : > { %v932_v55 = vsel %vm916_vm2, %v3308_v54, 0.0 }
 0x465   : > { %v3310_v56 = vpop.eup %3309  ;;  %933 = vadd.xlane.f32.xlu1 %v932_v55 }
 0x466   : > { %3143 = vmatprep.mubr.msk.f32.mxu1 %vm916_vm2, %v3310_v56  ;;  %v929_v57 = vsel %vm916_vm2, %v3310_v56, 0.0 }
 0x467   : > { %930 = vadd.xlane.f32.xlu0 %v929_v57  ;;  %3144 = vmatmul.mubr.msk.f32.vlgmr.msra.gmra.mxu1 %vm916_vm2, %v3308_v54 }
 0x468   : > { %3152 = vmatpush3.msra.mxu1 %v3501_v7 }
 0x476   : > { %1223 = vrot.lane.b32.xlu1 %v3511_v12, %s3358_s26 }
 0x47a   : > { %1120 = vrot.lane.b32.xlu1 %v3511_v12, %s3359_s27 }
 0x47d   : > { %1221 = vrot.lane.b32.xlu0 %v3509_v11, %s3358_s26 }
 0x47e   : > { %1112 = vrot.lane.b32.xlu1 %v3472_v2, %s3360_s28 }
 0x481   : > { %1118 = vrot.lane.b32.xlu0 %v3509_v11, %s3359_s27 }
 0x485   : > { %1215 = vrot.lane.b32.xlu0 %v3472_v2, %s3361_s29 }
 0x489   : > { %1213 = vrot.lane.b32.xlu0 %v3525_v13, %s3361_s29 }
 0x48d   : > { %1110 = vrot.lane.b32.xlu0 %v3525_v13, %s3360_s28 }
 0x4ee   : > { %v934_v59 = vpop.xlane.xlu1 %933 }
 0x4f0   : > { %v931_v60 = vpop.xlane.xlu0 %930 }
 0x4f1   : > { %3311 = vrcp.f32 %v931_v60 }
 0x4f2   : > { %v1224_v61 = vpop.permute.xlu1 %1223  ;;  %3313 = vrcp.f32 %v934_v59 }
 0x4f4   : > { %v1222_v62 = vpop.permute.xlu0 %1221 }
 0x4f6   : > { %v1121_v0 = vpop.permute.xlu1 %1120 }
 0x4f8   : > { %v1119_v63 = vpop.permute.xlu0 %1118 }
 0x4f9   : > { %3153 = vmatprep.mubr.msk.f32.mxu1 %vm632_vm1, %v1119_v63 }
 0x4fa   : > { %3154 = vmatmul.mubr.msk.f32.vlgmr.msra.gmra.mxu1 %vm632_vm1, %v1121_v0  ;;  %v1113_v28 = vpop.permute.xlu1 %1112  ;;  %v1522_v0 = vld [vmem:[%s3891_s3 + $0x8] sm:$0xff] }
 0x4fb   : > { %v1117_v39 = vmul.f32 %v1113_v28, %v3511_v12 }
 0x4fc   : > { %v1216_v26 = vpop.permute.xlu0 %1215 }
 0x4fd   : > { %v1220_v30 = vmul.f32 %v1216_v26, %v3511_v12 }
 0x4fe   : > { %v3312_v3 = vpop.eup %3311 }
 0x4ff   : > { %v3314_v8 = vpop.eup %3313 }
 0x500   : > { %v1214_v27 = vpop.permute.xlu0 %1213 }
 0x501   : > { %v1219_v34 = vmul.f32 %v1214_v27, %v3509_v11  ;;  %v2952_v27 = vld [vmem:[%s3892_s4] ss:$0 sm:$0xff] }
 0x504   : > { %v1111_v29 = vpop.permute.xlu0 %1110 }
 0x505   : > { %v1116_v35 = vmul.f32 %v1111_v29, %v3509_v11 }
 0x527   : > { %v3145_v1 = vpop.f32.mrf.mxu1 }
 0x528   : > { %v1025_v10 = vmul.f32 %v3314_v8, %v3145_v1 }
 0x529   : > { %v1013_v4 = vpop.f32.mrf.mxu1 }
 0x52a   : > { %v1024_v9 = vmul.f32 %v3312_v3, %v1013_v4 }
 0x52c   : > { %3148 = vmatprep.mubr.msk.f32.mxu0 %vm632_vm1, %v1024_v9 }
 0x52d   : > { %3149 = vmatmul.mubr.msk.f32.vlgmr.msra.gmra.mxu0 %vm632_vm1, %v1025_v10 }
 0x52e   : > { %3157 = vmatpush3.msra.mxu0 %v3501_v7  ;;  %3158 = vmatprep.mubr.msk.f32.mxu0 %vm632_vm1, %v1222_v62 }
 0x531   : > { %3159 = vmatmul.mubr.msk.f32.vlgmr.msra.gmra.mxu0 %vm632_vm1, %v1224_v61 }
 0x5ba   : > { %v3155_v14 = vpop.f32.mrf.mxu1 }
 0x5bb   : > { %v1202_v25 = vmul.f32 %v3155_v14, %v3543_v22 }
 0x5bc   : > { %v1192_v15 = vpop.f32.mrf.mxu1 }
 0x5bd   : > { %v1201_v16 = vmul.f32 %v1192_v15, %v3534_v17 }
 0x5bf   : > { %1205 = vrot.lane.b32.xlu0 %v1201_v16, %s3360_s28 }
 0x5ed   : > { %v3600_v18 = vpop.f32.mrf.mxu0 }
 0x5ee   : > { %v1109_v28 = vadd.f32 %v3600_v18, %v2952_v27 }
 0x5ef   : > { %v3602_v19 = vpop.f32.mrf.mxu0 }
 0x5f1   : > { %v3160_v20 = vpop.f32.mrf.mxu0 }
 0x5f2   : > { %v1305_v21 = vmul.f32 %v3160_v20, %v3543_v22 }
 0x5f3   : > { %v1295_v23 = vpop.f32.mrf.mxu0 }
 0x5f4   : > { %1310 = vrot.lane.b32.xlu1 %v1305_v21, %s3361_s29  ;;  %v1304_v24 = vmul.f32 %v1295_v23, %v3534_v17 }
 0x5f8   : > { %1308 = vrot.lane.b32.xlu1 %v1304_v24, %s3361_s29 }
 0x5fc   : > { %1207 = vrot.lane.b32.xlu1 %v1202_v25, %s3360_s28 }
 0x631   : > { %v1206_v33 = vpop.permute.xlu0 %1205 }
 0x632   : > { %v1211_v37 = vadd.f32 %v1206_v33, %v1116_v35 }
 0x666   : > { %v1311_v31 = vpop.permute.xlu1 %1310 }
 0x667   : > { %v1315_v32 = vadd.f32 %v1311_v31, %v1220_v30  ;;  %v1108_v30 = vadd.f32 %v2952_v27, %v3602_v19 }
 0x669   : > { %1326 = vrot.lane.b32.xlu0 %v1315_v32, %s3358_s26 }
 0x66a   : > { %v1309_v36 = vpop.permute.xlu1 %1308 }
 0x66b   : > { %v1314_v38 = vadd.f32 %v1309_v36, %v1219_v34 }
 0x66d   : > { %1324 = vrot.lane.b32.xlu1 %v1314_v38, %s3358_s26  ;;  %1318 = vrot.lane.b32.xlu0 %v1211_v37, %s3359_s27 }
 0x66e   : > { %v1208_v40 = vpop.permute.xlu1 %1207 }
 0x66f   : > { %v1212_v41 = vadd.f32 %v1208_v40, %v1117_v39 }
 0x671   : > { %1320 = vrot.lane.b32.xlu1 %v1212_v41, %s3359_s27 }
 0x6db   : > { %v1327_v42 = vpop.permute.xlu0 %1326 }
 0x6dc   : > { %3161 = vmatprep.subr.msk.mxu1 %vm632_vm1, %v1327_v42 }
 0x6dd   : > { %3162 = vmatpush3.xpose.msk.msra.mxu1 %vm632_vm1, %v1327_v42 }
 0x6df   : > { %v1325_v43 = vpop.permute.xlu1 %1324  ;;  %v1319_v44 = vpop.permute.xlu0 %1318 }
 0x6e0   : > { %3163 = vmatprep.subr.msk.mxu1 %vm632_vm1, %v1325_v43  ;;  %3165 = vmatprep.mubr.msk.f32.mxu1 %vm632_vm1, %v1319_v44 }
 0x6e1   : > { %3164 = vmatpush3.xpose.msk.msra.mxu1 %vm632_vm1, %v1325_v43 }
 0x6e2   : > { %3180 = vmatprep.subr.mxu1 %v3501_v7 }
 0x6e3   : > { %v1321_v45 = vpop.permute.xlu1 %1320 }
 0x6e4   : > { %3166 = vmatmul.mubr.msk.f32.vlgmr.msra.gmra.mxu1 %vm632_vm1, %v1321_v45 }
 0x6e5   : > { %3181 = vmatpush3.msra.mxu1 %v3501_v7 }
 0x7a4   : > { %v3167_v46 = vpop.f32.mrf.mxu1 }
 0x7a5   : > { %v1412_v47 = vmul.f32 0.35355338, %v3167_v46 }
 0x7a6   : > { %v1402_v48 = vpop.f32.mrf.mxu1 }
 0x7a7   : > { %v1411_v49 = vmul.f32 0.35355338, %v1402_v48  ;;  %v1416_v50 = vsel %vm916_vm2, %v1412_v47, -inf }
 0x7a8   : > { %1417 = vmax.xlane.f32.xlu1 %v1416_v50 }
 0x7a9   : > { %v1413_v51 = vsel %vm916_vm2, %v1411_v49, -inf }
 0x7aa   : > { %1414 = vmax.xlane.f32.xlu0 %v1413_v51 }
 0x7b9   : > { %1431 = vrot.lane.b32.xlu1 %v3509_v11, %s3362_s18 }
 0x7c0   : > { %1433 = vrot.lane.b32.xlu0 %v3511_v12, %s3362_s18 }
 0x831   : > { %v1418_v52 = vpop.xlane.xlu1 %1417 }
 0x832   : > { %v1420_v53 = vsub.f32 %v1412_v47, %v1418_v52 }
 0x833   : > { %v1415_v54 = vpop.xlane.xlu0 %1414 }
 0x834   : > { %v1423_v55 = vmul.f32 1.442695, %v1420_v53  ;;  %v1419_v56 = vsub.f32 %v1411_v49, %v1415_v54 }
 0x835   : > { %v1432_v59 = vpop.permute.xlu1 %1431 }
 0x836   : > { %3315 = vpow2.f32 %v1423_v55  ;;  %v1421_v57 = vmul.f32 1.442695, %v1419_v56 }
 0x837   : > { %v1434_v58 = vpop.permute.xlu0 %1433 }
 0x838   : > { %3317 = vpow2.f32 %v1421_v57  ;;  %3168 = vmatprep.subr.mxu0 %v1434_v58 }
 0x839   : > { %3169 = vmatpush3.msra.mxu0 %v1434_v58 }
 0x83a   : > { %3170 = vmatprep.subr.mxu0 %v1432_v59 }
 0x83b   : > { %3171 = vmatpush3.msra.mxu0 %v1432_v59 }
 0x83c   : > { %3175 = vmatprep.subr.mxu0 %v1522_v0 }
 0x843   : > { %v3316_v60 = vpop.eup %3315 }
 0x844   : > { %v1428_v61 = vsel %vm916_vm2, %v3316_v60, 0.0 }
 0x845   : > { %v3318_v62 = vpop.eup %3317  ;;  %1429 = vadd.xlane.f32.xlu1 %v1428_v61 }
 0x846   : > { %3172 = vmatprep.mubr.msk.f32.mxu0 %vm916_vm2, %v3318_v62  ;;  %v1425_v63 = vsel %vm916_vm2, %v3318_v62, 0.0 }
 0x847   : > { %1426 = vadd.xlane.f32.xlu0 %v1425_v63  ;;  %3173 = vmatmul.mubr.msk.f32.vlgmr.msra.gmra.mxu0 %vm916_vm2, %v3316_v60 }
 0x848   : > { %3176 = vmatpush3.msra.mxu0 %v1522_v0 }
 0x849   : > { %3185 = vmatprep.subr.mxu0 %v3501_v7 }
 0x856   : > { %1719 = vrot.lane.b32.xlu1 %v3511_v12, %s3363_s20 }
 0x85a   : > { %1616 = vrot.lane.b32.xlu1 %v3511_v12, %s3364_s23 }
 0x85d   : > { %1717 = vrot.lane.b32.xlu0 %v3509_v11, %s3363_s20 }
 0x85e   : > { %1608 = vrot.lane.b32.xlu1 %v3472_v2, %s3365_s24 }
 0x861   : > { %1614 = vrot.lane.b32.xlu0 %v3509_v11, %s3364_s23 }
 0x865   : > { %1711 = vrot.lane.b32.xlu0 %v3472_v2, %s3366_s25 }
 0x869   : > { %1709 = vrot.lane.b32.xlu0 %v3525_v13, %s3366_s25 }
 0x86d   : > { %1606 = vrot.lane.b32.xlu0 %v3525_v13, %s3365_s24 }
 0x8ce   : > { %v1430_v1 = vpop.xlane.xlu1 %1429 }
 0x8d0   : > { %v1427_v3 = vpop.xlane.xlu0 %1426 }
 0x8d1   : > { %3319 = vrcp.f32 %v1427_v3 }
 0x8d2   : > { %v1720_v4 = vpop.permute.xlu1 %1719  ;;  %3321 = vrcp.f32 %v1430_v1 }
 0x8d4   : > { %v1718_v8 = vpop.permute.xlu0 %1717 }
 0x8d6   : > { %v1617_v10 = vpop.permute.xlu1 %1616 }
 0x8d8   : > { %v1615_v9 = vpop.permute.xlu0 %1614 }
 0x8d9   : > { %3182 = vmatprep.mubr.msk.f32.mxu1 %vm632_vm1, %v1615_v9 }
 0x8da   : > { %3183 = vmatmul.mubr.msk.f32.vlgmr.msra.gmra.mxu1 %vm632_vm1, %v1617_v10  ;;  %v1609_v39 = vpop.permute.xlu1 %1608 }
 0x8db   : > { %v1613_v50 = vmul.f32 %v1609_v39, %v3511_v12 }
 0x8dc   : > { %v1712_v19 = vpop.permute.xlu0 %1711 }
 0x8dd   : > { %v1716_v41 = vmul.f32 %v1712_v19, %v3511_v12 }
 0x8de   : > { %v3320_v15 = vpop.eup %3319 }
 0x8df   : > { %v3322_v20 = vpop.eup %3321 }
 0x8e0   : > { %v1710_v38 = vpop.permute.xlu0 %1709 }
 0x8e1   : > { %v1715_v45 = vmul.f32 %v1710_v38, %v3509_v11 }
 0x8e4   : > { %v1607_v40 = vpop.permute.xlu0 %1606 }
 0x8e5   : > { %v1612_v46 = vmul.f32 %v1607_v40, %v3509_v11 }
 0x907   : > { %v3174_v14 = vpop.f32.mrf.mxu0 }
 0x908   : > { %v1521_v23 = vmul.f32 %v3322_v20, %v3174_v14 }
 0x909   : > { %v1509_v16 = vpop.f32.mrf.mxu0 }
 0x90a   : > { %v1520_v21 = vmul.f32 %v3320_v15, %v1509_v16 }
 0x90c   : > { %3177 = vmatprep.mubr.msk.f32.mxu0 %vm632_vm1, %v1520_v21  ;;  %v2018_v21 = vld [vmem:[%s3891_s3 + $0x10] sm:$0xff] }
 0x90d   : > { %3178 = vmatmul.mubr.msk.f32.vlgmr.msra.gmra.mxu0 %vm632_vm1, %v1521_v23 }
 0x90e   : > { %3186 = vmatpush3.msra.mxu0 %v3501_v7  ;;  %3187 = vmatprep.mubr.msk.f32.mxu0 %vm632_vm1, %v1718_v8 }
 0x911   : > { %3188 = vmatmul.mubr.msk.f32.vlgmr.msra.gmra.mxu0 %vm632_vm1, %v1720_v4 }
 0x99a   : > { %v3184_v24 = vpop.f32.mrf.mxu1 }
 0x99b   : > { %v1698_v18 = vmul.f32 %v3184_v24, %v3543_v22 }
 0x99c   : > { %v1688_v25 = vpop.f32.mrf.mxu1 }
 0x99d   : > { %v1697_v26 = vmul.f32 %v1688_v25, %v3534_v17 }
 0x99f   : > { %1701 = vrot.lane.b32.xlu0 %v1697_v26, %s3365_s24 }
 0x9cd   : > { %v3179_v29 = vpop.f32.mrf.mxu0 }
 0x9ce   : > { %v3670_v31 = vadd.f32 %v3179_v29, %v1109_v28 }
 0x9cf   : > { %v1595_v32 = vpop.f32.mrf.mxu0 }
 0x9d0   : > { %v3672_v33 = vadd.f32 %v1595_v32, %v1108_v30 }
 0x9d1   : > { %v3189_v34 = vpop.f32.mrf.mxu0 }
 0x9d2   : > { %v1801_v35 = vmul.f32 %v3189_v34, %v3543_v22 }
 0x9d3   : > { %v1791_v36 = vpop.f32.mrf.mxu0 }
 0x9d4   : > { %1806 = vrot.lane.b32.xlu1 %v1801_v35, %s3366_s25  ;;  %v1800_v37 = vmul.f32 %v1791_v36, %v3534_v17 }
 0x9d8   : > { %1804 = vrot.lane.b32.xlu1 %v1800_v37, %s3366_s25 }
 0x9dc   : > { %1703 = vrot.lane.b32.xlu1 %v1698_v18, %s3365_s24 }
 0xa11   : > { %v1702_v44 = vpop.permute.xlu0 %1701 }
 0xa12   : > { %v1707_v48 = vadd.f32 %v1702_v44, %v1612_v46 }
 0xa46   : > { %v1807_v42 = vpop.permute.xlu1 %1806 }
 0xa47   : > { %v1811_v43 = vadd.f32 %v1807_v42, %v1716_v41 }
 0xa49   : > { %1822 = vrot.lane.b32.xlu0 %v1811_v43, %s3363_s20 }
 0xa4a   : > { %v1805_v47 = vpop.permute.xlu1 %1804 }
 0xa4b   : > { %v1810_v49 = vadd.f32 %v1805_v47, %v1715_v45 }
 0xa4d   : > { %1820 = vrot.lane.b32.xlu1 %v1810_v49, %s3363_s20  ;;  %1814 = vrot.lane.b32.xlu0 %v1707_v48, %s3364_s23  ;;  %s3369_s20 = smov 24  }
 0xa4e   : > { %v1704_v51 = vpop.permute.xlu1 %1703 }
 0xa4f   : > { %v1708_v52 = vadd.f32 %v1704_v51, %v1613_v50 }
 0xa51   : > { %1816 = vrot.lane.b32.xlu1 %v1708_v52, %s3364_s23 }
 0xabb   : > { %v1823_v53 = vpop.permute.xlu0 %1822 }
 0xabc   : > { %3190 = vmatprep.subr.msk.mxu1 %vm632_vm1, %v1823_v53 }
 0xabd   : > { %3191 = vmatpush3.xpose.msk.msra.mxu1 %vm632_vm1, %v1823_v53 }
 0xabf   : > { %v1821_v54 = vpop.permute.xlu1 %1820  ;;  %v1815_v55 = vpop.permute.xlu0 %1814 }
 0xac0   : > { %3192 = vmatprep.subr.msk.mxu1 %vm632_vm1, %v1821_v54  ;;  %3194 = vmatprep.mubr.msk.f32.mxu1 %vm632_vm1, %v1815_v55 }
 0xac1   : > { %3193 = vmatpush3.xpose.msk.msra.mxu1 %vm632_vm1, %v1821_v54 }
 0xac2   : > { %3209 = vmatprep.subr.mxu1 %v3501_v7 }
 0xac3   : > { %v1817_v56 = vpop.permute.xlu1 %1816 }
 0xac4   : > { %3195 = vmatmul.mubr.msk.f32.vlgmr.msra.gmra.mxu1 %vm632_vm1, %v1817_v56 }
 0xac5   : > { %3210 = vmatpush3.msra.mxu1 %v3501_v7 }
 0xb84   : > { %v3196_v57 = vpop.f32.mrf.mxu1 }
 0xb85   : > { %v1908_v58 = vmul.f32 0.35355338, %v3196_v57 }
 0xb86   : > { %v1898_v59 = vpop.f32.mrf.mxu1 }
 0xb87   : > { %v1907_v60 = vmul.f32 0.35355338, %v1898_v59  ;;  %v1912_v61 = vsel %vm916_vm2, %v1908_v58, -inf }
 0xb88   : > { %1913 = vmax.xlane.f32.xlu1 %v1912_v61 }
 0xb89   : > { %v1909_v62 = vsel %vm916_vm2, %v1907_v60, -inf }
 0xb8a   : > { %1910 = vmax.xlane.f32.xlu0 %v1909_v62 }
 0xb99   : > { %1927 = vrot.lane.b32.xlu1 %v3509_v11, %s3366_s25 }
 0xba0   : > { %1929 = vrot.lane.b32.xlu0 %v3511_v12, %s3366_s25 }
 0xc11   : > { %v1914_v63 = vpop.xlane.xlu1 %1913 }
 0xc12   : > { %v1916_v0 = vsub.f32 %v1908_v58, %v1914_v63 }
 0xc13   : > { %v1911_v1 = vpop.xlane.xlu0 %1910 }
 0xc14   : > { %v1919_v3 = vmul.f32 1.442695, %v1916_v0  ;;  %v1915_v4 = vsub.f32 %v1907_v60, %v1911_v1 }
 0xc15   : > { %v1928_v10 = vpop.permute.xlu1 %1927 }
 0xc16   : > { %3323 = vpow2.f32 %v1919_v3  ;;  %v1917_v8 = vmul.f32 1.442695, %v1915_v4 }
 0xc17   : > { %v1930_v9 = vpop.permute.xlu0 %1929 }
 0xc18   : > { %3325 = vpow2.f32 %v1917_v8  ;;  %3197 = vmatprep.subr.mxu0 %v1930_v9 }
 0xc19   : > { %3198 = vmatpush3.msra.mxu0 %v1930_v9 }
 0xc1a   : > { %3199 = vmatprep.subr.mxu0 %v1928_v10 }
 0xc1b   : > { %3200 = vmatpush3.msra.mxu0 %v1928_v10 }
 0xc1c   : > { %3204 = vmatprep.subr.mxu0 %v2018_v21 }
 0xc23   : > { %v3324_v14 = vpop.eup %3323 }
 0xc24   : > { %v1924_v15 = vsel %vm916_vm2, %v3324_v14, 0.0 }
 0xc25   : > { %v3326_v16 = vpop.eup %3325  ;;  %1925 = vadd.xlane.f32.xlu1 %v1924_v15 }
 0xc26   : > { %3201 = vmatprep.mubr.msk.f32.mxu0 %vm916_vm2, %v3326_v16  ;;  %v1921_v20 = vsel %vm916_vm2, %v3326_v16, 0.0 }
 0xc27   : > { %1922 = vadd.xlane.f32.xlu0 %v1921_v20  ;;  %3202 = vmatmul.mubr.msk.f32.vlgmr.msra.gmra.mxu0 %vm916_vm2, %v3324_v14 }
 0xc28   : > { %3205 = vmatpush3.msra.mxu0 %v2018_v21 }
 0xc29   : > { %3214 = vmatprep.subr.mxu0 %v3501_v7 }
 0xc36   : > { %2215 = vrot.lane.b32.xlu1 %v3511_v12, %s3367_s30 }
 0xc3a   : > { %2112 = vrot.lane.b32.xlu1 %v3511_v12, %s3368_s17 }
 0xc3d   : > { %2213 = vrot.lane.b32.xlu0 %v3509_v11, %s3367_s30 }
 0xc3e   : > { %2104 = vrot.lane.b32.xlu1 %v3472_v2, %s3369_s20 }
 0xc41   : > { %2110 = vrot.lane.b32.xlu0 %v3509_v11, %s3368_s17 }
 0xc45   : > { %2207 = vrot.lane.b32.xlu0 %v3472_v2, %s3362_s18 }
 0xc49   : > { %2205 = vrot.lane.b32.xlu0 %v3525_v13, %s3362_s18 }
 0xc4d   : > { %2102 = vrot.lane.b32.xlu0 %v3525_v13, %s3369_s20 }
 0xcae   : > { %v1926_v23 = vpop.xlane.xlu1 %1925 }
 0xcb0   : > { %v1923_v24 = vpop.xlane.xlu0 %1922 }
 0xcb1   : > { %3327 = vrcp.f32 %v1923_v24 }
 0xcb2   : > { %v2216_v25 = vpop.permute.xlu1 %2215  ;;  %3329 = vrcp.f32 %v1926_v23  ;;  %v2514_v23 = vld [vmem:[%s3891_s3 + $0x18] sm:$0xff] }
 0xcb4   : > { %v2214_v26 = vpop.permute.xlu0 %2213 }
 0xcb6   : > { %v2113_v2 = vpop.permute.xlu1 %2112 }
 0xcb8   : > { %v2111_v27 = vpop.permute.xlu0 %2110 }
 0xcb9   : > { %3211 = vmatprep.mubr.msk.f32.mxu1 %vm632_vm1, %v2111_v27 }
 0xcba   : > { %3212 = vmatmul.mubr.msk.f32.vlgmr.msra.gmra.mxu1 %vm632_vm1, %v2113_v2  ;;  %v2105_v45 = vpop.permute.xlu1 %2104 }
 0xcbb   : > { %v2109_v53 = vmul.f32 %v2105_v45, %v3511_v12  ;;  %v2647_v45 = vld [vmem:[%s3895_s7 + $0x10] sm:$0xff] }
 0xcbe   : > { %v3328_v28 = vpop.eup %3327 }
 0xcbf   : > { %v3330_v30 = vpop.eup %3329 }
 0xce7   : > { %v3203_v13 = vpop.f32.mrf.mxu0 }
 0xce8   : > { %v2017_v34 = vmul.f32 %v3330_v30, %v3203_v13 }
 0xce9   : > { %v2005_v29 = vpop.f32.mrf.mxu0 }
 0xcea   : > { %v2016_v32 = vmul.f32 %v3328_v28, %v2005_v29 }
 0xcec   : > { %3206 = vmatprep.mubr.msk.f32.mxu0 %vm632_vm1, %v2016_v32 }
 0xced   : > { %3207 = vmatmul.mubr.msk.f32.vlgmr.msra.gmra.mxu0 %vm632_vm1, %v2017_v34 }
 0xcee   : > { %3215 = vmatpush3.msra.mxu0 %v3501_v7  ;;  %3216 = vmatprep.mubr.msk.f32.mxu0 %vm632_vm1, %v2214_v26 }
 0xcf1   : > { %3217 = vmatmul.mubr.msk.f32.vlgmr.msra.gmra.mxu0 %vm632_vm1, %v2216_v25 }
 0xd7a   : > { %v3213_v35 = vpop.f32.mrf.mxu1 }
 0xd7b   : > { %v2194_v43 = vmul.f32 %v3213_v35, %v3543_v22 }
 0xd7c   : > { %v2184_v36 = vpop.f32.mrf.mxu1 }
 0xd7d   : > { %v2193_v37 = vmul.f32 %v2184_v36, %v3534_v17 }
 0xd7f   : > { %2197 = vrot.lane.b32.xlu0 %v2193_v37, %s3369_s20 }
 0xdad   : > { %v3208_v18 = vpop.f32.mrf.mxu0 }
 0xdae   : > { %v3736_v19 = vadd.f32 %v3208_v18, %v3670_v31  ;;  %v2208_v31 = vpop.permute.xlu0 %2207 }
 0xdaf   : > { %v2091_v38 = vpop.f32.mrf.mxu0 }
 0xdb0   : > { %v3739_v39 = vadd.f32 %v2091_v38, %v3672_v33  ;;  %v2212_v33 = vmul.f32 %v2208_v31, %v3511_v12 }
 0xdb1   : > { %v3218_v40 = vpop.f32.mrf.mxu0 }
 0xdb2   : > { %v2297_v7 = vmul.f32 %v3218_v40, %v3543_v22  ;;  %v2206_v44 = vpop.permute.xlu0 %2205 }
 0xdb3   : > { %v2287_v41 = vpop.f32.mrf.mxu0  ;;  %v2211_v50 = vmul.f32 %v2206_v44, %v3509_v11  ;;  %v2648_v44 = vld [vmem:[%s3895_s7 + $0x18] sm:$0xff] }
 0xdb4   : > { %2302 = vrot.lane.b32.xlu1 %v2297_v7, %s3362_s18  ;;  %v2296_v42 = vmul.f32 %v2287_v41, %v3534_v17 }
 0xdb6   : > { %v2103_v46 = vpop.permute.xlu0 %2102 }
 0xdb7   : > { %v2108_v51 = vmul.f32 %v2103_v46, %v3509_v11  ;;  %v2646_v46 = vld [vmem:[%s3895_s7 + $0x8] sm:$0xff] }
 0xdb8   : > { %2300 = vrot.lane.b32.xlu1 %v2296_v42, %s3362_s18 }
 0xdbc   : > { %2199 = vrot.lane.b32.xlu1 %v2194_v43, %s3369_s20 }
 0xdf1   : > { %v2198_v49 = vpop.permute.xlu0 %2197 }
 0xdf2   : > { %v2203_v52 = vadd.f32 %v2198_v49, %v2108_v51  ;;  %v2752_v49 = vld [vmem:[%s3897_s9 + $0x68] sm:$0xff]  ;;  %v2750_v51 = vld [vmem:[%s3897_s9 + $0x58] sm:$0xff] }
 0xe26   : > { %v2303_v47 = vpop.permute.xlu1 %2302 }
 0xe27   : > { %v2307_v48 = vadd.f32 %v2303_v47, %v2212_v33  ;;  %v2645_v33 = vld [vmem:[%s3895_s7] sm:$0xff]  ;;  %v2754_v47 = vld [vmem:[%s3897_s9 + $0x78] sm:$0xff] }
 0xe29   : > { %2318 = vrot.lane.b32.xlu0 %v2307_v48, %s3367_s30  ;;  %v2753_v48 = vld [vmem:[%s3897_s9 + $0x70] sm:$0xff] }
 0xe2a   : > { %v2301_v17 = vpop.permute.xlu1 %2300 }
 0xe2b   : > { %v2306_v22 = vadd.f32 %v2301_v17, %v2211_v50  ;;  %v2751_v50 = vld [vmem:[%s3897_s9 + $0x60] sm:$0xff]  ;;  %v2749_v17 = vld [vmem:[%s3897_s9 + $0x50] sm:$0xff] }
 0xe2d   : > { %2316 = vrot.lane.b32.xlu1 %v2306_v22, %s3367_s30  ;;  %2310 = vrot.lane.b32.xlu0 %v2203_v52, %s3368_s17  ;;  %v2748_v52 = vld [vmem:[%s3897_s9 + $0x48] sm:$0xff]  ;;  %v2747_v22 = vld [vmem:[%s3897_s9 + $0x40] sm:$0xff] }
 0xe2e   : > { %v2200_v54 = vpop.permute.xlu1 %2199 }
 0xe2f   : > { %v2204_v55 = vadd.f32 %v2200_v54, %v2109_v53  ;;  %v2746_v53 = vld [vmem:[%s3897_s9 + $0x38] sm:$0xff]  ;;  %v2745_v54 = vld [vmem:[%s3897_s9 + $0x30] sm:$0xff] }
 0xe31   : > { %2312 = vrot.lane.b32.xlu1 %v2204_v55, %s3368_s17  ;;  %v2744_v55 = vld [vmem:[%s3897_s9 + $0x28] sm:$0xff]  ;;  %s521_s17 = scalar_lea.vmem %s3904_s16, %s3011_s19 }
 0xe9b   : > { %v2319_v56 = vpop.permute.xlu0 %2318 }
 0xe9c   : > { %3219 = vmatprep.subr.msk.mxu1 %vm632_vm1, %v2319_v56 }
 0xe9d   : > { %3220 = vmatpush3.xpose.msk.msra.mxu1 %vm632_vm1, %v2319_v56  ;;  %v2743_v56 = vld [vmem:[%s3897_s9 + $0x20] sm:$0xff] }
 0xe9f   : > { %v2317_v57 = vpop.permute.xlu1 %2316  ;;  %v2311_v58 = vpop.permute.xlu0 %2310 }
 0xea0   : > { %3221 = vmatprep.subr.msk.mxu1 %vm632_vm1, %v2317_v57  ;;  %3223 = vmatprep.mubr.msk.f32.mxu1 %vm632_vm1, %v2311_v58 }
 0xea1   : > { %3222 = vmatpush3.xpose.msk.msra.mxu1 %vm632_vm1, %v2317_v57 }
 0xea2   : > { %3238 = vmatprep.subr.mxu1 %v2648_v44 }
 0xea3   : > { %v2313_v59 = vpop.permute.xlu1 %2312 }
 0xea4   : > { %3224 = vmatmul.mubr.msk.f32.vlgmr.msra.gmra.mxu1 %vm632_vm1, %v2313_v59 }
 0xea5   : > { %3239 = vmatpush3.msra.mxu1 %v2648_v44 }
 0xea6   : > { %3240 = vmatprep.subr.mxu1 %v2647_v45 }
 0xea7   : > { %3241 = vmatpush3.msra.mxu1 %v2647_v45 }
 0xea8   : > { %3242 = vmatprep.subr.mxu1 %v2646_v46 }
 0xea9   : > { %3243 = vmatpush3.msra.mxu1 %v2646_v46 }
 0xeaa   : > { %3244 = vmatprep.subr.mxu1 %v2645_v33 }
 0xeab   : > { %3245 = vmatpush3.msra.mxu1 %v2645_v33 }
 0xf64   : > { %v3225_v60 = vpop.f32.mrf.mxu1 }
 0xf65   : > { %v2404_v61 = vmul.f32 0.35355338, %v3225_v60 }
 0xf66   : > { %v2394_v62 = vpop.f32.mrf.mxu1 }
 0xf67   : > { %v2403_v63 = vmul.f32 0.35355338, %v2394_v62  ;;  %v2408_v0 = vsel %vm916_vm2, %v2404_v61, -inf }
 0xf68   : > { %2409 = vmax.xlane.f32.xlu1 %v2408_v0  ;;  %v3001_v0 = vld [vmem:[%s3893_s5] ss:$0 sm:$0xff] }
 0xf69   : > { %v2405_v1 = vsel %vm916_vm2, %v2403_v63, -inf }
 0xf6a   : > { %2406 = vmax.xlane.f32.xlu0 %v2405_v1 }
 0xf79   : > { %2423 = vrot.lane.b32.xlu1 %v3509_v11, %s3361_s29 }
 0xf80   : > { %2425 = vrot.lane.b32.xlu0 %v3511_v12, %s3361_s29 }
 0xff1   : > { %v2410_v3 = vpop.xlane.xlu1 %2409 }
 0xff2   : > { %v2412_v4 = vsub.f32 %v2404_v61, %v2410_v3  ;;  %v3002_v3 = vld [vmem:[%s3894_s6] ss:$0 sm:$0xff] }
 0xff3   : > { %v2407_v8 = vpop.xlane.xlu0 %2406 }
 0xff4   : > { %v2415_v9 = vmul.f32 1.442695, %v2412_v4  ;;  %v2411_v10 = vsub.f32 %v2403_v63, %v2407_v8 }
 0xff5   : > { %v2424_v16 = vpop.permute.xlu1 %2423 }
 0xff6   : > { %3331 = vpow2.f32 %v2415_v9  ;;  %v2413_v14 = vmul.f32 1.442695, %v2411_v10 }
 0xff7   : > { %v2426_v15 = vpop.permute.xlu0 %2425 }
 0xff8   : > { %3333 = vpow2.f32 %v2413_v14  ;;  %3226 = vmatprep.subr.mxu0 %v2426_v15 }
 0xff9   : > { %3227 = vmatpush3.msra.mxu0 %v2426_v15 }
 0xffa   : > { %3228 = vmatprep.subr.mxu0 %v2424_v16 }
 0xffb   : > { %3229 = vmatpush3.msra.mxu0 %v2424_v16  ;;  %v2742_v16 = vld [vmem:[%s3897_s9 + $0x18] sm:$0xff] }
 0xffc   : > { %3233 = vmatprep.subr.mxu0 %v2514_v23 }
0x1003   : > { %v3332_v20 = vpop.eup %3331 }
0x1004   : > { %v2420_v11 = vsel %vm916_vm2, %v3332_v20, 0.0 }
0x1005   : > { %v3334_v21 = vpop.eup %3333  ;;  %2421 = vadd.xlane.f32.xlu1 %v2420_v11  ;;  %v2740_v11 = vld [vmem:[%s3897_s9 + $0x8] sm:$0xff] }
0x1006   : > { %3230 = vmatprep.mubr.msk.f32.mxu0 %vm916_vm2, %v3334_v21  ;;  %v2417_v12 = vsel %vm916_vm2, %v3334_v21, 0.0  ;;  %v2739_v21 = vld [vmem:[%s3897_s9] sm:$0xff] }
0x1007   : > { %2418 = vadd.xlane.f32.xlu0 %v2417_v12  ;;  %3231 = vmatmul.mubr.msk.f32.vlgmr.msra.gmra.mxu0 %vm916_vm2, %v3332_v20  ;;  %v2741_v20 = vld [vmem:[%s3897_s9 + $0x10] sm:$0xff]  ;;  %v3003_v12 = vld [vmem:[%s3896_s8] ss:$0 sm:$0xff] }
0x1008   : > { %3234 = vmatpush3.msra.mxu0 %v2514_v23 }
0x1009   : > { %3249 = vmatprep.subr.mxu0 %v2754_v47 }
0x108e   : > { %v2422_v25 = vpop.xlane.xlu1 %2421 }
0x1090   : > { %v2419_v24 = vpop.xlane.xlu0 %2418 }
0x1091   : > { %3335 = vrcp.f32 %v2419_v24 }
0x1092   : > { %3337 = vrcp.f32 %v2422_v25 }
0x109e   : > { %v3336_v27 = vpop.eup %3335 }
0x109f   : > { %v3338_v13 = vpop.eup %3337 }
0x10c7   : > { %v3232_v26 = vpop.f32.mrf.mxu0 }
0x10c8   : > { %v2513_v29 = vmul.f32 %v3338_v13, %v3232_v26  ;;  %v3006_v13 = vld [vmem:[%s3898_s10] ss:$0 sm:$0xff] }
0x10c9   : > { %v2501_v2 = vpop.f32.mrf.mxu0 }
0x10ca   : > { %v2512_v28 = vmul.f32 %v3336_v27, %v2501_v2 }
0x10cc   : > { %3235 = vmatprep.mubr.msk.f32.mxu0 %vm632_vm1, %v2512_v28 }
0x10cd   : > { %3236 = vmatmul.mubr.msk.f32.vlgmr.msra.gmra.mxu0 %vm632_vm1, %v2513_v29 }
0x10ce   : > { %3250 = vmatpush3.msra.mxu0 %v2754_v47 }
0x10cf   : > { %3251 = vmatprep.subr.mxu0 %v2753_v48 }
0x10d0   : > { %3252 = vmatpush3.msra.mxu0 %v2753_v48  ;;  %v3007_v48 = vld [vmem:[%s3899_s11] ss:$0 sm:$0xff] }
0x10d1   : > { %3253 = vmatprep.subr.mxu0 %v2752_v49 }
0x10d2   : > { %3254 = vmatpush3.msra.mxu0 %v2752_v49 }
0x10d3   : > { %3255 = vmatprep.subr.mxu0 %v2751_v50 }
0x10d4   : > { %3256 = vmatpush3.msra.mxu0 %v2751_v50 }
0x10d5   : > { %3257 = vmatprep.subr.mxu0 %v2750_v51 }
0x10d6   : > { %3258 = vmatpush3.msra.mxu0 %v2750_v51  ;;  %v3008_v51 = vld [vmem:[%s3900_s12] ss:$0 sm:$0xff] }
0x10d7   : > { %3259 = vmatprep.subr.mxu0 %v2749_v17 }
0x10d8   : > { %3260 = vmatpush3.msra.mxu0 %v2749_v17 }
0x10d9   : > { %3261 = vmatprep.subr.mxu0 %v2748_v52 }
0x10da   : > { %3262 = vmatpush3.msra.mxu0 %v2748_v52 }
0x10db   : > { %3263 = vmatprep.subr.mxu0 %v2747_v22 }
0x10dc   : > { %3264 = vmatpush3.msra.mxu0 %v2747_v22 }
0x10dd   : > { %3265 = vmatprep.subr.mxu0 %v2746_v53 }
0x10de   : > { %3266 = vmatpush3.msra.mxu0 %v2746_v53 }
0x10df   : > { %3267 = vmatprep.subr.mxu0 %v2745_v54 }
0x10e0   : > { %3268 = vmatpush3.msra.mxu0 %v2745_v54 }
0x10e1   : > { %3269 = vmatprep.subr.mxu0 %v2744_v55 }
0x10e2   : > { %3270 = vmatpush3.msra.mxu0 %v2744_v55 }
0x10e3   : > { %3271 = vmatprep.subr.mxu0 %v2743_v56 }
0x10e4   : > { %3272 = vmatpush3.msra.mxu0 %v2743_v56 }
0x10e5   : > { %3273 = vmatprep.subr.mxu0 %v2742_v16 }
0x10e6   : > { %3274 = vmatpush3.msra.mxu0 %v2742_v16 }
0x10e7   : > { %3275 = vmatprep.subr.mxu0 %v2741_v20 }
0x10e8   : > { %3276 = vmatpush3.msra.mxu0 %v2741_v20 }
0x10e9   : > { %3277 = vmatprep.subr.mxu0 %v2740_v11 }
0x10ea   : > { %3278 = vmatpush3.msra.mxu0 %v2740_v11 }
0x10eb   : > { %3279 = vmatprep.subr.mxu0 %v2739_v21 }
0x10ec   : > { %3280 = vmatpush3.msra.mxu0 %v2739_v21 }
0x118d   : > { %v3237_v30 = vpop.f32.mrf.mxu0 }
0x118e   : > { %v2597_v34 = vadd.f32 %v3237_v30, %v3736_v19 }
0x118f   : > { %v2587_v32 = vpop.f32.mrf.mxu0 }
0x1190   : > { %v2596_v35 = vadd.f32 %v2587_v32, %v3739_v39  ;;  %v2599_v18 = vadd.f32 %v2597_v34, %v3492_v6 }
0x1192   : > { %v2598_v36 = vadd.f32 %v2596_v35, %v3490_v5  ;;  %v2605_v38 = vsel %vm535_vm0, %v2599_v18, 0.0 }
0x1194   : > { %v2602_v37 = vsel %vm535_vm0, %v2598_v36, 0.0 }
0x1195   : > { %2603 = vadd.xlane.f32.xlu0 %v2602_v37 }
0x1199   : > { %2606 = vadd.xlane.f32.xlu0 %v2605_v38 }
0x121e   : > { %v2604_v40 = vpop.xlane.xlu0 %2603 }
0x121f   : > { %v2609_v7 = vmul.f32 0.03125, %v2604_v40 }
0x1221   : > { %v3782_v41 = vsub.f32 %v2598_v36, %v2609_v7 }
0x1222   : > { %v2607_v42 = vpop.xlane.xlu0 %2606 }
0x1223   : > { %v2610_v43 = vmul.f32 0.03125, %v2607_v42  ;;  %v2613_v19 = vmul.f32 %v3782_v41, %v3782_v41 }
0x1225   : > { %v3786_v39 = vsub.f32 %v2599_v18, %v2610_v43  ;;  %v2615_v5 = vsel %vm535_vm0, %v2613_v19, 0.0 }
0x1226   : > { %2616 = vadd.xlane.f32.xlu1 %v2615_v5 }
0x1227   : > { %v2614_v6 = vmul.f32 %v3786_v39, %v3786_v39 }
0x1229   : > { %v2618_v31 = vsel %vm535_vm0, %v2614_v6, 0.0 }
0x122a   : > { %2619 = vadd.xlane.f32.xlu0 %v2618_v31 }
0x12af   : > { %v2617_v57 = vpop.xlane.xlu1 %2616 }
0x12b0   : > { %v2621_v58 = vmul.f32 0.03125, %v2617_v57 }
0x12b2   : > { %v2623_v59 = vadd.f32 1e-05, %v2621_v58 }
0x12b3   : > { %v2620_v60 = vpop.xlane.xlu0 %2619 }
0x12b4   : > { %3339 = vrsqrt.f32 %v2623_v59  ;;  %v2622_v61 = vmul.f32 0.03125, %v2620_v60 }
0x12b6   : > { %v2624_v62 = vadd.f32 1e-05, %v2622_v61 }
0x12b8   : > { %3341 = vrsqrt.f32 %v2624_v62 }
0x12c1   : > { %v3340_v63 = vpop.eup %3339 }
0x12c2   : > { %v2627_v1 = vmul.f32 %v3340_v63, %v3782_v41 }
0x12c4   : > { %v2635_v4 = vmul.f32 %v3001_v0, %v2627_v1 }
0x12c5   : > { %v3342_v8 = vpop.eup %3341 }
0x12c6   : > { %v2628_v9 = vmul.f32 %v3342_v8, %v3786_v39  ;;  %v2643_v10 = vadd.f32 %v3002_v3, %v2635_v4 }
0x12c8   : > { %v2636_v14 = vmul.f32 %v3001_v0, %v2628_v9  ;;  %3246 = vmatprep.mubr.msk.f32.mxu1 %vm535_vm0, %v2643_v10 }
0x12ca   : > { %v2644_v15 = vadd.f32 %v3002_v3, %v2636_v14 }
0x12cc   : > { %3247 = vmatmul.mubr.msk.f32.vlgmr.msra.gmra.mxu1 %vm535_vm0, %v2644_v15 }
0x138c   : > { %v3248_v23 = vpop.f32.mrf.mxu1 }
0x138d   : > { %v2734_v24 = vadd.f32 %v3248_v23, %v3003_v12 }
0x138e   : > { %v2728_v25 = vpop.f32.mrf.mxu1 }
0x138f   : > { %v2729_v26 = vadd.f32 %v3003_v12, %v2728_v25  ;;  %v2738_v2 = vmax.f32 %v2734_v24, 0.0 }
0x1391   : > { %v2737_v27 = vmax.f32 %v2729_v26, 0.0 }
0x1393   : > { %3281 = vmatprep.mubr.f32.mxu0 %v2737_v27 }
0x1394   : > { %3282 = vmatmul.mubr.f32.vlgmr.msra.gmra.mxu0 %v2738_v2 }
0x1454   : > { %v3283_v28 = vpop.f32.mrf.mxu0 }
0x1455   : > { %v2834_v29 = vadd.f32 %v3283_v28, %v3006_v13 }
0x1456   : > { %v2828_v30 = vpop.f32.mrf.mxu0 }
0x1457   : > { %v2829_v32 = vadd.f32 %v3006_v13, %v2828_v30  ;;  %v2838_v34 = vadd.f32 %v2834_v29, %v2644_v15 }
0x1459   : > { %v2844_v35 = vsel %vm535_vm0, %v2838_v34, 0.0  ;;  %v2837_v36 = vadd.f32 %v2829_v32, %v2643_v10 }
0x145a   : > { %2845 = vadd.xlane.f32.xlu0 %v2844_v35 }
0x145b   : > { %v2841_v37 = vsel %vm535_vm0, %v2837_v36, 0.0 }
0x145c   : > { %2842 = vadd.xlane.f32.xlu1 %v2841_v37 }
0x14e3   : > { %v2846_v18 = vpop.xlane.xlu0 %2845 }
0x14e4   : > { %v2848_v38 = vmul.f32 0.03125, %v2846_v18 }
0x14e5   : > { %v2843_v40 = vpop.xlane.xlu1 %2842 }
0x14e6   : > { %v2850_v7 = vsub.f32 %v2838_v34, %v2848_v38  ;;  %v2847_v41 = vmul.f32 0.03125, %v2843_v40 }
0x14e8   : > { %v2849_v42 = vsub.f32 %v2837_v36, %v2847_v41  ;;  %v2852_v43 = vmul.f32 %v2850_v7, %v2850_v7 }
0x14ea   : > { %v2856_v19 = vsel %vm535_vm0, %v2852_v43, 0.0  ;;  %v2851_v39 = vmul.f32 %v2849_v42, %v2849_v42 }
0x14eb   : > { %2857 = vadd.xlane.f32.xlu0 %v2856_v19 }
0x14ec   : > { %v2853_v5 = vsel %vm535_vm0, %v2851_v39, 0.0 }
0x14ed   : > { %2854 = vadd.xlane.f32.xlu1 %v2853_v5 }
0x1574   : > { %v2858_v6 = vpop.xlane.xlu0 %2857 }
0x1575   : > { %v2860_v31 = vmul.f32 0.03125, %v2858_v6 }
0x1576   : > { %v2855_v44 = vpop.xlane.xlu1 %2854 }
0x1577   : > { %v2862_v45 = vadd.f32 1e-05, %v2860_v31  ;;  %v2859_v46 = vmul.f32 0.03125, %v2855_v44 }
0x1579   : > { %3343 = vrsqrt.f32 %v2862_v45  ;;  %v2861_v33 = vadd.f32 1e-05, %v2859_v46 }
0x157b   : > { %3345 = vrsqrt.f32 %v2861_v33 }
0x1586   : > { %v3344_v47 = vpop.eup %3343 }
0x1587   : > { %v2866_v49 = vmul.f32 %v3344_v47, %v2850_v7 }
0x1588   : > { %v3346_v50 = vpop.eup %3345 }
0x1589   : > { %v2874_v17 = vmul.f32 %v3007_v48, %v2866_v49  ;;  %v2865_v52 = vmul.f32 %v3346_v50, %v2849_v42 }
0x158b   : > { %v2882_v22 = vadd.f32 %v3008_v51, %v2874_v17  ;;  %v2873_v53 = vmul.f32 %v3007_v48, %v2865_v52 }
0x158d   : > { %2884 = vst.msk [vmem:[%s521_s17 + $0x8] sm:$0xff] %vm535_vm0, %v2882_v22  ;;  %v2881_v54 = vadd.f32 %v3008_v51, %v2873_v53 }
0x158f   : > { %2883 = vst.msk [vmem:[%s521_s17] sm:$0xff] %vm535_vm0, %v2881_v54 }
0x1590 PF: > { %s26_s21 = sadd.s32 1, %s3353_s21  }
0x1591   : > { %p23_p4 = scmp.ge.s32.totalorder %s26_s21, 4  }
0x1593   :  { %25 = sbr.rel (!%p23_p4) target bundleno = 2 (0x2), region = 114 }

// kernel: _lambda_.5
= control target key start
LH: loop header
LB: loop body
LE: loop exit
PB: predicated region body
PF: predicated region fallthrough
CT: control target
= control target key end

     0   :  { %s3492_s0 = inlined_call_operand.vmem [shape: f32[2,8,32], index: 0, kind: input, shape index: {}]   ;;  %s3493_s1 = inlined_call_operand.vmem [shape: f32[32,96], index: 1, kind: input, shape index: {}]   ;;  %s3494_s2 = inlined_call_operand.vmem [shape: f32[1,96], index: 2, kind: input, shape index: {}]   ;;  %s3495_s3 = inlined_call_operand.vmem [shape: f32[32,32], index: 3, kind: input, shape index: {}]   ;;  %s3496_s4 = inlined_call_operand.vmem [shape: f32[1,32], index: 4, kind: input, shape index: {}]   ;;  %s3497_s5 = inlined_call_operand.vmem [shape: f32[1,32], index: 5, kind: input, shape index: {}]   ;;  %s3498_s6 = inlined_call_operand.vmem [shape: f32[1,32], index: 6, kind: input, shape index: {}]   ;;  %s3499_s7 = inlined_call_operand.vmem [shape: f32[32,128], index: 7, kind: input, shape index: {}]   ;;  %s3500_s8 = inlined_call_operand.vmem [shape: f32[1,128], index: 8, kind: input, shape index: {}]   ;;  %s3501_s9 = inlined_call_operand.vmem [shape: f32[128,32], index: 9, kind: input, shape index: {}]   ;;  %s3502_s10 = inlined_call_operand.vmem [shape: f32[1,32], index: 10, kind: input, shape index: {}]   ;;  %s3503_s11 = inlined_call_operand.vmem [shape: f32[1,32], index: 11, kind: input, shape index: {}]   ;;  %s3504_s12 = inlined_call_operand.vmem [shape: f32[1,32], index: 12, kind: input, shape index: {}]   ;;  %s3505_s13 = inlined_call_operand.vmem [shape: f32[8,8], index: 13, kind: input, shape index: {}]   ;;  %s3506_s14 = inlined_call_operand.vmem [shape: f32[8,8], index: 14, kind: input, shape index: {}]   ;;  %s3507_s15 = inlined_call_operand.vmem [shape: f32[8,8], index: 15, kind: input, shape index: {}]   ;;  %s3508_s16 = inlined_call_operand.hbm [shape: f32[2,8,32], index: 16, kind: output, shape index: {}]  }
   0x1   :  { %3513 = sst [smem:[#allocation9_spill]] %s3492_s0 }
   0x2   :  { %3514 = sst [smem:[#allocation10_spill]] %s3493_s1 }
   0x3   :  { %3515 = sst [smem:[#allocation11_spill]] %s3494_s2 }
   0x4   :  { %3516 = sst [smem:[#allocation12_spill]] %s3495_s3 }
   0x5   :  { %21 = vsyncpa [#allocation3], 0 }
   0x6   :  { %23 = vsyncpa [#allocation3 + $0x1], 0  ;;  %s3072_s21 = smov 0   ;;  %s3074_s22 = smov 0  }
   0x7   :  { %s3076_s23 = smov 0   ;;  %s3078_s24 = smov 0  }
   0x8 LB: > { %3517 = sst [smem:[#allocation5_spill]] %s2963_s23  ;;  %s3093_s25 = sadd.s32 4294967295, %s2967_s24   ;;  %s2967_s24 = sphi %s3078_s24, %s3528_s24   ;;  %s2963_s23 = sphi %s3076_s23, %s3530_s23   ;;  %s2959_s22 = sphi %s3074_s22, %s3532_s22   ;;  %s2955_s21 = sphi %s3072_s21, %s3531_s21  }
   0x9   : > { %s2563_s26 = sadd.s32 4294967294, %s2967_s24   ;;  %s3097_s27 = sadd.s32 1, %s2967_s24  }
   0xa   : > { %3518 = sst [smem:[#allocation6_spill]] %s3097_s27  ;;  %s377_s28 = sadd.s32 1, %s2963_s23 }
   0xb   : > { %s374_s29 = ssub.s32 %s2967_s24, %s3097_s27  ;;  %p387_p0 = scmp.ne.s32.totalorder %s2963_s23, %s2959_s22 }
   0xc   : > { %p375_p1 = scmp.eq.s32.totalorder %s374_s29, 0  ;;  %p388_p2 = scmp.eq.s32.totalorder %s3093_s25, 1 }
   0xd   : > { %p393_p3 = scmp.ne.s32.totalorder %s2959_s22, %s2955_s21  ;;  %p394_p4 = scmp.eq.s32.totalorder %s2563_s26, 1 }
   0xe   : > { %s3108_s30 = scalar_select %p375_p1, %s2963_s23, %s377_s28  }
   0xf   : > { %p3110_p5 = por %p388_p2, %p387_p0  ;;  %p3114_p6 = por %p394_p4, %p393_p3 }
  0x10   : > { %3519 = sst [smem:[#allocation7_spill]] %s3108_s30  ;;  %p2566_p7 = scmp.ge.s32.totalorder %s2967_s24, 1 }
  0x11   : > { %s3521_s17 = scalar_select %p3114_p6, 1, 0 }
  0x12   : > { %p464_p8 = scmp.lt.s32.totalorder %s2967_s24, 3 }
  0x13   : > { %3522 = sst [smem:[#allocation8_spill]] %s3521_s17 }
  0x14   : > { %p465_p9 = pnand %p2566_p7, %p464_p8 }
  0x15   : > { %s3523_s1 = sld [smem:[#allocation10_spill]] (!%p465_p9)  ;;  %p513_p10 = scmp.lt.s32.totalorder (!%p465_p9), %s3093_s25, 1 }
  0x16   : > { %468 = sbr.rel (%p465_p9) target bundleno = 5489 (0x1571), region = 84  ;;  %s3524_s27 = sld [smem:[#allocation9_spill]] (!%p465_p9) }
  0x17   : > { %s3525_s2 = sld [smem:[#allocation11_spill]] (!%p465_p9)  ;;  %s2971_s30 = smov (!%p465_p9), 96  }
  0x18   : > { %s2974_s29 = smov (!%p465_p9), 88   ;;  %s2975_s23 = smov (!%p465_p9), 40  }
  0x19   : > { %s3526_s3 = sld [smem:[#allocation12_spill]] (!%p465_p9)  ;;  %s2979_s20 = smov (!%p465_p9), 80  }
  0x1a   : > { %s2980_s26 = smov (!%p465_p9), 48  }
  0x1b   : > { %v521_v0 = vld [vmem:[%s3523_s1 + $0x18] sm:$0xff]  ;;  %v2969_v1 = vmov 0.0   ;;  %v520_v2 = vld [vmem:[%s3523_s1 + $0x10] sm:$0xff]  ;;  %vm2970_vm0 = vmmov 0   ;;  %s514_s28 = scalar_select %p513_p10, %s3093_s25, 1  ;;  %v519_v3 = vld [vmem:[%s3523_s1 + $0x8] sm:$0xff] }
  0x1c   : > { %2674 = vmatprep.subr.mxu1 %v2969_v1  ;;  %2682 = vmatprep.mubr.msk.f32.mxu1 %vm2970_vm0, %v2969_v1  ;;  %v518_v4 = vld [vmem:[%s3523_s1] sm:$0xff]  ;;  %vm529_vm1 = vcmask 261120   ;;  %vm615_vm2 = vcmask 64512  }
  0x1d   : > { %2675 = vmatpush3.msra.mxu1 %v521_v0  ;;  %2710 = vmatprep.subr.mxu0 %v2969_v1  ;;  %s2568_s19 = sshll.u32 %s514_s28, 3  ;;  %v3156_v6 = vld [vmem:[%s3507_s15] sm:$0xff]  ;;  %s2973_s28 = smov 64  }
  0x1e   : > { %2676 = vmatprep.subr.mxu1 %v2969_v1  ;;  %2712 = vmatprep.mubr.msk.f32.mxu0 %vm2970_vm0, %v2969_v1  ;;  %s516_s17 = scalar_lea.vmem %s3524_s27, %s2568_s19  ;;  %v2569_v7 = vld [vmem:[%s3525_s2] ss:$0 sm:$0xff]  ;;  %s2972_s19 = smov 32  }
  0x1f   : > { %2677 = vmatpush3.msra.mxu1 %v520_v2  ;;  %v3145_v5 = vld [vmem:[%s516_s17] sm:$0xff]  ;;  %2711 = vmatpush3.msra.mxu0 %v3156_v6  ;;  %s2976_s27 = smov 120   ;;  %s2986_s17 = smov [#allocation2]  }
  0x20   : > { %2678 = vmatprep.subr.mxu1 %v2969_v1  ;;  %2720 = vmatprep.subr.mxu0 %v2969_v1  ;;  %v3177_v11 = vld [vmem:[%s3505_s13] sm:$0xff]  ;;  %s2911_s18 = sshll.u32 %s2986_s17, 4  ;;  %s2912_s18 = int_to_ptr.vmem [resolvable:$false] %s2911_s18 }
  0x21   : > { %2679 = vmatpush3.msra.mxu1 %v519_v3  ;;  %v3186_v15 = vld [vmem:[%s3506_s14] sm:$0xff] }
  0x22   : > { %2680 = vmatprep.subr.mxu1 %v2969_v1  ;;  %v942_v37 = vld [vmem:[%s3526_s3] sm:$0xff] }
  0x23   : > { %2681 = vmatpush3.msra.mxu1 %v518_v4 }
  0x24   : > { %2683 = vmatmul.mubr.msk.f32.vlgmr.msra.gmra.mxu1 %vm529_vm1, %v3145_v5  ;;  %2685 = vmatprep.subr.mxu1 %v2969_v1 }
  0x25   : > { %2687 = vmatprep.mubr.msk.f32.mxu1 %vm2970_vm0, %v2969_v1  ;;  %2686 = vmatpush3.msra.mxu1 %v3156_v6 }
  0x26   : > { %2690 = vmatprep.subr.mxu1 %v2969_v1 }
  0xe4   : > { %v599_v8 = vpop.f32.mrf.mxu1 }
  0xe5   : > { %v3165_v9 = vadd.f32 %v2569_v7, %v599_v8 }
  0xe6   : > { %v2684_v10 = vpop.f32.mrf.mxu1 }
  0xe7   : > { %696 = vrot.lane.b32.xlu0 %v3165_v9, %s2971_s30  ;;  %2688 = vmatmul.mubr.msk.f32.vlgmr.msra.gmra.mxu1 %vm615_vm2, %v3165_v9  ;;  %v614_v24 = vmul.f32 %v3177_v11, %v3165_v9 }
  0xe8   : > { %2691 = vmatpush3.msra.mxu1 %v3156_v6  ;;  %2692 = vmatprep.mubr.msk.f32.mxu1 %vm2970_vm0, %v2969_v1 }
  0xe9   : > { %2695 = vmatprep.subr.mxu1 %v2969_v1 }
  0xeb   : > { %692 = vrot.lane.b32.xlu0 %v3177_v11, %s2972_s19 }
 0x159   : > { %v697_v12 = vpop.permute.xlu0 %696 }
 0x15a   : > { %2693 = vmatmul.mubr.msk.f32.vlgmr.msra.gmra.mxu1 %vm615_vm2, %v697_v12 }
 0x15b   : > { %2697 = vmatprep.mubr.msk.f32.mxu1 %vm2970_vm0, %v2969_v1 }
 0x15d   : > { %v693_v19 = vpop.permute.xlu0 %692 }
 0x15e   : > { %v695_v20 = vmul.f32 %v693_v19, %v3165_v9 }
 0x1a7   : > { %v685_v13 = vpop.f32.mrf.mxu1 }
 0x1a8   : > { %v689_v23 = vmul.f32 %v685_v13, %v3186_v15 }
 0x1a9   : > { %v2689_v14 = vpop.f32.mrf.mxu1 }
 0x1aa   : > { %v690_v26 = vadd.f32 %v689_v23, %v614_v24  ;;  %v1353_v14 = vld [vmem:[%s3526_s3 + $0x8] sm:$0xff] }
 0x21a   : > { %v766_v16 = vpop.f32.mrf.mxu1 }
 0x21b   : > { %v770_v17 = vmul.f32 %v766_v16, %v3186_v15 }
 0x21c   : > { %v2694_v18 = vpop.f32.mrf.mxu1 }
 0x21d   : > { %772 = vrot.lane.b32.xlu1 %v770_v17, %s2972_s19  ;;  %s2978_s19 = smov 56  }
 0x28f   : > { %v773_v21 = vpop.permute.xlu1 %772 }
 0x290   : > { %v775_v22 = vadd.f32 %v773_v21, %v695_v20 }
 0x292   : > { %777 = vrot.lane.b32.xlu1 %v775_v22, %s2971_s30  ;;  %s2977_s30 = smov 8  }
 0x296   : > { %864 = vrot.lane.b32.xlu1 %v3165_v9, %s2973_s28  ;;  %s2981_s28 = smov 112  }
 0x304   : > { %v778_v25 = vpop.permute.xlu1 %777 }
 0x305   : > { %2696 = vmatpush3.xpose.msk.msra.mxu1 %vm615_vm2, %v778_v25  ;;  %v2571_v25 = vld [vmem:[%s3496_s4] ss:$0 sm:$0xff] }
 0x306   : > { %2700 = vmatprep.subr.mxu1 %v2969_v1 }
 0x308   : > { %2698 = vmatmul.mubr.msk.f32.vlgmr.msra.gmra.mxu1 %vm615_vm2, %v690_v26  ;;  %v865_v27 = vpop.permute.xlu1 %864 }
 0x309   : > { %2701 = vmatpush3.msra.mxu1 %v865_v27  ;;  %2702 = vmatprep.mubr.msk.f32.mxu1 %vm2970_vm0, %v2969_v1 }
 0x30a   : > { %2705 = vmatprep.subr.mxu1 %v2969_v1 }
 0x3c8   : > { %v850_v28 = vpop.f32.mrf.mxu1 }
 0x3c9   : > { %v854_v29 = vmul.f32 0.35355338, %v850_v28 }
 0x3ca   : > { %v2699_v30 = vpop.f32.mrf.mxu1 }
 0x3cb   : > { %v855_v31 = vsel %vm615_vm2, %v854_v29, -inf }
 0x3cc   : > { %856 = vmax.xlane.f32.xlu0 %v855_v31 }
 0x3e2   : > { %1105 = vrot.lane.b32.xlu0 %v3165_v9, %s2974_s29 }
 0x3e6   : > { %1101 = vrot.lane.b32.xlu0 %v3177_v11, %s2975_s23 }
 0x455   : > { %v857_v32 = vpop.xlane.xlu0 %856 }
 0x456   : > { %v858_v33 = vsub.f32 %v854_v29, %v857_v32 }
 0x458   : > { %v859_v34 = vmul.f32 1.442695, %v858_v33 }
 0x459   : > { %v1106_v44 = vpop.permute.xlu0 %1105 }
 0x45a   : > { %2887 = vpow2.f32 %v859_v34 }
 0x45d   : > { %v1102_v53 = vpop.permute.xlu0 %1101 }
 0x45e   : > { %v1104_v54 = vmul.f32 %v1102_v53, %v3165_v9 }
 0x467   : > { %v2888_v35 = vpop.eup %2887 }
 0x468   : > { %2703 = vmatmul.mubr.msk.f32.vlgmr.msra.gmra.mxu1 %vm615_vm2, %v2888_v35  ;;  %v861_v36 = vsel %vm615_vm2, %v2888_v35, 0.0 }
 0x469   : > { %862 = vadd.xlane.f32.xlu1 %v861_v36  ;;  %2707 = vmatprep.mubr.msk.f32.mxu1 %vm2970_vm0, %v2969_v1 }
 0x46a   : > { %2706 = vmatpush3.msra.mxu1 %v942_v37 }
 0x46b   : > { %2715 = vmatprep.subr.mxu1 %v2969_v1 }
 0x47a   : > { %1021 = vrot.lane.b32.xlu1 %v3165_v9, %s2976_s27 }
 0x47e   : > { %1017 = vrot.lane.b32.xlu1 %v3177_v11, %s2977_s30 }
 0x4f2   : > { %v863_v38 = vpop.xlane.xlu1 %862 }
 0x4f3   : > { %2889 = vrcp.f32 %v863_v38 }
 0x4f6   : > { %v1022_v39 = vpop.permute.xlu1 %1021 }
 0x4f7   : > { %2713 = vmatmul.mubr.msk.f32.vlgmr.msra.gmra.mxu0 %vm615_vm2, %v1022_v39 }
 0x4f8   : > { %2722 = vmatprep.mubr.msk.f32.mxu0 %vm2970_vm0, %v2969_v1 }
 0x4fa   : > { %v1018_v55 = vpop.permute.xlu1 %1017 }
 0x4fb   : > { %v1020_v58 = vmul.f32 %v1018_v55, %v3165_v9 }
 0x500   : > { %v2890_v40 = vpop.eup %2889 }
 0x528   : > { %v936_v41 = vpop.f32.mrf.mxu1 }
 0x529   : > { %v941_v42 = vmul.f32 %v2890_v40, %v936_v41 }
 0x52a   : > { %v2704_v43 = vpop.f32.mrf.mxu1 }
 0x52b   : > { %2708 = vmatmul.mubr.msk.f32.vlgmr.msra.gmra.mxu1 %vm615_vm2, %v941_v42 }
 0x52c   : > { %2716 = vmatpush3.msra.mxu1 %v3156_v6  ;;  %2717 = vmatprep.mubr.msk.f32.mxu1 %vm2970_vm0, %v2969_v1 }
 0x52d   : > { %2725 = vmatprep.subr.mxu1 %v2969_v1 }
 0x52f   : > { %2718 = vmatmul.mubr.msk.f32.vlgmr.msra.gmra.mxu1 %vm615_vm2, %v1106_v44 }
 0x530   : > { %2727 = vmatprep.mubr.msk.f32.mxu1 %vm2970_vm0, %v2969_v1 }
 0x5b7   : > { %v1091_v45 = vpop.f32.mrf.mxu0 }
 0x5b8   : > { %v1095_v52 = vmul.f32 %v1091_v45, %v3186_v15 }
 0x5b9   : > { %v2714_v46 = vpop.f32.mrf.mxu0 }
 0x5eb   : > { %v3227_v47 = vpop.f32.mrf.mxu1 }
 0x5ec   : > { %v1016_v26 = vadd.f32 %v2571_v25, %v3227_v47 }
 0x5ed   : > { %v2709_v48 = vpop.f32.mrf.mxu1 }
 0x5ef   : > { %v1175_v49 = vpop.f32.mrf.mxu1 }
 0x5f0   : > { %v1179_v50 = vmul.f32 %v1175_v49, %v3186_v15 }
 0x5f1   : > { %v2719_v51 = vpop.f32.mrf.mxu1 }
 0x5f2   : > { %1181 = vrot.lane.b32.xlu0 %v1179_v50, %s2975_s23 }
 0x5f6   : > { %1097 = vrot.lane.b32.xlu0 %v1095_v52, %s2977_s30 }
 0x664   : > { %v1182_v56 = vpop.permute.xlu0 %1181 }
 0x665   : > { %v1184_v57 = vadd.f32 %v1182_v56, %v1104_v54  ;;  %v1764_v54 = vld [vmem:[%s3526_s3 + $0x10] sm:$0xff] }
 0x667   : > { %1189 = vrot.lane.b32.xlu1 %v1184_v57, %s2974_s29  ;;  %s2982_s29 = smov 16  }
 0x668   : > { %v1098_v59 = vpop.permute.xlu0 %1097 }
 0x669   : > { %v1100_v60 = vadd.f32 %v1098_v59, %v1020_v58 }
 0x66b   : > { %1186 = vrot.lane.b32.xlu0 %v1100_v60, %s2976_s27 }
 0x66f   : > { %1275 = vrot.lane.b32.xlu0 %v3165_v9, %s2978_s19 }
 0x6d9   : > { %v1190_v61 = vpop.permute.xlu1 %1189 }
 0x6da   : > { %2721 = vmatpush3.xpose.msk.msra.mxu0 %vm615_vm2, %v1190_v61 }
 0x6db   : > { %2730 = vmatprep.subr.mxu0 %v2969_v1 }
 0x6dd   : > { %v1187_v62 = vpop.permute.xlu0 %1186 }
 0x6de   : > { %2723 = vmatmul.mubr.msk.f32.vlgmr.msra.gmra.mxu0 %vm615_vm2, %v1187_v62 }
 0x6df   : > { %2732 = vmatprep.mubr.msk.f32.mxu0 %vm2970_vm0, %v2969_v1  ;;  %2731 = vmatpush3.msra.mxu0 %v1353_v14 }
 0x6e0   : > { %2740 = vmatprep.subr.mxu0 %v2969_v1 }
 0x6e1   : > { %v1276_v63 = vpop.permute.xlu0 %1275 }
 0x6e2   : > { %2726 = vmatpush3.msra.mxu1 %v1276_v63 }
 0x6e3   : > { %2735 = vmatprep.subr.mxu1 %v2969_v1 }
 0x79e   : > { %v1261_v0 = vpop.f32.mrf.mxu0 }
 0x79f   : > { %v1265_v2 = vmul.f32 0.35355338, %v1261_v0 }
 0x7a0   : > { %v2724_v3 = vpop.f32.mrf.mxu0 }
 0x7a1   : > { %v1266_v4 = vsel %vm615_vm2, %v1265_v2, -inf }
 0x7a2   : > { %1267 = vmax.xlane.f32.xlu1 %v1266_v4 }
 0x7b3   : > { %1516 = vrot.lane.b32.xlu1 %v3165_v9, %s2979_s20 }
 0x7b7   : > { %1512 = vrot.lane.b32.xlu1 %v3177_v11, %s2980_s26 }
 0x82b   : > { %v1268_v7 = vpop.xlane.xlu1 %1267 }
 0x82c   : > { %v1269_v8 = vsub.f32 %v1265_v2, %v1268_v7 }
 0x82e   : > { %v1270_v10 = vmul.f32 1.442695, %v1269_v8 }
 0x82f   : > { %v1517_v22 = vpop.permute.xlu1 %1516 }
 0x830   : > { %2891 = vpow2.f32 %v1270_v10 }
 0x833   : > { %v1513_v34 = vpop.permute.xlu1 %1512 }
 0x834   : > { %v1515_v35 = vmul.f32 %v1513_v34, %v3165_v9 }
 0x83d   : > { %v2892_v12 = vpop.eup %2891 }
 0x83e   : > { %2728 = vmatmul.mubr.msk.f32.vlgmr.msra.gmra.mxu1 %vm615_vm2, %v2892_v12  ;;  %v1272_v13 = vsel %vm615_vm2, %v2892_v12, 0.0 }
 0x83f   : > { %1273 = vadd.xlane.f32.xlu0 %v1272_v13  ;;  %2736 = vmatpush3.msra.mxu1 %v3156_v6 }
 0x840   : > { %2737 = vmatprep.mubr.msk.f32.mxu1 %vm2970_vm0, %v2969_v1  ;;  %2745 = vmatprep.subr.mxu1 %v2969_v1 }
 0x855   : > { %1432 = vrot.lane.b32.xlu0 %v3165_v9, %s2981_s28 }
 0x859   : > { %1428 = vrot.lane.b32.xlu0 %v3177_v11, %s2982_s29 }
 0x8c8   : > { %v1274_v16 = vpop.xlane.xlu0 %1273 }
 0x8c9   : > { %2893 = vrcp.f32 %v1274_v16 }
 0x8cc   : > { %v1433_v17 = vpop.permute.xlu0 %1432 }
 0x8cd   : > { %2738 = vmatmul.mubr.msk.f32.vlgmr.msra.gmra.mxu1 %vm615_vm2, %v1433_v17 }
 0x8ce   : > { %2747 = vmatprep.mubr.msk.f32.mxu1 %vm2970_vm0, %v2969_v1 }
 0x8d0   : > { %v1429_v36 = vpop.permute.xlu0 %1428 }
 0x8d1   : > { %v1431_v39 = vmul.f32 %v1429_v36, %v3165_v9 }
 0x8d6   : > { %v2894_v18 = vpop.eup %2893 }
 0x8fe   : > { %v1347_v19 = vpop.f32.mrf.mxu1 }
 0x8ff   : > { %v1352_v20 = vmul.f32 %v2894_v18, %v1347_v19 }
 0x900   : > { %v2729_v21 = vpop.f32.mrf.mxu1 }
 0x901   : > { %2733 = vmatmul.mubr.msk.f32.vlgmr.msra.gmra.mxu0 %vm615_vm2, %v1352_v20 }
 0x902   : > { %2741 = vmatpush3.msra.mxu0 %v3156_v6  ;;  %2742 = vmatprep.mubr.msk.f32.mxu0 %vm2970_vm0, %v2969_v1 }
 0x903   : > { %2750 = vmatprep.subr.mxu0 %v2969_v1 }
 0x905   : > { %2743 = vmatmul.mubr.msk.f32.vlgmr.msra.gmra.mxu0 %vm615_vm2, %v1517_v22 }
 0x906   : > { %2752 = vmatprep.mubr.msk.f32.mxu0 %vm2970_vm0, %v2969_v1 }
 0x98d   : > { %v1502_v23 = vpop.f32.mrf.mxu1 }
 0x98e   : > { %v1506_v33 = vmul.f32 %v1502_v23, %v3186_v15 }
 0x98f   : > { %v2739_v24 = vpop.f32.mrf.mxu1 }
 0x9c1   : > { %v1423_v27 = vpop.f32.mrf.mxu0 }
 0x9c2   : > { %v3278_v28 = vadd.f32 %v1423_v27, %v1016_v26 }
 0x9c3   : > { %v2734_v29 = vpop.f32.mrf.mxu0 }
 0x9c4   : > { %v2175_v29 = vld [vmem:[%s3526_s3 + $0x18] sm:$0xff] }
 0x9c5   : > { %v1586_v30 = vpop.f32.mrf.mxu0 }
 0x9c6   : > { %v1590_v31 = vmul.f32 %v1586_v30, %v3186_v15 }
 0x9c7   : > { %v2744_v32 = vpop.f32.mrf.mxu0 }
 0x9c8   : > { %1592 = vrot.lane.b32.xlu1 %v1590_v31, %s2980_s26 }
 0x9cc   : > { %1508 = vrot.lane.b32.xlu1 %v1506_v33, %s2982_s29 }
 0xa3a   : > { %v1593_v37 = vpop.permute.xlu1 %1592 }
 0xa3b   : > { %v1595_v38 = vadd.f32 %v1593_v37, %v1515_v35 }
 0xa3d   : > { %1600 = vrot.lane.b32.xlu0 %v1595_v38, %s2979_s20  ;;  %s2983_s20 = smov 72  }
 0xa3e   : > { %v1509_v40 = vpop.permute.xlu1 %1508 }
 0xa3f   : > { %v1511_v41 = vadd.f32 %v1509_v40, %v1431_v39 }
 0xa41   : > { %1597 = vrot.lane.b32.xlu1 %v1511_v41, %s2981_s28  ;;  %s2985_s28 = smov 24  }
 0xa45   : > { %1686 = vrot.lane.b32.xlu1 %v3165_v9, %s2980_s26  ;;  %s2984_s26 = smov 104  }
 0xaaf   : > { %v1601_v42 = vpop.permute.xlu0 %1600 }
 0xab0   : > { %2746 = vmatpush3.xpose.msk.msra.mxu1 %vm615_vm2, %v1601_v42 }
 0xab1   : > { %2755 = vmatprep.subr.mxu1 %v2969_v1 }
 0xab3   : > { %v1598_v43 = vpop.permute.xlu1 %1597 }
 0xab4   : > { %2748 = vmatmul.mubr.msk.f32.vlgmr.msra.gmra.mxu1 %vm615_vm2, %v1598_v43 }
 0xab5   : > { %2757 = vmatprep.mubr.msk.f32.mxu1 %vm2970_vm0, %v2969_v1  ;;  %2756 = vmatpush3.msra.mxu1 %v1764_v54  ;;  %v2375_v54 = vld [vmem:[%s3501_s9 + $0x48] sm:$0xff] }
 0xab6   : > { %2765 = vmatprep.subr.mxu1 %v2969_v1 }
 0xab7   : > { %v1687_v44 = vpop.permute.xlu1 %1686 }
 0xab8   : > { %2751 = vmatpush3.msra.mxu0 %v1687_v44 }
 0xab9   : > { %2760 = vmatprep.subr.mxu0 %v2969_v1 }
 0xb74   : > { %v1672_v45 = vpop.f32.mrf.mxu1 }
 0xb75   : > { %v1676_v46 = vmul.f32 0.35355338, %v1672_v45  ;;  %v2284_v45 = vld [vmem:[%s3499_s7 + $0x18] sm:$0xff] }
 0xb76   : > { %v2749_v47 = vpop.f32.mrf.mxu1 }
 0xb77   : > { %v1677_v48 = vsel %vm615_vm2, %v1676_v46, -inf  ;;  %v2281_v47 = vld [vmem:[%s3499_s7] sm:$0xff] }
 0xb78   : > { %1678 = vmax.xlane.f32.xlu0 %v1677_v48  ;;  %v2381_v48 = vld [vmem:[%s3501_s9 + $0x78] sm:$0xff] }
 0xb8e   : > { %1927 = vrot.lane.b32.xlu0 %v3165_v9, %s2983_s20 }
 0xb92   : > { %1923 = vrot.lane.b32.xlu0 %v3177_v11, %s2978_s19 }
 0xc01   : > { %v1679_v49 = vpop.xlane.xlu0 %1678 }
 0xc02   : > { %v1680_v50 = vsub.f32 %v1676_v46, %v1679_v49  ;;  %v2282_v46 = vld [vmem:[%s3499_s7 + $0x8] sm:$0xff]  ;;  %v2380_v49 = vld [vmem:[%s3501_s9 + $0x70] sm:$0xff] }
 0xc04   : > { %v1681_v51 = vmul.f32 1.442695, %v1680_v50  ;;  %v2379_v50 = vld [vmem:[%s3501_s9 + $0x68] sm:$0xff] }
 0xc06   : > { %2895 = vpow2.f32 %v1681_v51  ;;  %v2378_v51 = vld [vmem:[%s3501_s9 + $0x60] sm:$0xff] }
 0xc13   : > { %v2896_v52 = vpop.eup %2895 }
 0xc14   : > { %2753 = vmatmul.mubr.msk.f32.vlgmr.msra.gmra.mxu0 %vm615_vm2, %v2896_v52  ;;  %v1683_v53 = vsel %vm615_vm2, %v2896_v52, 0.0  ;;  %v2377_v52 = vld [vmem:[%s3501_s9 + $0x58] sm:$0xff] }
 0xc15   : > { %1684 = vadd.xlane.f32.xlu1 %v1683_v53  ;;  %2761 = vmatpush3.msra.mxu0 %v3156_v6  ;;  %v2376_v53 = vld [vmem:[%s3501_s9 + $0x50] sm:$0xff] }
 0xc16   : > { %2762 = vmatprep.mubr.msk.f32.mxu0 %vm2970_vm0, %v2969_v1  ;;  %2770 = vmatprep.subr.mxu0 %v2969_v1 }
 0xc26   : > { %1843 = vrot.lane.b32.xlu1 %v3165_v9, %s2984_s26 }
 0xc2a   : > { %1839 = vrot.lane.b32.xlu1 %v3177_v11, %s2985_s28  ;;  %v1928_v11 = vpop.permute.xlu0 %1927 }
 0xc2e   : > { %v1924_v8 = vpop.permute.xlu0 %1923 }
 0xc2f   : > { %v1926_v10 = vmul.f32 %v1924_v8, %v3165_v9  ;;  %v2367_v8 = vld [vmem:[%s3501_s9 + $0x8] sm:$0xff] }
 0xc9e   : > { %v1685_v55 = vpop.xlane.xlu1 %1684 }
 0xc9f   : > { %2897 = vrcp.f32 %v1685_v55  ;;  %v2374_v55 = vld [vmem:[%s3501_s9 + $0x40] sm:$0xff] }
 0xca2   : > { %v1844_v56 = vpop.permute.xlu1 %1843 }
 0xca3   : > { %2763 = vmatmul.mubr.msk.f32.vlgmr.msra.gmra.mxu0 %vm615_vm2, %v1844_v56  ;;  %v2373_v56 = vld [vmem:[%s3501_s9 + $0x38] sm:$0xff] }
 0xca4   : > { %2772 = vmatprep.mubr.msk.f32.mxu0 %vm2970_vm0, %v2969_v1 }
 0xca6   : > { %v1840_v12 = vpop.permute.xlu1 %1839 }
 0xca7   : > { %v1842_v16 = vmul.f32 %v1840_v12, %v3165_v9  ;;  %v2598_v12 = vld [vmem:[%s3500_s8] ss:$0 sm:$0xff] }
 0xcac   : > { %v2898_v57 = vpop.eup %2897 }
 0xcd4   : > { %v1758_v58 = vpop.f32.mrf.mxu0 }
 0xcd5   : > { %v1763_v59 = vmul.f32 %v2898_v57, %v1758_v58  ;;  %v2372_v57 = vld [vmem:[%s3501_s9 + $0x30] sm:$0xff]  ;;  %v2371_v58 = vld [vmem:[%s3501_s9 + $0x28] sm:$0xff] }
 0xcd6   : > { %v2754_v60 = vpop.f32.mrf.mxu0 }
 0xcd7   : > { %2758 = vmatmul.mubr.msk.f32.vlgmr.msra.gmra.mxu1 %vm615_vm2, %v1763_v59  ;;  %v2370_v59 = vld [vmem:[%s3501_s9 + $0x20] sm:$0xff]  ;;  %v2369_v60 = vld [vmem:[%s3501_s9 + $0x18] sm:$0xff] }
 0xcd8   : > { %2766 = vmatpush3.msra.mxu1 %v3156_v6  ;;  %2767 = vmatprep.mubr.msk.f32.mxu1 %vm2970_vm0, %v2969_v1 }
 0xcd9   : > { %2775 = vmatprep.subr.mxu1 %v2969_v1 }
 0xcdb   : > { %2768 = vmatmul.mubr.msk.f32.vlgmr.msra.gmra.mxu1 %vm615_vm2, %v1928_v11 }
 0xcdc   : > { %2777 = vmatprep.mubr.msk.f32.mxu1 %vm2970_vm0, %v2969_v1 }
 0xd63   : > { %v1913_v61 = vpop.f32.mrf.mxu0 }
 0xd64   : > { %v1917_v7 = vmul.f32 %v1913_v61, %v3186_v15 }
 0xd65   : > { %v2764_v62 = vpop.f32.mrf.mxu0 }
 0xd97   : > { %v1834_v63 = vpop.f32.mrf.mxu1 }
 0xd98   : > { %v1838_v0 = vadd.f32 %v1834_v63, %v3278_v28 }
 0xd99   : > { %v2759_v2 = vpop.f32.mrf.mxu1 }
 0xd9b   : > { %v1997_v3 = vpop.f32.mrf.mxu1 }
 0xd9c   : > { %v2001_v6 = vmul.f32 %v1997_v3, %v3186_v15  ;;  %v2597_v3 = vld [vmem:[%s3498_s6] ss:$0 sm:$0xff] }
 0xd9d   : > { %v2769_v4 = vpop.f32.mrf.mxu1 }
 0xd9e   : > { %2003 = vrot.lane.b32.xlu0 %v2001_v6, %s2978_s19 }
 0xda2   : > { %1919 = vrot.lane.b32.xlu0 %v1917_v7, %s2985_s28  ;;  %v2368_v7 = vld [vmem:[%s3501_s9 + $0x10] sm:$0xff] }
 0xe10   : > { %v2004_v13 = vpop.permute.xlu0 %2003 }
 0xe11   : > { %v2006_v14 = vadd.f32 %v2004_v13, %v1926_v10  ;;  %v2366_v10 = vld [vmem:[%s3501_s9] sm:$0xff] }
 0xe13   : > { %2011 = vrot.lane.b32.xlu1 %v2006_v14, %s2983_s20 }
 0xe14   : > { %v1920_v17 = vpop.permute.xlu0 %1919 }
 0xe15   : > { %v1922_v18 = vadd.f32 %v1920_v17, %v1842_v16 }
 0xe17   : > { %2008 = vrot.lane.b32.xlu0 %v1922_v18, %s2984_s26  ;;  %v2600_v18 = vld [vmem:[%s3502_s10] ss:$0 sm:$0xff]  ;;  %s2604_s26 = sshll.u32 %s3093_s25, 7  ;;  %s2913_s25 = scalar_lea.vmem %s2912_s18, 256 }
 0xe18   : > { %s2502_s2 = scalar_lea.hbm %s3508_s16, %s2604_s26 }
 0xe1b   : > { %2097 = vrot.lane.b32.xlu0 %v3165_v9, %s2975_s23  ;;  %s510_s23 = sand.u32 1, %s2959_s22  }
 0xe1c   : > { %s2567_s19 = sshll.u32 %s510_s23, 3  ;;  %s2491_s3 = scalar_lea.sflag [#allocation3], %s510_s23 }
 0xe1d   : > { %s512_s28 = scalar_lea.vmem [#allocation2], %s2567_s19 }
 0xe1e   : > { %s2504_s29 = sshll.u32 %s512_s28, 4  ;;  %s2505_s29 = int_to_ptr.vmem [resolvable:$true] %s2504_s29 }
 0xe1f   : > { %s2907_s30 = scalar_lea.vmem %s2505_s29, 128  ;;  %p2914_p0 = scmp.lt.s32.totalorder %s2505_s29, %s2912_s18 }
 0xe20   : > { %p2908_p11 = scmp.ne.s32.totalorder %s2505_s29, %s2907_s30  ;;  %p2915_p1 = scmp.lt.s32.totalorder %s2913_s25, %s2907_s30 }
 0xe22   : > { %p2909_p12 = pnand %p2908_p11, %p3110_p5  ;;  %p2916_p2 = por %p2915_p1, %p2914_p0 }
 0xe24   : > { %p2910_p13 = pneg %p2909_p12 }
 0xe26   : > { %p2917_p3 = pnand %p2916_p2, %p2910_p13 }
 0xe85   : > { %v2012_v15 = vpop.permute.xlu1 %2011 }
 0xe86   : > { %2771 = vmatpush3.xpose.msk.msra.mxu0 %vm615_vm2, %v2012_v15 }
 0xe87   : > { %2780 = vmatprep.subr.mxu0 %v2969_v1 }
 0xe89   : > { %v2009_v19 = vpop.permute.xlu0 %2008 }
 0xe8a   : > { %2773 = vmatmul.mubr.msk.f32.vlgmr.msra.gmra.mxu0 %vm615_vm2, %v2009_v19 }
 0xe8b   : > { %2782 = vmatprep.mubr.msk.f32.mxu0 %vm2970_vm0, %v2969_v1  ;;  %2781 = vmatpush3.msra.mxu0 %v2175_v29 }
 0xe8c   : > { %2796 = vmatprep.subr.mxu0 %v2969_v1 }
 0xe8d   : > { %v2098_v20 = vpop.permute.xlu0 %2097 }
 0xe8e   : > { %2776 = vmatpush3.msra.mxu1 %v2098_v20 }
 0xe8f   : > { %2785 = vmatprep.subr.mxu1 %v2969_v1 }
 0xf4a   : > { %v2083_v21 = vpop.f32.mrf.mxu0 }
 0xf4b   : > { %v2087_v22 = vmul.f32 0.35355338, %v2083_v21 }
 0xf4c   : > { %v2774_v23 = vpop.f32.mrf.mxu0 }
 0xf4d   : > { %v2088_v9 = vsel %vm615_vm2, %v2087_v22, -inf }
 0xf4e   : > { %2089 = vmax.xlane.f32.xlu1 %v2088_v9 }
 0xfd7   : > { %v2090_v24 = vpop.xlane.xlu1 %2089 }
 0xfd8   : > { %v2091_v25 = vsub.f32 %v2087_v22, %v2090_v24 }
 0xfda   : > { %v2092_v26 = vmul.f32 1.442695, %v2091_v25 }
 0xfdc   : > { %2899 = vpow2.f32 %v2092_v26 }
 0xfe9   : > { %v2900_v27 = vpop.eup %2899 }
 0xfea   : > { %2778 = vmatmul.mubr.msk.f32.vlgmr.msra.gmra.mxu1 %vm615_vm2, %v2900_v27  ;;  %v2094_v28 = vsel %vm615_vm2, %v2900_v27, 0.0 }
 0xfeb   : > { %2095 = vadd.xlane.f32.xlu0 %v2094_v28  ;;  %2793 = vmatprep.mubr.msk.f32.mxu1 %vm2970_vm0, %v2969_v1 }
 0xfec   : > { %2786 = vmatpush3.msra.mxu1 %v2284_v45 }
 0xfed   : > { %2787 = vmatprep.subr.mxu1 %v2969_v1 }
0x1074   : > { %v2096_v30 = vpop.xlane.xlu0 %2095 }
0x1075   : > { %2901 = vrcp.f32 %v2096_v30  ;;  %v2601_v30 = vld [vmem:[%s3503_s11] ss:$0 sm:$0xff] }
0x1082   : > { %v2902_v31 = vpop.eup %2901 }
0x10aa   : > { %v2169_v32 = vpop.f32.mrf.mxu1 }
0x10ab   : > { %v2174_v33 = vmul.f32 %v2902_v31, %v2169_v32  ;;  %v2602_v32 = vld [vmem:[%s3504_s12] ss:$0 sm:$0xff] }
0x10ac   : > { %v2779_v34 = vpop.f32.mrf.mxu1 }
0x10ad   : > { %2783 = vmatmul.mubr.msk.f32.vlgmr.msra.gmra.mxu0 %vm615_vm2, %v2174_v33 }
0x10ae   : > { %2828 = vmatprep.mubr.msk.f32.mxu0 %vm2970_vm0, %v2969_v1  ;;  %2797 = vmatpush3.msra.mxu0 %v2381_v48 }
0x10af   : > { %2798 = vmatprep.subr.mxu0 %v2969_v1 }
0x10b0   : > { %2799 = vmatpush3.msra.mxu0 %v2380_v49 }
0x10b1   : > { %2800 = vmatprep.subr.mxu0 %v2969_v1 }
0x10b2   : > { %2801 = vmatpush3.msra.mxu0 %v2379_v50 }
0x10b3   : > { %2802 = vmatprep.subr.mxu0 %v2969_v1 }
0x10b4   : > { %2803 = vmatpush3.msra.mxu0 %v2378_v51 }
0x10b5   : > { %2804 = vmatprep.subr.mxu0 %v2969_v1 }
0x10b6   : > { %2805 = vmatpush3.msra.mxu0 %v2377_v52 }
0x10b7   : > { %2806 = vmatprep.subr.mxu0 %v2969_v1 }
0x10b8   : > { %2807 = vmatpush3.msra.mxu0 %v2376_v53 }
0x10b9   : > { %2808 = vmatprep.subr.mxu0 %v2969_v1 }
0x10ba   : > { %2809 = vmatpush3.msra.mxu0 %v2375_v54 }
0x10bb   : > { %2810 = vmatprep.subr.mxu0 %v2969_v1 }
0x10bc   : > { %2811 = vmatpush3.msra.mxu0 %v2374_v55 }
0x10bd   : > { %2812 = vmatprep.subr.mxu0 %v2969_v1 }
0x10be   : > { %2813 = vmatpush3.msra.mxu0 %v2373_v56 }
0x10bf   : > { %2814 = vmatprep.subr.mxu0 %v2969_v1 }
0x10c0   : > { %2815 = vmatpush3.msra.mxu0 %v2372_v57 }
0x10c1   : > { %2816 = vmatprep.subr.mxu0 %v2969_v1 }
0x10c2   : > { %2817 = vmatpush3.msra.mxu0 %v2371_v58 }
0x10c3   : > { %2818 = vmatprep.subr.mxu0 %v2969_v1 }
0x10c4   : > { %2819 = vmatpush3.msra.mxu0 %v2370_v59 }
0x10c5   : > { %2820 = vmatprep.subr.mxu0 %v2969_v1 }
0x10c6   : > { %2821 = vmatpush3.msra.mxu0 %v2369_v60 }
0x10c7   : > { %2822 = vmatprep.subr.mxu0 %v2969_v1 }
0x10c8   : > { %2823 = vmatpush3.msra.mxu0 %v2368_v7 }
0x10c9   : > { %2824 = vmatprep.subr.mxu0 %v2969_v1 }
0x10ca   : > { %2825 = vmatpush3.msra.mxu0 %v2367_v8 }
0x10cb   : > { %2826 = vmatprep.subr.mxu0 %v2969_v1 }
0x10cc   : > { %2827 = vmatpush3.msra.mxu0 %v2366_v10 }
0x116d   : > { %v2245_v35 = vpop.f32.mrf.mxu0 }
0x116e   : > { %v2249_v36 = vadd.f32 %v2245_v35, %v1838_v0  ;;  %v2596_v0 = vld [vmem:[%s3497_s5] ss:$0 sm:$0xff] }
0x116f   : > { %v2784_v37 = vpop.f32.mrf.mxu0 }
0x1170   : > { %v2250_v38 = vadd.f32 %v2249_v36, %v3145_v5  ;;  %v2283_v5 = vld [vmem:[%s3499_s7 + $0x10] sm:$0xff] }
0x1171   : > { %2788 = vmatpush3.msra.mxu1 %v2283_v5 }
0x1172   : > { %v2253_v39 = vsel %vm529_vm1, %v2250_v38, 0.0  ;;  %2789 = vmatprep.subr.mxu1 %v2969_v1 }
0x1173   : > { %2254 = vadd.xlane.f32.xlu1 %v2253_v39  ;;  %2790 = vmatpush3.msra.mxu1 %v2282_v46 }
0x1174   : > { %2791 = vmatprep.subr.mxu1 %v2969_v1 }
0x1175   : > { %2792 = vmatpush3.msra.mxu1 %v2281_v47 }
0x11fc   : > { %v2255_v40 = vpop.xlane.xlu1 %2254 }
0x11fd   : > { %v2257_v41 = vmul.f32 0.03125, %v2255_v40 }
0x11ff   : > { %v2258_v42 = vsub.f32 %v2250_v38, %v2257_v41 }
0x1201   : > { %v2259_v43 = vmul.f32 %v2258_v42, %v2258_v42 }
0x1203   : > { %v2260_v44 = vsel %vm529_vm1, %v2259_v43, 0.0 }
0x1204   : > { %2261 = vadd.xlane.f32.xlu0 %v2260_v44 }
0x128d   : > { %v2262_v11 = vpop.xlane.xlu0 %2261 }
0x128e   : > { %v2263_v61 = vmul.f32 0.03125, %v2262_v11 }
0x1290   : > { %v2264_v62 = vadd.f32 1e-05, %v2263_v61 }
0x1292   : > { %2903 = vrsqrt.f32 %v2264_v62 }
0x129f   : > { %v2904_v63 = vpop.eup %2903 }
0x12a0   : > { %v2266_v2 = vmul.f32 %v2904_v63, %v2258_v42 }
0x12a2   : > { %v2273_v6 = vmul.f32 %v2596_v0, %v2266_v2 }
0x12a4   : > { %v2280_v4 = vadd.f32 %v2597_v3, %v2273_v6 }
0x12a6   : > { %2794 = vmatmul.mubr.msk.f32.vlgmr.msra.gmra.mxu1 %vm529_vm1, %v2280_v4 }
0x1366   : > { %v2361_v13 = vpop.f32.mrf.mxu1 }
0x1367   : > { %v2362_v14 = vadd.f32 %v2598_v12, %v2361_v13 }
0x1368   : > { %v2795_v16 = vpop.f32.mrf.mxu1 }
0x1369   : > { %v2365_v17 = vmax.f32 %v2362_v14, 0.0 }
0x136b   : > { %2829 = vmatmul.mubr.f32.vlgmr.msra.gmra.mxu0 %v2365_v17 }
0x142b   : > { %v2455_v15 = vpop.f32.mrf.mxu0 }
0x142c   : > { %v2456_v1 = vadd.f32 %v2600_v18, %v2455_v15 }
0x142d   : > { %v2830_v19 = vpop.f32.mrf.mxu0 }
0x142e   : > { %v2459_v20 = vadd.f32 %v2456_v1, %v2280_v4 }
0x1430   : > { %v2462_v21 = vsel %vm529_vm1, %v2459_v20, 0.0 }
0x1431   : > { %2463 = vadd.xlane.f32.xlu1 %v2462_v21 }
0x14ba   : > { %v2464_v22 = vpop.xlane.xlu1 %2463 }
0x14bb   : > { %v2465_v23 = vmul.f32 0.03125, %v2464_v22 }
0x14bd   : > { %v2466_v9 = vsub.f32 %v2459_v20, %v2465_v23 }
0x14bf   : > { %v2467_v24 = vmul.f32 %v2466_v9, %v2466_v9 }
0x14c1   : > { %v2468_v25 = vsel %vm529_vm1, %v2467_v24, 0.0 }
0x14c2   : > { %2469 = vadd.xlane.f32.xlu0 %v2468_v25 }
0x154b   : > { %v2470_v26 = vpop.xlane.xlu0 %2469 }
0x154c   : > { %v2471_v27 = vmul.f32 0.03125, %v2470_v26 }
0x154e   : > { %v2472_v28 = vadd.f32 1e-05, %v2471_v27 }
0x1550   : > { %2905 = vrsqrt.f32 %v2472_v28 }
0x155d   : > { %v2906_v29 = vpop.eup %2905 }
0x155e   : > { %v2474_v31 = vmul.f32 %v2906_v29, %v2466_v9 }
0x1560   : > { %v2481_v33 = vmul.f32 %v2601_v30, %v2474_v31 }
0x1562   : > { %v2488_v34 = vadd.f32 %v2602_v32, %v2481_v33 }
0x1564   : > { %2489 = vst.msk [vmem:[%s512_s28] sm:$0xff] %vm529_vm1, %v2488_v34 }
0x1565   : > { %2920 = shalt.err (!%p2917_p3)
}
0x1566   : > { %s2921_s1 = scalar_lea.hbm %s2502_s2, 128  ;;  %s2925_s20 = scalar_lea.hbm %s3508_s16, 256 }
0x1567   : > { %p2922_p4 = scmp.ne.s32.totalorder %s2502_s2, %s2921_s1  ;;  %p2926_p9 = scmp.lt.s32.totalorder %s2502_s2, %s3508_s16 }
0x1568   : > { %p2927_p10 = scmp.lt.s32.totalorder %s2925_s20, %s2921_s1 }
0x1569   : > { %p2923_p7 = pnand %p2922_p4, %p3110_p5 }
0x156a   : > { %p2928_p11 = por %p2927_p10, %p2926_p9 }
0x156b   : > { %p2924_p8 = pneg %p2923_p7 }
0x156d   : > { %p2929_p12 = pnand %p2928_p11, %p2924_p8 }
0x156f   : > { %2932 = shalt.err (!%p2929_p12)
}
0x1570   : > { %2831 = dma.vmem_to_hbm [thread:$0]  (%p3110_p5), %s2505_s29, 128, %s2502_s2, %s2491_s3  }
0x1571 PF: > { %p2837_p13 = scmp.ge.s32.totalorder %s2967_s24, 2  ;;  %s2516_s30 = sand.u32 1, %s2955_s21  }
0x1572   : > { %s2517_s17 = scalar_lea.sflag [#allocation3], %s2516_s30 }
0x1573   : > { %p2834_p0 = pnand %p2837_p13, %p3114_p6 }
0x1575   : > { %p2835_p1 = pneg %p2834_p0 }
0x1577   : > { %2950 = dma.done.wait (%p2835_p1), %s2517_s17, 128  }
0x1578   : > { %2952 = vsyncadd (%p2835_p1), %s2517_s17, 4294967168  ;;  %s3528_s24 = sld [smem:[#allocation6_spill]]  ;;  %s3531_s21 = smov %s2959_s22 }
0x1579   : > { %s3529_s18 = sld [smem:[#allocation5_spill]] }
0x157a   : > { %s3530_s23 = sld [smem:[#allocation7_spill]] }
0x157e   : > { %p26_p2 = scmp.ge.s32.totalorder %s3528_s24, 4  }
0x157f   : > { %s3532_s22 = smov %s3529_s18 }
0x1580   :  { %28 = sbr.rel (!%p26_p2) target bundleno = 8 (0x8), region = 119 }
0x1585   :  { %2522 = vsyncpa [#allocation3], 1 }
0x1586   :  { %2524 = vsyncpa [#allocation3 + $0x1], 1 }

</bundles_post_ra>
